<compile_context>
chip_gen: v6e
topology: v6e:2x2x1
jax: 0.10.0
libtpu: 0.0.40
codegen_flags: <defaults>
</compile_context>

<pallas_src>
from functools import partial

import jax
import jax.numpy as jnp
from jax import lax
from jax.experimental import pallas as pl
from jax.experimental.pallas import tpu as pltpu

C_IN = 4
C_OUT = 4
VMEM_LIMIT_BYTES = 32 * 1024 * 1024      # safe on v5e/v6e/v7x scoped VMEM
MAX_BLOCK_BYTES = 8 * 1024 * 1024        # whole-image block budget (pre double-buffer)

# Each branch: (#rot90 applied to the model input, transpose-input-first,
#               #rot90 applied to the model output, transpose-output-last).
# This is literally the aug/de-aug pairing of the PyTorch module:
#   group 1: aug = rot90^k,      de-aug = rot90^(4-k)
#   group 2: aug = rot90^k ∘ T,  de-aug = T ∘ rot90^(4-k)
_BRANCHES = (
    (0, False, 0, False),
    (1, False, 3, False),
    (2, False, 2, False),
    (3, False, 1, False),
    (0, True, 0, True),
    (1, True, 3, True),
    (2, True, 2, True),
    (3, True, 1, True),
)


def _mm_nt(a, x):
    """result[i, j] = sum_k a[i, k] * x[j, k]  ==  a @ x^T   (MXU matmul)."""
    return lax.dot_general(
        a, x,
        dimension_numbers=(((1,), (1,)), ((), ())),
        preferred_element_type=jnp.float32,
    )


# ----------------------------------------------------------------------------
# Fused kernel: aug -> pointwise-conv model -> de-aug -> sum -> scale,
# for all 8 D4 branches, on one whole-image block.
# ----------------------------------------------------------------------------
def _fused_d4_kernel(w_ref, b_ref, x_ref, o_ref, *, c_in, c_out, scale):
    # w_ref: SMEM (c_out, c_in)    b_ref: SMEM (c_out,)
    # x_ref: VMEM (c_in, S, S)     o_ref: VMEM (c_out, S, S)
    s = x_ref.shape[-1]

    # Constant D4 permutation matrices (hoisted out of the branch loop):
    #   transpose(x) = eye  @ x^T
    #   rot90(x)     = anti @ x^T      (== jnp.rot90(x, 1): out[i,j] = x[j, S-1-i])
    row = lax.broadcasted_iota(jnp.int32, (s, s), 0)
    col = lax.broadcasted_iota(jnp.int32, (s, s), 1)
    one = jnp.float32(1.0)
    zero = jnp.float32(0.0)
    eye = jnp.where(row == col, one, zero)
    anti = jnp.where(row + col == s - 1, one, zero)

    # Load each input channel once as a full (S, S) plane.
    xs = [x_ref[c] for c in range(c_in)]
    acc = [jnp.zeros((s, s), jnp.float32) for _ in range(c_out)]

    for k_aug, pre_t, k_deaug, post_t in _BRANCHES:
        # ---- augment the input (full (S, S) planes, MXU permutations) -----
        aug = []
        for c in range(c_in):
            xc = xs[c]
            if pre_t:
                xc = _mm_nt(eye, xc)             # transpose
            for _ in range(k_aug):
                xc = _mm_nt(anti, xc)            # rot90
            aug.append(xc)
        # ---- synthetic model: pointwise 1x1 conv (VPU full-plane FMAs) ----
        for o in range(c_out):
            y = aug[0] * w_ref[o, 0]
            for c in range(1, c_in):
                y = y + aug[c] * w_ref[o, c]
            y = y + b_ref[o]
            # ---- de-augment this output and accumulate --------------------
            for _ in range(k_deaug):
                y = _mm_nt(anti, y)              # rot90
            if post_t:
                y = _mm_nt(eye, y)               # transpose
            acc[o] = acc[o] + y

    for o in range(c_out):
        o_ref[o] = acc[o] * scale                # dense full-plane stores


# ----------------------------------------------------------------------------
# D4TTA forward (same math as the PyTorch module), single pallas_call.
# ----------------------------------------------------------------------------
def d4_tta_forward(image, w, b, output_keys=("mask",), average=True):
    N, C, H, W = image.shape
    assert H == W, "D4 TTA requires square spatial dims"
    c_out = w.shape[0]
    assert w.shape == (c_out, C) and b.shape == (c_out,)

    # Whole-image blocks: one grid step per image, all 8 TTA branches fused.
    block_bytes = (C + c_out) * H * W * 4
    assert block_bytes <= MAX_BLOCK_BYTES, (
        "image too large for whole-image blocks; add spatial tiling "
        "(see TODO at top of file)")

    scale = (1.0 / 8.0) if average else 1.0
    mask = pl.pallas_call(
        partial(_fused_d4_kernel, c_in=C, c_out=c_out, scale=scale),
        out_shape=jax.ShapeDtypeStruct((N, c_out, H, W), jnp.float32),
        grid_spec=pltpu.PrefetchScalarGridSpec(
            num_scalar_prefetch=0,
            grid=(N,),
            in_specs=[
                pl.BlockSpec(memory_space=pltpu.MemorySpace.SMEM),   # weights (c_out, C)
                pl.BlockSpec(memory_space=pltpu.MemorySpace.SMEM),   # bias (c_out,)
                pl.BlockSpec((pl.Squeezed(), C, H, W),
                             lambda i: (i, 0, 0, 0)),
            ],
            out_specs=pl.BlockSpec((pl.Squeezed(), c_out, H, W),
                                   lambda i: (i, 0, 0, 0)),
        ),
        compiler_params=pltpu.CompilerParams(
            dimension_semantics=("parallel",),
            vmem_limit_bytes=VMEM_LIMIT_BYTES,
        ),
    )(w.astype(jnp.float32), b.astype(jnp.float32), image.astype(jnp.float32))

    # TODO(synk): the original wraps an arbitrary nn.Module `model`; a synthetic
    # pointwise 1x1-conv model is used since no checkpoint/architecture is given.
    return {key: mask for key in output_keys}


# ----------------------------------------------------------------------------
# Pure-JAX reference (correctness check, mirrors the PyTorch module exactly).
# ----------------------------------------------------------------------------
def _rot(x, k):
    return jnp.rot90(x, k=k, axes=(2, 3))


def _transpose(x):
    return jnp.swapaxes(x, 2, 3)


def _ref_model(image, w, b):
    out = jnp.einsum("oc,nchw->nohw", w, image) + b[None, :, None, None]
    return {"mask": out}


def _ref_d4(image, w, b, average=True):
    outputs = {k: v for k, v in _ref_model(image, w, b).items()}
    for k_aug, k_deaug in zip((1, 2, 3), (3, 2, 1)):
        aug_out = _ref_model(_rot(image, k_aug), w, b)
        for key in outputs:
            outputs[key] = outputs[key] + _rot(aug_out[key], k_deaug)
    image_t = _transpose(image)
    for k_aug, k_deaug in zip((0, 1, 2, 3), (0, 3, 2, 1)):
        aug_out = _ref_model(_rot(image_t, k_aug), w, b)
        for key in outputs:
            x = _rot(aug_out[key], k_deaug)
            outputs[key] = outputs[key] + _transpose(x)
    if average:
        for key in outputs:
            outputs[key] = outputs[key] * (1.0 / 8.0)
    return outputs


if __name__ == "__main__":
    key = jax.random.PRNGKey(0)
    k_img, k_w, k_b = jax.random.split(key, 3)

    # Small shapes: batch=2, channels=4, spatial=16x16 (square, as D4 requires).
    image = jax.random.normal(k_img, (2, C_IN, 16, 16), dtype=jnp.float32)
    w = jax.random.normal(k_w, (C_OUT, C_IN), dtype=jnp.float32) * 0.5
    b = jax.random.normal(k_b, (C_OUT,), dtype=jnp.float32) * 0.1

    fwd = jax.jit(lambda img: d4_tta_forward(img, w, b,
                                             output_keys=("mask",),
                                             average=True))
    out = fwd(image)
    out = jax.tree_util.tree_map(jax.block_until_ready, out)

    ref = _ref_d4(image, w, b, average=True)
    assert out["mask"].shape == (2, C_OUT, 16, 16)
    # Tolerance note: the in-kernel D4 permutations go through the MXU; if the
    # compiler chooses a reduced-precision (bf16-pass) f32 matmul the exact
    # 0/1 permutation still only introduces ~bf16-level rounding of the data,
    # so 1e-2 comfortably covers it while still catching any wrong rotation /
    # transpose / branch pairing (which would produce O(1) errors).
    assert jnp.allclose(out["mask"], ref["mask"], atol=1e-2, rtol=1e-2), (
        "Pallas D4TTA output mismatch vs pure-JAX reference"
    )

    print("KERNEL_OK")
</pallas_src>

<mosaic_0001>
module attributes {stable_mosaic.version = 11 : i64} {
  func.func @_fused_d4_kernel(%arg0: i32, %arg1: memref<4x4xf32, #tpu.memory_space<smem>>, %arg2: memref<4xf32, #tpu.memory_space<smem>>, %arg3: memref<1x4x16x16xf32, #tpu.memory_space<vmem>>, %arg4: memref<1x4x16x16xf32, #tpu.memory_space<vmem>>) attributes {dimension_semantics = [#tpu.dimension_semantics<parallel>], iteration_bounds = array<i64: 2>, scalar_prefetch = 0 : i64, scratch_operands = 0 : i64, tpu.core_type = #tpu.core_type<tc>, window_params = [{transform_indices = @transform_0, window_bounds = array<i64: 4, 4>}, {transform_indices = @transform_1, window_bounds = array<i64: 4>}, {transform_indices = @transform_2, window_bounds = array<i64: 1, 4, 16, 16>}, {transform_indices = @transform_3, window_bounds = array<i64: 1, 4, 16, 16>}]} {
    %0 = tpu.iota {dimensions = array<i32: 0>} : vector<16x16xi32>
    %1 = tpu.iota {dimensions = array<i32: 1>} : vector<16x16xi32>
    %2 = arith.cmpi eq, %0, %1 : vector<16x16xi32>
    %cst = arith.constant 1.000000e+00 : f32
    %cst_0 = arith.constant 0.000000e+00 : f32
    %3 = vector.broadcast %cst : f32 to vector<16x16xf32>
    %4 = vector.broadcast %cst_0 : f32 to vector<16x16xf32>
    %5 = arith.select %2, %3, %4 : vector<16x16xi1>, vector<16x16xf32>
    %6 = arith.addi %0, %1 : vector<16x16xi32>
    %c15_i32 = arith.constant 15 : i32
    %7 = vector.broadcast %c15_i32 : i32 to vector<16x16xi32>
    %8 = arith.cmpi eq, %6, %7 : vector<16x16xi32>
    %cst_1 = arith.constant 1.000000e+00 : f32
    %cst_2 = arith.constant 0.000000e+00 : f32
    %9 = vector.broadcast %cst_1 : f32 to vector<16x16xf32>
    %10 = vector.broadcast %cst_2 : f32 to vector<16x16xf32>
    %11 = arith.select %8, %9, %10 : vector<16x16xi1>, vector<16x16xf32>
    %c0 = arith.constant 0 : index
    %c0_3 = arith.constant 0 : index
    %c0_4 = arith.constant 0 : index
    %c0_5 = arith.constant 0 : index
    %12 = vector.load %arg3[%c0, %c0_3, %c0_4, %c0_5] : memref<1x4x16x16xf32, #tpu.memory_space<vmem>>, vector<1x1x16x16xf32>
    %13 = vector.shape_cast %12 : vector<1x1x16x16xf32> to vector<16x16xf32>
    %c0_6 = arith.constant 0 : index
    %c1 = arith.constant 1 : index
    %c0_7 = arith.constant 0 : index
    %c0_8 = arith.constant 0 : index
    %14 = vector.load %arg3[%c0_6, %c1, %c0_7, %c0_8] : memref<1x4x16x16xf32, #tpu.memory_space<vmem>>, vector<1x1x16x16xf32>
    %15 = vector.shape_cast %14 : vector<1x1x16x16xf32> to vector<16x16xf32>
    %c0_9 = arith.constant 0 : index
    %c2 = arith.constant 2 : index
    %c0_10 = arith.constant 0 : index
    %c0_11 = arith.constant 0 : index
    %16 = vector.load %arg3[%c0_9, %c2, %c0_10, %c0_11] : memref<1x4x16x16xf32, #tpu.memory_space<vmem>>, vector<1x1x16x16xf32>
    %17 = vector.shape_cast %16 : vector<1x1x16x16xf32> to vector<16x16xf32>
    %c0_12 = arith.constant 0 : index
    %c3 = arith.constant 3 : index
    %c0_13 = arith.constant 0 : index
    %c0_14 = arith.constant 0 : index
    %18 = vector.load %arg3[%c0_12, %c3, %c0_13, %c0_14] : memref<1x4x16x16xf32, #tpu.memory_space<vmem>>, vector<1x1x16x16xf32>
    %19 = vector.shape_cast %18 : vector<1x1x16x16xf32> to vector<16x16xf32>
    %cst_15 = arith.constant 0.000000e+00 : f32
    %20 = vector.broadcast %cst_15 : f32 to vector<16x16xf32>
    %cst_16 = arith.constant 0.000000e+00 : f32
    %21 = vector.broadcast %cst_16 : f32 to vector<16x16xf32>
    %cst_17 = arith.constant 0.000000e+00 : f32
    %22 = vector.broadcast %cst_17 : f32 to vector<16x16xf32>
    %cst_18 = arith.constant 0.000000e+00 : f32
    %23 = vector.broadcast %cst_18 : f32 to vector<16x16xf32>
    %c0_19 = arith.constant 0 : index
    %c0_20 = arith.constant 0 : index
    %24 = memref.load %arg1[%c0_19, %c0_20] : memref<4x4xf32, #tpu.memory_space<smem>>
    %25 = vector.broadcast %24 : f32 to vector<16x16xf32>
    %26 = arith.mulf %13, %25 : vector<16x16xf32>
    %c0_21 = arith.constant 0 : index
    %c1_22 = arith.constant 1 : index
    %27 = memref.load %arg1[%c0_21, %c1_22] : memref<4x4xf32, #tpu.memory_space<smem>>
    %28 = vector.broadcast %27 : f32 to vector<16x16xf32>
    %29 = arith.mulf %15, %28 : vector<16x16xf32>
    %30 = arith.addf %26, %29 : vector<16x16xf32>
    %c0_23 = arith.constant 0 : index
    %c2_24 = arith.constant 2 : index
    %31 = memref.load %arg1[%c0_23, %c2_24] : memref<4x4xf32, #tpu.memory_space<smem>>
    %32 = vector.broadcast %31 : f32 to vector<16x16xf32>
    %33 = arith.mulf %17, %32 : vector<16x16xf32>
    %34 = arith.addf %30, %33 : vector<16x16xf32>
    %c0_25 = arith.constant 0 : index
    %c3_26 = arith.constant 3 : index
    %35 = memref.load %arg1[%c0_25, %c3_26] : memref<4x4xf32, #tpu.memory_space<smem>>
    %36 = vector.broadcast %35 : f32 to vector<16x16xf32>
    %37 = arith.mulf %19, %36 : vector<16x16xf32>
    %38 = arith.addf %34, %37 : vector<16x16xf32>
    %c0_27 = arith.constant 0 : index
    %39 = memref.load %arg2[%c0_27] : memref<4xf32, #tpu.memory_space<smem>>
    %40 = vector.broadcast %39 : f32 to vector<16x16xf32>
    %41 = arith.addf %38, %40 : vector<16x16xf32>
    %42 = arith.addf %20, %41 : vector<16x16xf32>
    %c1_28 = arith.constant 1 : index
    %c0_29 = arith.constant 0 : index
    %43 = memref.load %arg1[%c1_28, %c0_29] : memref<4x4xf32, #tpu.memory_space<smem>>
    %44 = vector.broadcast %43 : f32 to vector<16x16xf32>
    %45 = arith.mulf %13, %44 : vector<16x16xf32>
    %c1_30 = arith.constant 1 : index
    %c1_31 = arith.constant 1 : index
    %46 = memref.load %arg1[%c1_30, %c1_31] : memref<4x4xf32, #tpu.memory_space<smem>>
    %47 = vector.broadcast %46 : f32 to vector<16x16xf32>
    %48 = arith.mulf %15, %47 : vector<16x16xf32>
    %49 = arith.addf %45, %48 : vector<16x16xf32>
    %c1_32 = arith.constant 1 : index
    %c2_33 = arith.constant 2 : index
    %50 = memref.load %arg1[%c1_32, %c2_33] : memref<4x4xf32, #tpu.memory_space<smem>>
    %51 = vector.broadcast %50 : f32 to vector<16x16xf32>
    %52 = arith.mulf %17, %51 : vector<16x16xf32>
    %53 = arith.addf %49, %52 : vector<16x16xf32>
    %c1_34 = arith.constant 1 : index
    %c3_35 = arith.constant 3 : index
    %54 = memref.load %arg1[%c1_34, %c3_35] : memref<4x4xf32, #tpu.memory_space<smem>>
    %55 = vector.broadcast %54 : f32 to vector<16x16xf32>
    %56 = arith.mulf %19, %55 : vector<16x16xf32>
    %57 = arith.addf %53, %56 : vector<16x16xf32>
    %c1_36 = arith.constant 1 : index
    %58 = memref.load %arg2[%c1_36] : memref<4xf32, #tpu.memory_space<smem>>
    %59 = vector.broadcast %58 : f32 to vector<16x16xf32>
    %60 = arith.addf %57, %59 : vector<16x16xf32>
    %61 = arith.addf %21, %60 : vector<16x16xf32>
    %c2_37 = arith.constant 2 : index
    %c0_38 = arith.constant 0 : index
    %62 = memref.load %arg1[%c2_37, %c0_38] : memref<4x4xf32, #tpu.memory_space<smem>>
    %63 = vector.broadcast %62 : f32 to vector<16x16xf32>
    %64 = arith.mulf %13, %63 : vector<16x16xf32>
    %c2_39 = arith.constant 2 : index
    %c1_40 = arith.constant 1 : index
    %65 = memref.load %arg1[%c2_39, %c1_40] : memref<4x4xf32, #tpu.memory_space<smem>>
    %66 = vector.broadcast %65 : f32 to vector<16x16xf32>
    %67 = arith.mulf %15, %66 : vector<16x16xf32>
    %68 = arith.addf %64, %67 : vector<16x16xf32>
    %c2_41 = arith.constant 2 : index
    %c2_42 = arith.constant 2 : index
    %69 = memref.load %arg1[%c2_41, %c2_42] : memref<4x4xf32, #tpu.memory_space<smem>>
    %70 = vector.broadcast %69 : f32 to vector<16x16xf32>
    %71 = arith.mulf %17, %70 : vector<16x16xf32>
    %72 = arith.addf %68, %71 : vector<16x16xf32>
    %c2_43 = arith.constant 2 : index
    %c3_44 = arith.constant 3 : index
    %73 = memref.load %arg1[%c2_43, %c3_44] : memref<4x4xf32, #tpu.memory_space<smem>>
    %74 = vector.broadcast %73 : f32 to vector<16x16xf32>
    %75 = arith.mulf %19, %74 : vector<16x16xf32>
    %76 = arith.addf %72, %75 : vector<16x16xf32>
    %c2_45 = arith.constant 2 : index
    %77 = memref.load %arg2[%c2_45] : memref<4xf32, #tpu.memory_space<smem>>
    %78 = vector.broadcast %77 : f32 to vector<16x16xf32>
    %79 = arith.addf %76, %78 : vector<16x16xf32>
    %80 = arith.addf %22, %79 : vector<16x16xf32>
    %c3_46 = arith.constant 3 : index
    %c0_47 = arith.constant 0 : index
    %81 = memref.load %arg1[%c3_46, %c0_47] : memref<4x4xf32, #tpu.memory_space<smem>>
    %82 = vector.broadcast %81 : f32 to vector<16x16xf32>
    %83 = arith.mulf %13, %82 : vector<16x16xf32>
    %c3_48 = arith.constant 3 : index
    %c1_49 = arith.constant 1 : index
    %84 = memref.load %arg1[%c3_48, %c1_49] : memref<4x4xf32, #tpu.memory_space<smem>>
    %85 = vector.broadcast %84 : f32 to vector<16x16xf32>
    %86 = arith.mulf %15, %85 : vector<16x16xf32>
    %87 = arith.addf %83, %86 : vector<16x16xf32>
    %c3_50 = arith.constant 3 : index
    %c2_51 = arith.constant 2 : index
    %88 = memref.load %arg1[%c3_50, %c2_51] : memref<4x4xf32, #tpu.memory_space<smem>>
    %89 = vector.broadcast %88 : f32 to vector<16x16xf32>
    %90 = arith.mulf %17, %89 : vector<16x16xf32>
    %91 = arith.addf %87, %90 : vector<16x16xf32>
    %c3_52 = arith.constant 3 : index
    %c3_53 = arith.constant 3 : index
    %92 = memref.load %arg1[%c3_52, %c3_53] : memref<4x4xf32, #tpu.memory_space<smem>>
    %93 = vector.broadcast %92 : f32 to vector<16x16xf32>
    %94 = arith.mulf %19, %93 : vector<16x16xf32>
    %95 = arith.addf %91, %94 : vector<16x16xf32>
    %c3_54 = arith.constant 3 : index
    %96 = memref.load %arg2[%c3_54] : memref<4xf32, #tpu.memory_space<smem>>
    %97 = vector.broadcast %96 : f32 to vector<16x16xf32>
    %98 = arith.addf %95, %97 : vector<16x16xf32>
    %99 = arith.addf %23, %98 : vector<16x16xf32>
    %cst_55 = arith.constant dense<0.000000e+00> : vector<16x16xf32>
    %100 = tpu.matmul %11, %13, %cst_55 {dimension_numbers = #tpu.dot_dimension_numbers<[1], [1], [0], [0], [0, 0, 1, 0], [], []>} : vector<16x16xf32>, vector<16x16xf32>, vector<16x16xf32> -> vector<16x16xf32>
    %cst_56 = arith.constant dense<0.000000e+00> : vector<16x16xf32>
    %101 = tpu.matmul %11, %15, %cst_56 {dimension_numbers = #tpu.dot_dimension_numbers<[1], [1], [0], [0], [0, 0, 1, 0], [], []>} : vector<16x16xf32>, vector<16x16xf32>, vector<16x16xf32> -> vector<16x16xf32>
    %cst_57 = arith.constant dense<0.000000e+00> : vector<16x16xf32>
    %102 = tpu.matmul %11, %17, %cst_57 {dimension_numbers = #tpu.dot_dimension_numbers<[1], [1], [0], [0], [0, 0, 1, 0], [], []>} : vector<16x16xf32>, vector<16x16xf32>, vector<16x16xf32> -> vector<16x16xf32>
    %cst_58 = arith.constant dense<0.000000e+00> : vector<16x16xf32>
    %103 = tpu.matmul %11, %19, %cst_58 {dimension_numbers = #tpu.dot_dimension_numbers<[1], [1], [0], [0], [0, 0, 1, 0], [], []>} : vector<16x16xf32>, vector<16x16xf32>, vector<16x16xf32> -> vector<16x16xf32>
    %c0_59 = arith.constant 0 : index
    %c0_60 = arith.constant 0 : index
    %104 = memref.load %arg1[%c0_59, %c0_60] : memref<4x4xf32, #tpu.memory_space<smem>>
    %105 = vector.broadcast %104 : f32 to vector<16x16xf32>
    %106 = arith.mulf %100, %105 : vector<16x16xf32>
    %c0_61 = arith.constant 0 : index
    %c1_62 = arith.constant 1 : index
    %107 = memref.load %arg1[%c0_61, %c1_62] : memref<4x4xf32, #tpu.memory_space<smem>>
    %108 = vector.broadcast %107 : f32 to vector<16x16xf32>
    %109 = arith.mulf %101, %108 : vector<16x16xf32>
    %110 = arith.addf %106, %109 : vector<16x16xf32>
    %c0_63 = arith.constant 0 : index
    %c2_64 = arith.constant 2 : index
    %111 = memref.load %arg1[%c0_63, %c2_64] : memref<4x4xf32, #tpu.memory_space<smem>>
    %112 = vector.broadcast %111 : f32 to vector<16x16xf32>
    %113 = arith.mulf %102, %112 : vector<16x16xf32>
    %114 = arith.addf %110, %113 : vector<16x16xf32>
    %c0_65 = arith.constant 0 : index
    %c3_66 = arith.constant 3 : index
    %115 = memref.load %arg1[%c0_65, %c3_66] : memref<4x4xf32, #tpu.memory_space<smem>>
    %116 = vector.broadcast %115 : f32 to vector<16x16xf32>
    %117 = arith.mulf %103, %116 : vector<16x16xf32>
    %118 = arith.addf %114, %117 : vector<16x16xf32>
    %c0_67 = arith.constant 0 : index
    %119 = memref.load %arg2[%c0_67] : memref<4xf32, #tpu.memory_space<smem>>
    %120 = vector.broadcast %119 : f32 to vector<16x16xf32>
    %121 = arith.addf %118, %120 : vector<16x16xf32>
    %cst_68 = arith.constant dense<0.000000e+00> : vector<16x16xf32>
    %122 = tpu.matmul %11, %121, %cst_68 {dimension_numbers = #tpu.dot_dimension_numbers<[1], [1], [0], [0], [0, 0, 1, 0], [], []>} : vector<16x16xf32>, vector<16x16xf32>, vector<16x16xf32> -> vector<16x16xf32>
    %cst_69 = arith.constant dense<0.000000e+00> : vector<16x16xf32>
    %123 = tpu.matmul %11, %122, %cst_69 {dimension_numbers = #tpu.dot_dimension_numbers<[1], [1], [0], [0], [0, 0, 1, 0], [], []>} : vector<16x16xf32>, vector<16x16xf32>, vector<16x16xf32> -> vector<16x16xf32>
    %cst_70 = arith.constant dense<0.000000e+00> : vector<16x16xf32>
    %124 = tpu.matmul %11, %123, %cst_70 {dimension_numbers = #tpu.dot_dimension_numbers<[1], [1], [0], [0], [0, 0, 1, 0], [], []>} : vector<16x16xf32>, vector<16x16xf32>, vector<16x16xf32> -> vector<16x16xf32>
    %125 = arith.addf %42, %124 : vector<16x16xf32>
    %c1_71 = arith.constant 1 : index
    %c0_72 = arith.constant 0 : index
    %126 = memref.load %arg1[%c1_71, %c0_72] : memref<4x4xf32, #tpu.memory_space<smem>>
    %127 = vector.broadcast %126 : f32 to vector<16x16xf32>
    %128 = arith.mulf %100, %127 : vector<16x16xf32>
    %c1_73 = arith.constant 1 : index
    %c1_74 = arith.constant 1 : index
    %129 = memref.load %arg1[%c1_73, %c1_74] : memref<4x4xf32, #tpu.memory_space<smem>>
    %130 = vector.broadcast %129 : f32 to vector<16x16xf32>
    %131 = arith.mulf %101, %130 : vector<16x16xf32>
    %132 = arith.addf %128, %131 : vector<16x16xf32>
    %c1_75 = arith.constant 1 : index
    %c2_76 = arith.constant 2 : index
    %133 = memref.load %arg1[%c1_75, %c2_76] : memref<4x4xf32, #tpu.memory_space<smem>>
    %134 = vector.broadcast %133 : f32 to vector<16x16xf32>
    %135 = arith.mulf %102, %134 : vector<16x16xf32>
    %136 = arith.addf %132, %135 : vector<16x16xf32>
    %c1_77 = arith.constant 1 : index
    %c3_78 = arith.constant 3 : index
    %137 = memref.load %arg1[%c1_77, %c3_78] : memref<4x4xf32, #tpu.memory_space<smem>>
    %138 = vector.broadcast %137 : f32 to vector<16x16xf32>
    %139 = arith.mulf %103, %138 : vector<16x16xf32>
    %140 = arith.addf %136, %139 : vector<16x16xf32>
    %c1_79 = arith.constant 1 : index
    %141 = memref.load %arg2[%c1_79] : memref<4xf32, #tpu.memory_space<smem>>
    %142 = vector.broadcast %141 : f32 to vector<16x16xf32>
    %143 = arith.addf %140, %142 : vector<16x16xf32>
    %cst_80 = arith.constant dense<0.000000e+00> : vector<16x16xf32>
    %144 = tpu.matmul %11, %143, %cst_80 {dimension_numbers = #tpu.dot_dimension_numbers<[1], [1], [0], [0], [0, 0, 1, 0], [], []>} : vector<16x16xf32>, vector<16x16xf32>, vector<16x16xf32> -> vector<16x16xf32>
    %cst_81 = arith.constant dense<0.000000e+00> : vector<16x16xf32>
    %145 = tpu.matmul %11, %144, %cst_81 {dimension_numbers = #tpu.dot_dimension_numbers<[1], [1], [0], [0], [0, 0, 1, 0], [], []>} : vector<16x16xf32>, vector<16x16xf32>, vector<16x16xf32> -> vector<16x16xf32>
    %cst_82 = arith.constant dense<0.000000e+00> : vector<16x16xf32>
    %146 = tpu.matmul %11, %145, %cst_82 {dimension_numbers = #tpu.dot_dimension_numbers<[1], [1], [0], [0], [0, 0, 1, 0], [], []>} : vector<16x16xf32>, vector<16x16xf32>, vector<16x16xf32> -> vector<16x16xf32>
    %147 = arith.addf %61, %146 : vector<16x16xf32>
    %c2_83 = arith.constant 2 : index
    %c0_84 = arith.constant 0 : index
    %148 = memref.load %arg1[%c2_83, %c0_84] : memref<4x4xf32, #tpu.memory_space<smem>>
    %149 = vector.broadcast %148 : f32 to vector<16x16xf32>
    %150 = arith.mulf %100, %149 : vector<16x16xf32>
    %c2_85 = arith.constant 2 : index
    %c1_86 = arith.constant 1 : index
    %151 = memref.load %arg1[%c2_85, %c1_86] : memref<4x4xf32, #tpu.memory_space<smem>>
    %152 = vector.broadcast %151 : f32 to vector<16x16xf32>
    %153 = arith.mulf %101, %152 : vector<16x16xf32>
    %154 = arith.addf %150, %153 : vector<16x16xf32>
    %c2_87 = arith.constant 2 : index
    %c2_88 = arith.constant 2 : index
    %155 = memref.load %arg1[%c2_87, %c2_88] : memref<4x4xf32, #tpu.memory_space<smem>>
    %156 = vector.broadcast %155 : f32 to vector<16x16xf32>
    %157 = arith.mulf %102, %156 : vector<16x16xf32>
    %158 = arith.addf %154, %157 : vector<16x16xf32>
    %c2_89 = arith.constant 2 : index
    %c3_90 = arith.constant 3 : index
    %159 = memref.load %arg1[%c2_89, %c3_90] : memref<4x4xf32, #tpu.memory_space<smem>>
    %160 = vector.broadcast %159 : f32 to vector<16x16xf32>
    %161 = arith.mulf %103, %160 : vector<16x16xf32>
    %162 = arith.addf %158, %161 : vector<16x16xf32>
    %c2_91 = arith.constant 2 : index
    %163 = memref.load %arg2[%c2_91] : memref<4xf32, #tpu.memory_space<smem>>
    %164 = vector.broadcast %163 : f32 to vector<16x16xf32>
    %165 = arith.addf %162, %164 : vector<16x16xf32>
    %cst_92 = arith.constant dense<0.000000e+00> : vector<16x16xf32>
    %166 = tpu.matmul %11, %165, %cst_92 {dimension_numbers = #tpu.dot_dimension_numbers<[1], [1], [0], [0], [0, 0, 1, 0], [], []>} : vector<16x16xf32>, vector<16x16xf32>, vector<16x16xf32> -> vector<16x16xf32>
    %cst_93 = arith.constant dense<0.000000e+00> : vector<16x16xf32>
    %167 = tpu.matmul %11, %166, %cst_93 {dimension_numbers = #tpu.dot_dimension_numbers<[1], [1], [0], [0], [0, 0, 1, 0], [], []>} : vector<16x16xf32>, vector<16x16xf32>, vector<16x16xf32> -> vector<16x16xf32>
    %cst_94 = arith.constant dense<0.000000e+00> : vector<16x16xf32>
    %168 = tpu.matmul %11, %167, %cst_94 {dimension_numbers = #tpu.dot_dimension_numbers<[1], [1], [0], [0], [0, 0, 1, 0], [], []>} : vector<16x16xf32>, vector<16x16xf32>, vector<16x16xf32> -> vector<16x16xf32>
    %169 = arith.addf %80, %168 : vector<16x16xf32>
    %c3_95 = arith.constant 3 : index
    %c0_96 = arith.constant 0 : index
    %170 = memref.load %arg1[%c3_95, %c0_96] : memref<4x4xf32, #tpu.memory_space<smem>>
    %171 = vector.broadcast %170 : f32 to vector<16x16xf32>
    %172 = arith.mulf %100, %171 : vector<16x16xf32>
    %c3_97 = arith.constant 3 : index
    %c1_98 = arith.constant 1 : index
    %173 = memref.load %arg1[%c3_97, %c1_98] : memref<4x4xf32, #tpu.memory_space<smem>>
    %174 = vector.broadcast %173 : f32 to vector<16x16xf32>
    %175 = arith.mulf %101, %174 : vector<16x16xf32>
    %176 = arith.addf %172, %175 : vector<16x16xf32>
    %c3_99 = arith.constant 3 : index
    %c2_100 = arith.constant 2 : index
    %177 = memref.load %arg1[%c3_99, %c2_100] : memref<4x4xf32, #tpu.memory_space<smem>>
    %178 = vector.broadcast %177 : f32 to vector<16x16xf32>
    %179 = arith.mulf %102, %178 : vector<16x16xf32>
    %180 = arith.addf %176, %179 : vector<16x16xf32>
    %c3_101 = arith.constant 3 : index
    %c3_102 = arith.constant 3 : index
    %181 = memref.load %arg1[%c3_101, %c3_102] : memref<4x4xf32, #tpu.memory_space<smem>>
    %182 = vector.broadcast %181 : f32 to vector<16x16xf32>
    %183 = arith.mulf %103, %182 : vector<16x16xf32>
    %184 = arith.addf %180, %183 : vector<16x16xf32>
    %c3_103 = arith.constant 3 : index
    %185 = memref.load %arg2[%c3_103] : memref<4xf32, #tpu.memory_space<smem>>
    %186 = vector.broadcast %185 : f32 to vector<16x16xf32>
    %187 = arith.addf %184, %186 : vector<16x16xf32>
    %cst_104 = arith.constant dense<0.000000e+00> : vector<16x16xf32>
    %188 = tpu.matmul %11, %187, %cst_104 {dimension_numbers = #tpu.dot_dimension_numbers<[1], [1], [0], [0], [0, 0, 1, 0], [], []>} : vector<16x16xf32>, vector<16x16xf32>, vector<16x16xf32> -> vector<16x16xf32>
    %cst_105 = arith.constant dense<0.000000e+00> : vector<16x16xf32>
    %189 = tpu.matmul %11, %188, %cst_105 {dimension_numbers = #tpu.dot_dimension_numbers<[1], [1], [0], [0], [0, 0, 1, 0], [], []>} : vector<16x16xf32>, vector<16x16xf32>, vector<16x16xf32> -> vector<16x16xf32>
    %cst_106 = arith.constant dense<0.000000e+00> : vector<16x16xf32>
    %190 = tpu.matmul %11, %189, %cst_106 {dimension_numbers = #tpu.dot_dimension_numbers<[1], [1], [0], [0], [0, 0, 1, 0], [], []>} : vector<16x16xf32>, vector<16x16xf32>, vector<16x16xf32> -> vector<16x16xf32>
    %191 = arith.addf %99, %190 : vector<16x16xf32>
    %cst_107 = arith.constant dense<0.000000e+00> : vector<16x16xf32>
    %192 = tpu.matmul %11, %13, %cst_107 {dimension_numbers = #tpu.dot_dimension_numbers<[1], [1], [0], [0], [0, 0, 1, 0], [], []>} : vector<16x16xf32>, vector<16x16xf32>, vector<16x16xf32> -> vector<16x16xf32>
    %cst_108 = arith.constant dense<0.000000e+00> : vector<16x16xf32>
    %193 = tpu.matmul %11, %192, %cst_108 {dimension_numbers = #tpu.dot_dimension_numbers<[1], [1], [0], [0], [0, 0, 1, 0], [], []>} : vector<16x16xf32>, vector<16x16xf32>, vector<16x16xf32> -> vector<16x16xf32>
    %cst_109 = arith.constant dense<0.000000e+00> : vector<16x16xf32>
    %194 = tpu.matmul %11, %15, %cst_109 {dimension_numbers = #tpu.dot_dimension_numbers<[1], [1], [0], [0], [0, 0, 1, 0], [], []>} : vector<16x16xf32>, vector<16x16xf32>, vector<16x16xf32> -> vector<16x16xf32>
    %cst_110 = arith.constant dense<0.000000e+00> : vector<16x16xf32>
    %195 = tpu.matmul %11, %194, %cst_110 {dimension_numbers = #tpu.dot_dimension_numbers<[1], [1], [0], [0], [0, 0, 1, 0], [], []>} : vector<16x16xf32>, vector<16x16xf32>, vector<16x16xf32> -> vector<16x16xf32>
    %cst_111 = arith.constant dense<0.000000e+00> : vector<16x16xf32>
    %196 = tpu.matmul %11, %17, %cst_111 {dimension_numbers = #tpu.dot_dimension_numbers<[1], [1], [0], [0], [0, 0, 1, 0], [], []>} : vector<16x16xf32>, vector<16x16xf32>, vector<16x16xf32> -> vector<16x16xf32>
    %cst_112 = arith.constant dense<0.000000e+00> : vector<16x16xf32>
    %197 = tpu.matmul %11, %196, %cst_112 {dimension_numbers = #tpu.dot_dimension_numbers<[1], [1], [0], [0], [0, 0, 1, 0], [], []>} : vector<16x16xf32>, vector<16x16xf32>, vector<16x16xf32> -> vector<16x16xf32>
    %cst_113 = arith.constant dense<0.000000e+00> : vector<16x16xf32>
    %198 = tpu.matmul %11, %19, %cst_113 {dimension_numbers = #tpu.dot_dimension_numbers<[1], [1], [0], [0], [0, 0, 1, 0], [], []>} : vector<16x16xf32>, vector<16x16xf32>, vector<16x16xf32> -> vector<16x16xf32>
    %cst_114 = arith.constant dense<0.000000e+00> : vector<16x16xf32>
    %199 = tpu.matmul %11, %198, %cst_114 {dimension_numbers = #tpu.dot_dimension_numbers<[1], [1], [0], [0], [0, 0, 1, 0], [], []>} : vector<16x16xf32>, vector<16x16xf32>, vector<16x16xf32> -> vector<16x16xf32>
    %c0_115 = arith.constant 0 : index
    %c0_116 = arith.constant 0 : index
    %200 = memref.load %arg1[%c0_115, %c0_116] : memref<4x4xf32, #tpu.memory_space<smem>>
    %201 = vector.broadcast %200 : f32 to vector<16x16xf32>
    %202 = arith.mulf %193, %201 : vector<16x16xf32>
    %c0_117 = arith.constant 0 : index
    %c1_118 = arith.constant 1 : index
    %203 = memref.load %arg1[%c0_117, %c1_118] : memref<4x4xf32, #tpu.memory_space<smem>>
    %204 = vector.broadcast %203 : f32 to vector<16x16xf32>
    %205 = arith.mulf %195, %204 : vector<16x16xf32>
    %206 = arith.addf %202, %205 : vector<16x16xf32>
    %c0_119 = arith.constant 0 : index
    %c2_120 = arith.constant 2 : index
    %207 = memref.load %arg1[%c0_119, %c2_120] : memref<4x4xf32, #tpu.memory_space<smem>>
    %208 = vector.broadcast %207 : f32 to vector<16x16xf32>
    %209 = arith.mulf %197, %208 : vector<16x16xf32>
    %210 = arith.addf %206, %209 : vector<16x16xf32>
    %c0_121 = arith.constant 0 : index
    %c3_122 = arith.constant 3 : index
    %211 = memref.load %arg1[%c0_121, %c3_122] : memref<4x4xf32, #tpu.memory_space<smem>>
    %212 = vector.broadcast %211 : f32 to vector<16x16xf32>
    %213 = arith.mulf %199, %212 : vector<16x16xf32>
    %214 = arith.addf %210, %213 : vector<16x16xf32>
    %c0_123 = arith.constant 0 : index
    %215 = memref.load %arg2[%c0_123] : memref<4xf32, #tpu.memory_space<smem>>
    %216 = vector.broadcast %215 : f32 to vector<16x16xf32>
    %217 = arith.addf %214, %216 : vector<16x16xf32>
    %cst_124 = arith.constant dense<0.000000e+00> : vector<16x16xf32>
    %218 = tpu.matmul %11, %217, %cst_124 {dimension_numbers = #tpu.dot_dimension_numbers<[1], [1], [0], [0], [0, 0, 1, 0], [], []>} : vector<16x16xf32>, vector<16x16xf32>, vector<16x16xf32> -> vector<16x16xf32>
    %cst_125 = arith.constant dense<0.000000e+00> : vector<16x16xf32>
    %219 = tpu.matmul %11, %218, %cst_125 {dimension_numbers = #tpu.dot_dimension_numbers<[1], [1], [0], [0], [0, 0, 1, 0], [], []>} : vector<16x16xf32>, vector<16x16xf32>, vector<16x16xf32> -> vector<16x16xf32>
    %220 = arith.addf %125, %219 : vector<16x16xf32>
    %c1_126 = arith.constant 1 : index
    %c0_127 = arith.constant 0 : index
    %221 = memref.load %arg1[%c1_126, %c0_127] : memref<4x4xf32, #tpu.memory_space<smem>>
    %222 = vector.broadcast %221 : f32 to vector<16x16xf32>
    %223 = arith.mulf %193, %222 : vector<16x16xf32>
    %c1_128 = arith.constant 1 : index
    %c1_129 = arith.constant 1 : index
    %224 = memref.load %arg1[%c1_128, %c1_129] : memref<4x4xf32, #tpu.memory_space<smem>>
    %225 = vector.broadcast %224 : f32 to vector<16x16xf32>
    %226 = arith.mulf %195, %225 : vector<16x16xf32>
    %227 = arith.addf %223, %226 : vector<16x16xf32>
    %c1_130 = arith.constant 1 : index
    %c2_131 = arith.constant 2 : index
    %228 = memref.load %arg1[%c1_130, %c2_131] : memref<4x4xf32, #tpu.memory_space<smem>>
    %229 = vector.broadcast %228 : f32 to vector<16x16xf32>
    %230 = arith.mulf %197, %229 : vector<16x16xf32>
    %231 = arith.addf %227, %230 : vector<16x16xf32>
    %c1_132 = arith.constant 1 : index
    %c3_133 = arith.constant 3 : index
    %232 = memref.load %arg1[%c1_132, %c3_133] : memref<4x4xf32, #tpu.memory_space<smem>>
    %233 = vector.broadcast %232 : f32 to vector<16x16xf32>
    %234 = arith.mulf %199, %233 : vector<16x16xf32>
    %235 = arith.addf %231, %234 : vector<16x16xf32>
    %c1_134 = arith.constant 1 : index
    %236 = memref.load %arg2[%c1_134] : memref<4xf32, #tpu.memory_space<smem>>
    %237 = vector.broadcast %236 : f32 to vector<16x16xf32>
    %238 = arith.addf %235, %237 : vector<16x16xf32>
    %cst_135 = arith.constant dense<0.000000e+00> : vector<16x16xf32>
    %239 = tpu.matmul %11, %238, %cst_135 {dimension_numbers = #tpu.dot_dimension_numbers<[1], [1], [0], [0], [0, 0, 1, 0], [], []>} : vector<16x16xf32>, vector<16x16xf32>, vector<16x16xf32> -> vector<16x16xf32>
    %cst_136 = arith.constant dense<0.000000e+00> : vector<16x16xf32>
    %240 = tpu.matmul %11, %239, %cst_136 {dimension_numbers = #tpu.dot_dimension_numbers<[1], [1], [0], [0], [0, 0, 1, 0], [], []>} : vector<16x16xf32>, vector<16x16xf32>, vector<16x16xf32> -> vector<16x16xf32>
    %241 = arith.addf %147, %240 : vector<16x16xf32>
    %c2_137 = arith.constant 2 : index
    %c0_138 = arith.constant 0 : index
    %242 = memref.load %arg1[%c2_137, %c0_138] : memref<4x4xf32, #tpu.memory_space<smem>>
    %243 = vector.broadcast %242 : f32 to vector<16x16xf32>
    %244 = arith.mulf %193, %243 : vector<16x16xf32>
    %c2_139 = arith.constant 2 : index
    %c1_140 = arith.constant 1 : index
    %245 = memref.load %arg1[%c2_139, %c1_140] : memref<4x4xf32, #tpu.memory_space<smem>>
    %246 = vector.broadcast %245 : f32 to vector<16x16xf32>
    %247 = arith.mulf %195, %246 : vector<16x16xf32>
    %248 = arith.addf %244, %247 : vector<16x16xf32>
    %c2_141 = arith.constant 2 : index
    %c2_142 = arith.constant 2 : index
    %249 = memref.load %arg1[%c2_141, %c2_142] : memref<4x4xf32, #tpu.memory_space<smem>>
    %250 = vector.broadcast %249 : f32 to vector<16x16xf32>
    %251 = arith.mulf %197, %250 : vector<16x16xf32>
    %252 = arith.addf %248, %251 : vector<16x16xf32>
    %c2_143 = arith.constant 2 : index
    %c3_144 = arith.constant 3 : index
    %253 = memref.load %arg1[%c2_143, %c3_144] : memref<4x4xf32, #tpu.memory_space<smem>>
    %254 = vector.broadcast %253 : f32 to vector<16x16xf32>
    %255 = arith.mulf %199, %254 : vector<16x16xf32>
    %256 = arith.addf %252, %255 : vector<16x16xf32>
    %c2_145 = arith.constant 2 : index
    %257 = memref.load %arg2[%c2_145] : memref<4xf32, #tpu.memory_space<smem>>
    %258 = vector.broadcast %257 : f32 to vector<16x16xf32>
    %259 = arith.addf %256, %258 : vector<16x16xf32>
    %cst_146 = arith.constant dense<0.000000e+00> : vector<16x16xf32>
    %260 = tpu.matmul %11, %259, %cst_146 {dimension_numbers = #tpu.dot_dimension_numbers<[1], [1], [0], [0], [0, 0, 1, 0], [], []>} : vector<16x16xf32>, vector<16x16xf32>, vector<16x16xf32> -> vector<16x16xf32>
    %cst_147 = arith.constant dense<0.000000e+00> : vector<16x16xf32>
    %261 = tpu.matmul %11, %260, %cst_147 {dimension_numbers = #tpu.dot_dimension_numbers<[1], [1], [0], [0], [0, 0, 1, 0], [], []>} : vector<16x16xf32>, vector<16x16xf32>, vector<16x16xf32> -> vector<16x16xf32>
    %262 = arith.addf %169, %261 : vector<16x16xf32>
    %c3_148 = arith.constant 3 : index
    %c0_149 = arith.constant 0 : index
    %263 = memref.load %arg1[%c3_148, %c0_149] : memref<4x4xf32, #tpu.memory_space<smem>>
    %264 = vector.broadcast %263 : f32 to vector<16x16xf32>
    %265 = arith.mulf %193, %264 : vector<16x16xf32>
    %c3_150 = arith.constant 3 : index
    %c1_151 = arith.constant 1 : index
    %266 = memref.load %arg1[%c3_150, %c1_151] : memref<4x4xf32, #tpu.memory_space<smem>>
    %267 = vector.broadcast %266 : f32 to vector<16x16xf32>
    %268 = arith.mulf %195, %267 : vector<16x16xf32>
    %269 = arith.addf %265, %268 : vector<16x16xf32>
    %c3_152 = arith.constant 3 : index
    %c2_153 = arith.constant 2 : index
    %270 = memref.load %arg1[%c3_152, %c2_153] : memref<4x4xf32, #tpu.memory_space<smem>>
    %271 = vector.broadcast %270 : f32 to vector<16x16xf32>
    %272 = arith.mulf %197, %271 : vector<16x16xf32>
    %273 = arith.addf %269, %272 : vector<16x16xf32>
    %c3_154 = arith.constant 3 : index
    %c3_155 = arith.constant 3 : index
    %274 = memref.load %arg1[%c3_154, %c3_155] : memref<4x4xf32, #tpu.memory_space<smem>>
    %275 = vector.broadcast %274 : f32 to vector<16x16xf32>
    %276 = arith.mulf %199, %275 : vector<16x16xf32>
    %277 = arith.addf %273, %276 : vector<16x16xf32>
    %c3_156 = arith.constant 3 : index
    %278 = memref.load %arg2[%c3_156] : memref<4xf32, #tpu.memory_space<smem>>
    %279 = vector.broadcast %278 : f32 to vector<16x16xf32>
    %280 = arith.addf %277, %279 : vector<16x16xf32>
    %cst_157 = arith.constant dense<0.000000e+00> : vector<16x16xf32>
    %281 = tpu.matmul %11, %280, %cst_157 {dimension_numbers = #tpu.dot_dimension_numbers<[1], [1], [0], [0], [0, 0, 1, 0], [], []>} : vector<16x16xf32>, vector<16x16xf32>, vector<16x16xf32> -> vector<16x16xf32>
    %cst_158 = arith.constant dense<0.000000e+00> : vector<16x16xf32>
    %282 = tpu.matmul %11, %281, %cst_158 {dimension_numbers = #tpu.dot_dimension_numbers<[1], [1], [0], [0], [0, 0, 1, 0], [], []>} : vector<16x16xf32>, vector<16x16xf32>, vector<16x16xf32> -> vector<16x16xf32>
    %283 = arith.addf %191, %282 : vector<16x16xf32>
    %cst_159 = arith.constant dense<0.000000e+00> : vector<16x16xf32>
    %284 = tpu.matmul %11, %13, %cst_159 {dimension_numbers = #tpu.dot_dimension_numbers<[1], [1], [0], [0], [0, 0, 1, 0], [], []>} : vector<16x16xf32>, vector<16x16xf32>, vector<16x16xf32> -> vector<16x16xf32>
    %cst_160 = arith.constant dense<0.000000e+00> : vector<16x16xf32>
    %285 = tpu.matmul %11, %284, %cst_160 {dimension_numbers = #tpu.dot_dimension_numbers<[1], [1], [0], [0], [0, 0, 1, 0], [], []>} : vector<16x16xf32>, vector<16x16xf32>, vector<16x16xf32> -> vector<16x16xf32>
    %cst_161 = arith.constant dense<0.000000e+00> : vector<16x16xf32>
    %286 = tpu.matmul %11, %285, %cst_161 {dimension_numbers = #tpu.dot_dimension_numbers<[1], [1], [0], [0], [0, 0, 1, 0], [], []>} : vector<16x16xf32>, vector<16x16xf32>, vector<16x16xf32> -> vector<16x16xf32>
    %cst_162 = arith.constant dense<0.000000e+00> : vector<16x16xf32>
    %287 = tpu.matmul %11, %15, %cst_162 {dimension_numbers = #tpu.dot_dimension_numbers<[1], [1], [0], [0], [0, 0, 1, 0], [], []>} : vector<16x16xf32>, vector<16x16xf32>, vector<16x16xf32> -> vector<16x16xf32>
    %cst_163 = arith.constant dense<0.000000e+00> : vector<16x16xf32>
    %288 = tpu.matmul %11, %287, %cst_163 {dimension_numbers = #tpu.dot_dimension_numbers<[1], [1], [0], [0], [0, 0, 1, 0], [], []>} : vector<16x16xf32>, vector<16x16xf32>, vector<16x16xf32> -> vector<16x16xf32>
    %cst_164 = arith.constant dense<0.000000e+00> : vector<16x16xf32>
    %289 = tpu.matmul %11, %288, %cst_164 {dimension_numbers = #tpu.dot_dimension_numbers<[1], [1], [0], [0], [0, 0, 1, 0], [], []>} : vector<16x16xf32>, vector<16x16xf32>, vector<16x16xf32> -> vector<16x16xf32>
    %cst_165 = arith.constant dense<0.000000e+00> : vector<16x16xf32>
    %290 = tpu.matmul %11, %17, %cst_165 {dimension_numbers = #tpu.dot_dimension_numbers<[1], [1], [0], [0], [0, 0, 1, 0], [], []>} : vector<16x16xf32>, vector<16x16xf32>, vector<16x16xf32> -> vector<16x16xf32>
    %cst_166 = arith.constant dense<0.000000e+00> : vector<16x16xf32>
    %291 = tpu.matmul %11, %290, %cst_166 {dimension_numbers = #tpu.dot_dimension_numbers<[1], [1], [0], [0], [0, 0, 1, 0], [], []>} : vector<16x16xf32>, vector<16x16xf32>, vector<16x16xf32> -> vector<16x16xf32>
    %cst_167 = arith.constant dense<0.000000e+00> : vector<16x16xf32>
    %292 = tpu.matmul %11, %291, %cst_167 {dimension_numbers = #tpu.dot_dimension_numbers<[1], [1], [0], [0], [0, 0, 1, 0], [], []>} : vector<16x16xf32>, vector<16x16xf32>, vector<16x16xf32> -> vector<16x16xf32>
    %cst_168 = arith.constant dense<0.000000e+00> : vector<16x16xf32>
    %293 = tpu.matmul %11, %19, %cst_168 {dimension_numbers = #tpu.dot_dimension_numbers<[1], [1], [0], [0], [0, 0, 1, 0], [], []>} : vector<16x16xf32>, vector<16x16xf32>, vector<16x16xf32> -> vector<16x16xf32>
    %cst_169 = arith.constant dense<0.000000e+00> : vector<16x16xf32>
    %294 = tpu.matmul %11, %293, %cst_169 {dimension_numbers = #tpu.dot_dimension_numbers<[1], [1], [0], [0], [0, 0, 1, 0], [], []>} : vector<16x16xf32>, vector<16x16xf32>, vector<16x16xf32> -> vector<16x16xf32>
    %cst_170 = arith.constant dense<0.000000e+00> : vector<16x16xf32>
    %295 = tpu.matmul %11, %294, %cst_170 {dimension_numbers = #tpu.dot_dimension_numbers<[1], [1], [0], [0], [0, 0, 1, 0], [], []>} : vector<16x16xf32>, vector<16x16xf32>, vector<16x16xf32> -> vector<16x16xf32>
    %c0_171 = arith.constant 0 : index
    %c0_172 = arith.constant 0 : index
    %296 = memref.load %arg1[%c0_171, %c0_172] : memref<4x4xf32, #tpu.memory_space<smem>>
    %297 = vector.broadcast %296 : f32 to vector<16x16xf32>
    %298 = arith.mulf %286, %297 : vector<16x16xf32>
    %c0_173 = arith.constant 0 : index
    %c1_174 = arith.constant 1 : index
    %299 = memref.load %arg1[%c0_173, %c1_174] : memref<4x4xf32, #tpu.memory_space<smem>>
    %300 = vector.broadcast %299 : f32 to vector<16x16xf32>
    %301 = arith.mulf %289, %300 : vector<16x16xf32>
    %302 = arith.addf %298, %301 : vector<16x16xf32>
    %c0_175 = arith.constant 0 : index
    %c2_176 = arith.constant 2 : index
    %303 = memref.load %arg1[%c0_175, %c2_176] : memref<4x4xf32, #tpu.memory_space<smem>>
    %304 = vector.broadcast %303 : f32 to vector<16x16xf32>
    %305 = arith.mulf %292, %304 : vector<16x16xf32>
    %306 = arith.addf %302, %305 : vector<16x16xf32>
    %c0_177 = arith.constant 0 : index
    %c3_178 = arith.constant 3 : index
    %307 = memref.load %arg1[%c0_177, %c3_178] : memref<4x4xf32, #tpu.memory_space<smem>>
    %308 = vector.broadcast %307 : f32 to vector<16x16xf32>
    %309 = arith.mulf %295, %308 : vector<16x16xf32>
    %310 = arith.addf %306, %309 : vector<16x16xf32>
    %c0_179 = arith.constant 0 : index
    %311 = memref.load %arg2[%c0_179] : memref<4xf32, #tpu.memory_space<smem>>
    %312 = vector.broadcast %311 : f32 to vector<16x16xf32>
    %313 = arith.addf %310, %312 : vector<16x16xf32>
    %cst_180 = arith.constant dense<0.000000e+00> : vector<16x16xf32>
    %314 = tpu.matmul %11, %313, %cst_180 {dimension_numbers = #tpu.dot_dimension_numbers<[1], [1], [0], [0], [0, 0, 1, 0], [], []>} : vector<16x16xf32>, vector<16x16xf32>, vector<16x16xf32> -> vector<16x16xf32>
    %315 = arith.addf %220, %314 : vector<16x16xf32>
    %c1_181 = arith.constant 1 : index
    %c0_182 = arith.constant 0 : index
    %316 = memref.load %arg1[%c1_181, %c0_182] : memref<4x4xf32, #tpu.memory_space<smem>>
    %317 = vector.broadcast %316 : f32 to vector<16x16xf32>
    %318 = arith.mulf %286, %317 : vector<16x16xf32>
    %c1_183 = arith.constant 1 : index
    %c1_184 = arith.constant 1 : index
    %319 = memref.load %arg1[%c1_183, %c1_184] : memref<4x4xf32, #tpu.memory_space<smem>>
    %320 = vector.broadcast %319 : f32 to vector<16x16xf32>
    %321 = arith.mulf %289, %320 : vector<16x16xf32>
    %322 = arith.addf %318, %321 : vector<16x16xf32>
    %c1_185 = arith.constant 1 : index
    %c2_186 = arith.constant 2 : index
    %323 = memref.load %arg1[%c1_185, %c2_186] : memref<4x4xf32, #tpu.memory_space<smem>>
    %324 = vector.broadcast %323 : f32 to vector<16x16xf32>
    %325 = arith.mulf %292, %324 : vector<16x16xf32>
    %326 = arith.addf %322, %325 : vector<16x16xf32>
    %c1_187 = arith.constant 1 : index
    %c3_188 = arith.constant 3 : index
    %327 = memref.load %arg1[%c1_187, %c3_188] : memref<4x4xf32, #tpu.memory_space<smem>>
    %328 = vector.broadcast %327 : f32 to vector<16x16xf32>
    %329 = arith.mulf %295, %328 : vector<16x16xf32>
    %330 = arith.addf %326, %329 : vector<16x16xf32>
    %c1_189 = arith.constant 1 : index
    %331 = memref.load %arg2[%c1_189] : memref<4xf32, #tpu.memory_space<smem>>
    %332 = vector.broadcast %331 : f32 to vector<16x16xf32>
    %333 = arith.addf %330, %332 : vector<16x16xf32>
    %cst_190 = arith.constant dense<0.000000e+00> : vector<16x16xf32>
    %334 = tpu.matmul %11, %333, %cst_190 {dimension_numbers = #tpu.dot_dimension_numbers<[1], [1], [0], [0], [0, 0, 1, 0], [], []>} : vector<16x16xf32>, vector<16x16xf32>, vector<16x16xf32> -> vector<16x16xf32>
    %335 = arith.addf %241, %334 : vector<16x16xf32>
    %c2_191 = arith.constant 2 : index
    %c0_192 = arith.constant 0 : index
    %336 = memref.load %arg1[%c2_191, %c0_192] : memref<4x4xf32, #tpu.memory_space<smem>>
    %337 = vector.broadcast %336 : f32 to vector<16x16xf32>
    %338 = arith.mulf %286, %337 : vector<16x16xf32>
    %c2_193 = arith.constant 2 : index
    %c1_194 = arith.constant 1 : index
    %339 = memref.load %arg1[%c2_193, %c1_194] : memref<4x4xf32, #tpu.memory_space<smem>>
    %340 = vector.broadcast %339 : f32 to vector<16x16xf32>
    %341 = arith.mulf %289, %340 : vector<16x16xf32>
    %342 = arith.addf %338, %341 : vector<16x16xf32>
    %c2_195 = arith.constant 2 : index
    %c2_196 = arith.constant 2 : index
    %343 = memref.load %arg1[%c2_195, %c2_196] : memref<4x4xf32, #tpu.memory_space<smem>>
    %344 = vector.broadcast %343 : f32 to vector<16x16xf32>
    %345 = arith.mulf %292, %344 : vector<16x16xf32>
    %346 = arith.addf %342, %345 : vector<16x16xf32>
    %c2_197 = arith.constant 2 : index
    %c3_198 = arith.constant 3 : index
    %347 = memref.load %arg1[%c2_197, %c3_198] : memref<4x4xf32, #tpu.memory_space<smem>>
    %348 = vector.broadcast %347 : f32 to vector<16x16xf32>
    %349 = arith.mulf %295, %348 : vector<16x16xf32>
    %350 = arith.addf %346, %349 : vector<16x16xf32>
    %c2_199 = arith.constant 2 : index
    %351 = memref.load %arg2[%c2_199] : memref<4xf32, #tpu.memory_space<smem>>
    %352 = vector.broadcast %351 : f32 to vector<16x16xf32>
    %353 = arith.addf %350, %352 : vector<16x16xf32>
    %cst_200 = arith.constant dense<0.000000e+00> : vector<16x16xf32>
    %354 = tpu.matmul %11, %353, %cst_200 {dimension_numbers = #tpu.dot_dimension_numbers<[1], [1], [0], [0], [0, 0, 1, 0], [], []>} : vector<16x16xf32>, vector<16x16xf32>, vector<16x16xf32> -> vector<16x16xf32>
    %355 = arith.addf %262, %354 : vector<16x16xf32>
    %c3_201 = arith.constant 3 : index
    %c0_202 = arith.constant 0 : index
    %356 = memref.load %arg1[%c3_201, %c0_202] : memref<4x4xf32, #tpu.memory_space<smem>>
    %357 = vector.broadcast %356 : f32 to vector<16x16xf32>
    %358 = arith.mulf %286, %357 : vector<16x16xf32>
    %c3_203 = arith.constant 3 : index
    %c1_204 = arith.constant 1 : index
    %359 = memref.load %arg1[%c3_203, %c1_204] : memref<4x4xf32, #tpu.memory_space<smem>>
    %360 = vector.broadcast %359 : f32 to vector<16x16xf32>
    %361 = arith.mulf %289, %360 : vector<16x16xf32>
    %362 = arith.addf %358, %361 : vector<16x16xf32>
    %c3_205 = arith.constant 3 : index
    %c2_206 = arith.constant 2 : index
    %363 = memref.load %arg1[%c3_205, %c2_206] : memref<4x4xf32, #tpu.memory_space<smem>>
    %364 = vector.broadcast %363 : f32 to vector<16x16xf32>
    %365 = arith.mulf %292, %364 : vector<16x16xf32>
    %366 = arith.addf %362, %365 : vector<16x16xf32>
    %c3_207 = arith.constant 3 : index
    %c3_208 = arith.constant 3 : index
    %367 = memref.load %arg1[%c3_207, %c3_208] : memref<4x4xf32, #tpu.memory_space<smem>>
    %368 = vector.broadcast %367 : f32 to vector<16x16xf32>
    %369 = arith.mulf %295, %368 : vector<16x16xf32>
    %370 = arith.addf %366, %369 : vector<16x16xf32>
    %c3_209 = arith.constant 3 : index
    %371 = memref.load %arg2[%c3_209] : memref<4xf32, #tpu.memory_space<smem>>
    %372 = vector.broadcast %371 : f32 to vector<16x16xf32>
    %373 = arith.addf %370, %372 : vector<16x16xf32>
    %cst_210 = arith.constant dense<0.000000e+00> : vector<16x16xf32>
    %374 = tpu.matmul %11, %373, %cst_210 {dimension_numbers = #tpu.dot_dimension_numbers<[1], [1], [0], [0], [0, 0, 1, 0], [], []>} : vector<16x16xf32>, vector<16x16xf32>, vector<16x16xf32> -> vector<16x16xf32>
    %375 = arith.addf %283, %374 : vector<16x16xf32>
    %cst_211 = arith.constant dense<0.000000e+00> : vector<16x16xf32>
    %376 = tpu.matmul %5, %13, %cst_211 {dimension_numbers = #tpu.dot_dimension_numbers<[1], [1], [0], [0], [0, 0, 1, 0], [], []>} : vector<16x16xf32>, vector<16x16xf32>, vector<16x16xf32> -> vector<16x16xf32>
    %cst_212 = arith.constant dense<0.000000e+00> : vector<16x16xf32>
    %377 = tpu.matmul %5, %15, %cst_212 {dimension_numbers = #tpu.dot_dimension_numbers<[1], [1], [0], [0], [0, 0, 1, 0], [], []>} : vector<16x16xf32>, vector<16x16xf32>, vector<16x16xf32> -> vector<16x16xf32>
    %cst_213 = arith.constant dense<0.000000e+00> : vector<16x16xf32>
    %378 = tpu.matmul %5, %17, %cst_213 {dimension_numbers = #tpu.dot_dimension_numbers<[1], [1], [0], [0], [0, 0, 1, 0], [], []>} : vector<16x16xf32>, vector<16x16xf32>, vector<16x16xf32> -> vector<16x16xf32>
    %cst_214 = arith.constant dense<0.000000e+00> : vector<16x16xf32>
    %379 = tpu.matmul %5, %19, %cst_214 {dimension_numbers = #tpu.dot_dimension_numbers<[1], [1], [0], [0], [0, 0, 1, 0], [], []>} : vector<16x16xf32>, vector<16x16xf32>, vector<16x16xf32> -> vector<16x16xf32>
    %c0_215 = arith.constant 0 : index
    %c0_216 = arith.constant 0 : index
    %380 = memref.load %arg1[%c0_215, %c0_216] : memref<4x4xf32, #tpu.memory_space<smem>>
    %381 = vector.broadcast %380 : f32 to vector<16x16xf32>
    %382 = arith.mulf %376, %381 : vector<16x16xf32>
    %c0_217 = arith.constant 0 : index
    %c1_218 = arith.constant 1 : index
    %383 = memref.load %arg1[%c0_217, %c1_218] : memref<4x4xf32, #tpu.memory_space<smem>>
    %384 = vector.broadcast %383 : f32 to vector<16x16xf32>
    %385 = arith.mulf %377, %384 : vector<16x16xf32>
    %386 = arith.addf %382, %385 : vector<16x16xf32>
    %c0_219 = arith.constant 0 : index
    %c2_220 = arith.constant 2 : index
    %387 = memref.load %arg1[%c0_219, %c2_220] : memref<4x4xf32, #tpu.memory_space<smem>>
    %388 = vector.broadcast %387 : f32 to vector<16x16xf32>
    %389 = arith.mulf %378, %388 : vector<16x16xf32>
    %390 = arith.addf %386, %389 : vector<16x16xf32>
    %c0_221 = arith.constant 0 : index
    %c3_222 = arith.constant 3 : index
    %391 = memref.load %arg1[%c0_221, %c3_222] : memref<4x4xf32, #tpu.memory_space<smem>>
    %392 = vector.broadcast %391 : f32 to vector<16x16xf32>
    %393 = arith.mulf %379, %392 : vector<16x16xf32>
    %394 = arith.addf %390, %393 : vector<16x16xf32>
    %c0_223 = arith.constant 0 : index
    %395 = memref.load %arg2[%c0_223] : memref<4xf32, #tpu.memory_space<smem>>
    %396 = vector.broadcast %395 : f32 to vector<16x16xf32>
    %397 = arith.addf %394, %396 : vector<16x16xf32>
    %cst_224 = arith.constant dense<0.000000e+00> : vector<16x16xf32>
    %398 = tpu.matmul %5, %397, %cst_224 {dimension_numbers = #tpu.dot_dimension_numbers<[1], [1], [0], [0], [0, 0, 1, 0], [], []>} : vector<16x16xf32>, vector<16x16xf32>, vector<16x16xf32> -> vector<16x16xf32>
    %399 = arith.addf %315, %398 : vector<16x16xf32>
    %c1_225 = arith.constant 1 : index
    %c0_226 = arith.constant 0 : index
    %400 = memref.load %arg1[%c1_225, %c0_226] : memref<4x4xf32, #tpu.memory_space<smem>>
    %401 = vector.broadcast %400 : f32 to vector<16x16xf32>
    %402 = arith.mulf %376, %401 : vector<16x16xf32>
    %c1_227 = arith.constant 1 : index
    %c1_228 = arith.constant 1 : index
    %403 = memref.load %arg1[%c1_227, %c1_228] : memref<4x4xf32, #tpu.memory_space<smem>>
    %404 = vector.broadcast %403 : f32 to vector<16x16xf32>
    %405 = arith.mulf %377, %404 : vector<16x16xf32>
    %406 = arith.addf %402, %405 : vector<16x16xf32>
    %c1_229 = arith.constant 1 : index
    %c2_230 = arith.constant 2 : index
    %407 = memref.load %arg1[%c1_229, %c2_230] : memref<4x4xf32, #tpu.memory_space<smem>>
    %408 = vector.broadcast %407 : f32 to vector<16x16xf32>
    %409 = arith.mulf %378, %408 : vector<16x16xf32>
    %410 = arith.addf %406, %409 : vector<16x16xf32>
    %c1_231 = arith.constant 1 : index
    %c3_232 = arith.constant 3 : index
    %411 = memref.load %arg1[%c1_231, %c3_232] : memref<4x4xf32, #tpu.memory_space<smem>>
    %412 = vector.broadcast %411 : f32 to vector<16x16xf32>
    %413 = arith.mulf %379, %412 : vector<16x16xf32>
    %414 = arith.addf %410, %413 : vector<16x16xf32>
    %c1_233 = arith.constant 1 : index
    %415 = memref.load %arg2[%c1_233] : memref<4xf32, #tpu.memory_space<smem>>
    %416 = vector.broadcast %415 : f32 to vector<16x16xf32>
    %417 = arith.addf %414, %416 : vector<16x16xf32>
    %cst_234 = arith.constant dense<0.000000e+00> : vector<16x16xf32>
    %418 = tpu.matmul %5, %417, %cst_234 {dimension_numbers = #tpu.dot_dimension_numbers<[1], [1], [0], [0], [0, 0, 1, 0], [], []>} : vector<16x16xf32>, vector<16x16xf32>, vector<16x16xf32> -> vector<16x16xf32>
    %419 = arith.addf %335, %418 : vector<16x16xf32>
    %c2_235 = arith.constant 2 : index
    %c0_236 = arith.constant 0 : index
    %420 = memref.load %arg1[%c2_235, %c0_236] : memref<4x4xf32, #tpu.memory_space<smem>>
    %421 = vector.broadcast %420 : f32 to vector<16x16xf32>
    %422 = arith.mulf %376, %421 : vector<16x16xf32>
    %c2_237 = arith.constant 2 : index
    %c1_238 = arith.constant 1 : index
    %423 = memref.load %arg1[%c2_237, %c1_238] : memref<4x4xf32, #tpu.memory_space<smem>>
    %424 = vector.broadcast %423 : f32 to vector<16x16xf32>
    %425 = arith.mulf %377, %424 : vector<16x16xf32>
    %426 = arith.addf %422, %425 : vector<16x16xf32>
    %c2_239 = arith.constant 2 : index
    %c2_240 = arith.constant 2 : index
    %427 = memref.load %arg1[%c2_239, %c2_240] : memref<4x4xf32, #tpu.memory_space<smem>>
    %428 = vector.broadcast %427 : f32 to vector<16x16xf32>
    %429 = arith.mulf %378, %428 : vector<16x16xf32>
    %430 = arith.addf %426, %429 : vector<16x16xf32>
    %c2_241 = arith.constant 2 : index
    %c3_242 = arith.constant 3 : index
    %431 = memref.load %arg1[%c2_241, %c3_242] : memref<4x4xf32, #tpu.memory_space<smem>>
    %432 = vector.broadcast %431 : f32 to vector<16x16xf32>
    %433 = arith.mulf %379, %432 : vector<16x16xf32>
    %434 = arith.addf %430, %433 : vector<16x16xf32>
    %c2_243 = arith.constant 2 : index
    %435 = memref.load %arg2[%c2_243] : memref<4xf32, #tpu.memory_space<smem>>
    %436 = vector.broadcast %435 : f32 to vector<16x16xf32>
    %437 = arith.addf %434, %436 : vector<16x16xf32>
    %cst_244 = arith.constant dense<0.000000e+00> : vector<16x16xf32>
    %438 = tpu.matmul %5, %437, %cst_244 {dimension_numbers = #tpu.dot_dimension_numbers<[1], [1], [0], [0], [0, 0, 1, 0], [], []>} : vector<16x16xf32>, vector<16x16xf32>, vector<16x16xf32> -> vector<16x16xf32>
    %439 = arith.addf %355, %438 : vector<16x16xf32>
    %c3_245 = arith.constant 3 : index
    %c0_246 = arith.constant 0 : index
    %440 = memref.load %arg1[%c3_245, %c0_246] : memref<4x4xf32, #tpu.memory_space<smem>>
    %441 = vector.broadcast %440 : f32 to vector<16x16xf32>
    %442 = arith.mulf %376, %441 : vector<16x16xf32>
    %c3_247 = arith.constant 3 : index
    %c1_248 = arith.constant 1 : index
    %443 = memref.load %arg1[%c3_247, %c1_248] : memref<4x4xf32, #tpu.memory_space<smem>>
    %444 = vector.broadcast %443 : f32 to vector<16x16xf32>
    %445 = arith.mulf %377, %444 : vector<16x16xf32>
    %446 = arith.addf %442, %445 : vector<16x16xf32>
    %c3_249 = arith.constant 3 : index
    %c2_250 = arith.constant 2 : index
    %447 = memref.load %arg1[%c3_249, %c2_250] : memref<4x4xf32, #tpu.memory_space<smem>>
    %448 = vector.broadcast %447 : f32 to vector<16x16xf32>
    %449 = arith.mulf %378, %448 : vector<16x16xf32>
    %450 = arith.addf %446, %449 : vector<16x16xf32>
    %c3_251 = arith.constant 3 : index
    %c3_252 = arith.constant 3 : index
    %451 = memref.load %arg1[%c3_251, %c3_252] : memref<4x4xf32, #tpu.memory_space<smem>>
    %452 = vector.broadcast %451 : f32 to vector<16x16xf32>
    %453 = arith.mulf %379, %452 : vector<16x16xf32>
    %454 = arith.addf %450, %453 : vector<16x16xf32>
    %c3_253 = arith.constant 3 : index
    %455 = memref.load %arg2[%c3_253] : memref<4xf32, #tpu.memory_space<smem>>
    %456 = vector.broadcast %455 : f32 to vector<16x16xf32>
    %457 = arith.addf %454, %456 : vector<16x16xf32>
    %cst_254 = arith.constant dense<0.000000e+00> : vector<16x16xf32>
    %458 = tpu.matmul %5, %457, %cst_254 {dimension_numbers = #tpu.dot_dimension_numbers<[1], [1], [0], [0], [0, 0, 1, 0], [], []>} : vector<16x16xf32>, vector<16x16xf32>, vector<16x16xf32> -> vector<16x16xf32>
    %459 = arith.addf %375, %458 : vector<16x16xf32>
    %cst_255 = arith.constant dense<0.000000e+00> : vector<16x16xf32>
    %460 = tpu.matmul %5, %13, %cst_255 {dimension_numbers = #tpu.dot_dimension_numbers<[1], [1], [0], [0], [0, 0, 1, 0], [], []>} : vector<16x16xf32>, vector<16x16xf32>, vector<16x16xf32> -> vector<16x16xf32>
    %cst_256 = arith.constant dense<0.000000e+00> : vector<16x16xf32>
    %461 = tpu.matmul %11, %460, %cst_256 {dimension_numbers = #tpu.dot_dimension_numbers<[1], [1], [0], [0], [0, 0, 1, 0], [], []>} : vector<16x16xf32>, vector<16x16xf32>, vector<16x16xf32> -> vector<16x16xf32>
    %cst_257 = arith.constant dense<0.000000e+00> : vector<16x16xf32>
    %462 = tpu.matmul %5, %15, %cst_257 {dimension_numbers = #tpu.dot_dimension_numbers<[1], [1], [0], [0], [0, 0, 1, 0], [], []>} : vector<16x16xf32>, vector<16x16xf32>, vector<16x16xf32> -> vector<16x16xf32>
    %cst_258 = arith.constant dense<0.000000e+00> : vector<16x16xf32>
    %463 = tpu.matmul %11, %462, %cst_258 {dimension_numbers = #tpu.dot_dimension_numbers<[1], [1], [0], [0], [0, 0, 1, 0], [], []>} : vector<16x16xf32>, vector<16x16xf32>, vector<16x16xf32> -> vector<16x16xf32>
    %cst_259 = arith.constant dense<0.000000e+00> : vector<16x16xf32>
    %464 = tpu.matmul %5, %17, %cst_259 {dimension_numbers = #tpu.dot_dimension_numbers<[1], [1], [0], [0], [0, 0, 1, 0], [], []>} : vector<16x16xf32>, vector<16x16xf32>, vector<16x16xf32> -> vector<16x16xf32>
    %cst_260 = arith.constant dense<0.000000e+00> : vector<16x16xf32>
    %465 = tpu.matmul %11, %464, %cst_260 {dimension_numbers = #tpu.dot_dimension_numbers<[1], [1], [0], [0], [0, 0, 1, 0], [], []>} : vector<16x16xf32>, vector<16x16xf32>, vector<16x16xf32> -> vector<16x16xf32>
    %cst_261 = arith.constant dense<0.000000e+00> : vector<16x16xf32>
    %466 = tpu.matmul %5, %19, %cst_261 {dimension_numbers = #tpu.dot_dimension_numbers<[1], [1], [0], [0], [0, 0, 1, 0], [], []>} : vector<16x16xf32>, vector<16x16xf32>, vector<16x16xf32> -> vector<16x16xf32>
    %cst_262 = arith.constant dense<0.000000e+00> : vector<16x16xf32>
    %467 = tpu.matmul %11, %466, %cst_262 {dimension_numbers = #tpu.dot_dimension_numbers<[1], [1], [0], [0], [0, 0, 1, 0], [], []>} : vector<16x16xf32>, vector<16x16xf32>, vector<16x16xf32> -> vector<16x16xf32>
    %c0_263 = arith.constant 0 : index
    %c0_264 = arith.constant 0 : index
    %468 = memref.load %arg1[%c0_263, %c0_264] : memref<4x4xf32, #tpu.memory_space<smem>>
    %469 = vector.broadcast %468 : f32 to vector<16x16xf32>
    %470 = arith.mulf %461, %469 : vector<16x16xf32>
    %c0_265 = arith.constant 0 : index
    %c1_266 = arith.constant 1 : index
    %471 = memref.load %arg1[%c0_265, %c1_266] : memref<4x4xf32, #tpu.memory_space<smem>>
    %472 = vector.broadcast %471 : f32 to vector<16x16xf32>
    %473 = arith.mulf %463, %472 : vector<16x16xf32>
    %474 = arith.addf %470, %473 : vector<16x16xf32>
    %c0_267 = arith.constant 0 : index
    %c2_268 = arith.constant 2 : index
    %475 = memref.load %arg1[%c0_267, %c2_268] : memref<4x4xf32, #tpu.memory_space<smem>>
    %476 = vector.broadcast %475 : f32 to vector<16x16xf32>
    %477 = arith.mulf %465, %476 : vector<16x16xf32>
    %478 = arith.addf %474, %477 : vector<16x16xf32>
    %c0_269 = arith.constant 0 : index
    %c3_270 = arith.constant 3 : index
    %479 = memref.load %arg1[%c0_269, %c3_270] : memref<4x4xf32, #tpu.memory_space<smem>>
    %480 = vector.broadcast %479 : f32 to vector<16x16xf32>
    %481 = arith.mulf %467, %480 : vector<16x16xf32>
    %482 = arith.addf %478, %481 : vector<16x16xf32>
    %c0_271 = arith.constant 0 : index
    %483 = memref.load %arg2[%c0_271] : memref<4xf32, #tpu.memory_space<smem>>
    %484 = vector.broadcast %483 : f32 to vector<16x16xf32>
    %485 = arith.addf %482, %484 : vector<16x16xf32>
    %cst_272 = arith.constant dense<0.000000e+00> : vector<16x16xf32>
    %486 = tpu.matmul %11, %485, %cst_272 {dimension_numbers = #tpu.dot_dimension_numbers<[1], [1], [0], [0], [0, 0, 1, 0], [], []>} : vector<16x16xf32>, vector<16x16xf32>, vector<16x16xf32> -> vector<16x16xf32>
    %cst_273 = arith.constant dense<0.000000e+00> : vector<16x16xf32>
    %487 = tpu.matmul %11, %486, %cst_273 {dimension_numbers = #tpu.dot_dimension_numbers<[1], [1], [0], [0], [0, 0, 1, 0], [], []>} : vector<16x16xf32>, vector<16x16xf32>, vector<16x16xf32> -> vector<16x16xf32>
    %cst_274 = arith.constant dense<0.000000e+00> : vector<16x16xf32>
    %488 = tpu.matmul %11, %487, %cst_274 {dimension_numbers = #tpu.dot_dimension_numbers<[1], [1], [0], [0], [0, 0, 1, 0], [], []>} : vector<16x16xf32>, vector<16x16xf32>, vector<16x16xf32> -> vector<16x16xf32>
    %cst_275 = arith.constant dense<0.000000e+00> : vector<16x16xf32>
    %489 = tpu.matmul %5, %488, %cst_275 {dimension_numbers = #tpu.dot_dimension_numbers<[1], [1], [0], [0], [0, 0, 1, 0], [], []>} : vector<16x16xf32>, vector<16x16xf32>, vector<16x16xf32> -> vector<16x16xf32>
    %490 = arith.addf %399, %489 : vector<16x16xf32>
    %c1_276 = arith.constant 1 : index
    %c0_277 = arith.constant 0 : index
    %491 = memref.load %arg1[%c1_276, %c0_277] : memref<4x4xf32, #tpu.memory_space<smem>>
    %492 = vector.broadcast %491 : f32 to vector<16x16xf32>
    %493 = arith.mulf %461, %492 : vector<16x16xf32>
    %c1_278 = arith.constant 1 : index
    %c1_279 = arith.constant 1 : index
    %494 = memref.load %arg1[%c1_278, %c1_279] : memref<4x4xf32, #tpu.memory_space<smem>>
    %495 = vector.broadcast %494 : f32 to vector<16x16xf32>
    %496 = arith.mulf %463, %495 : vector<16x16xf32>
    %497 = arith.addf %493, %496 : vector<16x16xf32>
    %c1_280 = arith.constant 1 : index
    %c2_281 = arith.constant 2 : index
    %498 = memref.load %arg1[%c1_280, %c2_281] : memref<4x4xf32, #tpu.memory_space<smem>>
    %499 = vector.broadcast %498 : f32 to vector<16x16xf32>
    %500 = arith.mulf %465, %499 : vector<16x16xf32>
    %501 = arith.addf %497, %500 : vector<16x16xf32>
    %c1_282 = arith.constant 1 : index
    %c3_283 = arith.constant 3 : index
    %502 = memref.load %arg1[%c1_282, %c3_283] : memref<4x4xf32, #tpu.memory_space<smem>>
    %503 = vector.broadcast %502 : f32 to vector<16x16xf32>
    %504 = arith.mulf %467, %503 : vector<16x16xf32>
    %505 = arith.addf %501, %504 : vector<16x16xf32>
    %c1_284 = arith.constant 1 : index
    %506 = memref.load %arg2[%c1_284] : memref<4xf32, #tpu.memory_space<smem>>
    %507 = vector.broadcast %506 : f32 to vector<16x16xf32>
    %508 = arith.addf %505, %507 : vector<16x16xf32>
    %cst_285 = arith.constant dense<0.000000e+00> : vector<16x16xf32>
    %509 = tpu.matmul %11, %508, %cst_285 {dimension_numbers = #tpu.dot_dimension_numbers<[1], [1], [0], [0], [0, 0, 1, 0], [], []>} : vector<16x16xf32>, vector<16x16xf32>, vector<16x16xf32> -> vector<16x16xf32>
    %cst_286 = arith.constant dense<0.000000e+00> : vector<16x16xf32>
    %510 = tpu.matmul %11, %509, %cst_286 {dimension_numbers = #tpu.dot_dimension_numbers<[1], [1], [0], [0], [0, 0, 1, 0], [], []>} : vector<16x16xf32>, vector<16x16xf32>, vector<16x16xf32> -> vector<16x16xf32>
    %cst_287 = arith.constant dense<0.000000e+00> : vector<16x16xf32>
    %511 = tpu.matmul %11, %510, %cst_287 {dimension_numbers = #tpu.dot_dimension_numbers<[1], [1], [0], [0], [0, 0, 1, 0], [], []>} : vector<16x16xf32>, vector<16x16xf32>, vector<16x16xf32> -> vector<16x16xf32>
    %cst_288 = arith.constant dense<0.000000e+00> : vector<16x16xf32>
    %512 = tpu.matmul %5, %511, %cst_288 {dimension_numbers = #tpu.dot_dimension_numbers<[1], [1], [0], [0], [0, 0, 1, 0], [], []>} : vector<16x16xf32>, vector<16x16xf32>, vector<16x16xf32> -> vector<16x16xf32>
    %513 = arith.addf %419, %512 : vector<16x16xf32>
    %c2_289 = arith.constant 2 : index
    %c0_290 = arith.constant 0 : index
    %514 = memref.load %arg1[%c2_289, %c0_290] : memref<4x4xf32, #tpu.memory_space<smem>>
    %515 = vector.broadcast %514 : f32 to vector<16x16xf32>
    %516 = arith.mulf %461, %515 : vector<16x16xf32>
    %c2_291 = arith.constant 2 : index
    %c1_292 = arith.constant 1 : index
    %517 = memref.load %arg1[%c2_291, %c1_292] : memref<4x4xf32, #tpu.memory_space<smem>>
    %518 = vector.broadcast %517 : f32 to vector<16x16xf32>
    %519 = arith.mulf %463, %518 : vector<16x16xf32>
    %520 = arith.addf %516, %519 : vector<16x16xf32>
    %c2_293 = arith.constant 2 : index
    %c2_294 = arith.constant 2 : index
    %521 = memref.load %arg1[%c2_293, %c2_294] : memref<4x4xf32, #tpu.memory_space<smem>>
    %522 = vector.broadcast %521 : f32 to vector<16x16xf32>
    %523 = arith.mulf %465, %522 : vector<16x16xf32>
    %524 = arith.addf %520, %523 : vector<16x16xf32>
    %c2_295 = arith.constant 2 : index
    %c3_296 = arith.constant 3 : index
    %525 = memref.load %arg1[%c2_295, %c3_296] : memref<4x4xf32, #tpu.memory_space<smem>>
    %526 = vector.broadcast %525 : f32 to vector<16x16xf32>
    %527 = arith.mulf %467, %526 : vector<16x16xf32>
    %528 = arith.addf %524, %527 : vector<16x16xf32>
    %c2_297 = arith.constant 2 : index
    %529 = memref.load %arg2[%c2_297] : memref<4xf32, #tpu.memory_space<smem>>
    %530 = vector.broadcast %529 : f32 to vector<16x16xf32>
    %531 = arith.addf %528, %530 : vector<16x16xf32>
    %cst_298 = arith.constant dense<0.000000e+00> : vector<16x16xf32>
    %532 = tpu.matmul %11, %531, %cst_298 {dimension_numbers = #tpu.dot_dimension_numbers<[1], [1], [0], [0], [0, 0, 1, 0], [], []>} : vector<16x16xf32>, vector<16x16xf32>, vector<16x16xf32> -> vector<16x16xf32>
    %cst_299 = arith.constant dense<0.000000e+00> : vector<16x16xf32>
    %533 = tpu.matmul %11, %532, %cst_299 {dimension_numbers = #tpu.dot_dimension_numbers<[1], [1], [0], [0], [0, 0, 1, 0], [], []>} : vector<16x16xf32>, vector<16x16xf32>, vector<16x16xf32> -> vector<16x16xf32>
    %cst_300 = arith.constant dense<0.000000e+00> : vector<16x16xf32>
    %534 = tpu.matmul %11, %533, %cst_300 {dimension_numbers = #tpu.dot_dimension_numbers<[1], [1], [0], [0], [0, 0, 1, 0], [], []>} : vector<16x16xf32>, vector<16x16xf32>, vector<16x16xf32> -> vector<16x16xf32>
    %cst_301 = arith.constant dense<0.000000e+00> : vector<16x16xf32>
    %535 = tpu.matmul %5, %534, %cst_301 {dimension_numbers = #tpu.dot_dimension_numbers<[1], [1], [0], [0], [0, 0, 1, 0], [], []>} : vector<16x16xf32>, vector<16x16xf32>, vector<16x16xf32> -> vector<16x16xf32>
    %536 = arith.addf %439, %535 : vector<16x16xf32>
    %c3_302 = arith.constant 3 : index
    %c0_303 = arith.constant 0 : index
    %537 = memref.load %arg1[%c3_302, %c0_303] : memref<4x4xf32, #tpu.memory_space<smem>>
    %538 = vector.broadcast %537 : f32 to vector<16x16xf32>
    %539 = arith.mulf %461, %538 : vector<16x16xf32>
    %c3_304 = arith.constant 3 : index
    %c1_305 = arith.constant 1 : index
    %540 = memref.load %arg1[%c3_304, %c1_305] : memref<4x4xf32, #tpu.memory_space<smem>>
    %541 = vector.broadcast %540 : f32 to vector<16x16xf32>
    %542 = arith.mulf %463, %541 : vector<16x16xf32>
    %543 = arith.addf %539, %542 : vector<16x16xf32>
    %c3_306 = arith.constant 3 : index
    %c2_307 = arith.constant 2 : index
    %544 = memref.load %arg1[%c3_306, %c2_307] : memref<4x4xf32, #tpu.memory_space<smem>>
    %545 = vector.broadcast %544 : f32 to vector<16x16xf32>
    %546 = arith.mulf %465, %545 : vector<16x16xf32>
    %547 = arith.addf %543, %546 : vector<16x16xf32>
    %c3_308 = arith.constant 3 : index
    %c3_309 = arith.constant 3 : index
    %548 = memref.load %arg1[%c3_308, %c3_309] : memref<4x4xf32, #tpu.memory_space<smem>>
    %549 = vector.broadcast %548 : f32 to vector<16x16xf32>
    %550 = arith.mulf %467, %549 : vector<16x16xf32>
    %551 = arith.addf %547, %550 : vector<16x16xf32>
    %c3_310 = arith.constant 3 : index
    %552 = memref.load %arg2[%c3_310] : memref<4xf32, #tpu.memory_space<smem>>
    %553 = vector.broadcast %552 : f32 to vector<16x16xf32>
    %554 = arith.addf %551, %553 : vector<16x16xf32>
    %cst_311 = arith.constant dense<0.000000e+00> : vector<16x16xf32>
    %555 = tpu.matmul %11, %554, %cst_311 {dimension_numbers = #tpu.dot_dimension_numbers<[1], [1], [0], [0], [0, 0, 1, 0], [], []>} : vector<16x16xf32>, vector<16x16xf32>, vector<16x16xf32> -> vector<16x16xf32>
    %cst_312 = arith.constant dense<0.000000e+00> : vector<16x16xf32>
    %556 = tpu.matmul %11, %555, %cst_312 {dimension_numbers = #tpu.dot_dimension_numbers<[1], [1], [0], [0], [0, 0, 1, 0], [], []>} : vector<16x16xf32>, vector<16x16xf32>, vector<16x16xf32> -> vector<16x16xf32>
    %cst_313 = arith.constant dense<0.000000e+00> : vector<16x16xf32>
    %557 = tpu.matmul %11, %556, %cst_313 {dimension_numbers = #tpu.dot_dimension_numbers<[1], [1], [0], [0], [0, 0, 1, 0], [], []>} : vector<16x16xf32>, vector<16x16xf32>, vector<16x16xf32> -> vector<16x16xf32>
    %cst_314 = arith.constant dense<0.000000e+00> : vector<16x16xf32>
    %558 = tpu.matmul %5, %557, %cst_314 {dimension_numbers = #tpu.dot_dimension_numbers<[1], [1], [0], [0], [0, 0, 1, 0], [], []>} : vector<16x16xf32>, vector<16x16xf32>, vector<16x16xf32> -> vector<16x16xf32>
    %559 = arith.addf %459, %558 : vector<16x16xf32>
    %cst_315 = arith.constant dense<0.000000e+00> : vector<16x16xf32>
    %560 = tpu.matmul %5, %13, %cst_315 {dimension_numbers = #tpu.dot_dimension_numbers<[1], [1], [0], [0], [0, 0, 1, 0], [], []>} : vector<16x16xf32>, vector<16x16xf32>, vector<16x16xf32> -> vector<16x16xf32>
    %cst_316 = arith.constant dense<0.000000e+00> : vector<16x16xf32>
    %561 = tpu.matmul %11, %560, %cst_316 {dimension_numbers = #tpu.dot_dimension_numbers<[1], [1], [0], [0], [0, 0, 1, 0], [], []>} : vector<16x16xf32>, vector<16x16xf32>, vector<16x16xf32> -> vector<16x16xf32>
    %cst_317 = arith.constant dense<0.000000e+00> : vector<16x16xf32>
    %562 = tpu.matmul %11, %561, %cst_317 {dimension_numbers = #tpu.dot_dimension_numbers<[1], [1], [0], [0], [0, 0, 1, 0], [], []>} : vector<16x16xf32>, vector<16x16xf32>, vector<16x16xf32> -> vector<16x16xf32>
    %cst_318 = arith.constant dense<0.000000e+00> : vector<16x16xf32>
    %563 = tpu.matmul %5, %15, %cst_318 {dimension_numbers = #tpu.dot_dimension_numbers<[1], [1], [0], [0], [0, 0, 1, 0], [], []>} : vector<16x16xf32>, vector<16x16xf32>, vector<16x16xf32> -> vector<16x16xf32>
    %cst_319 = arith.constant dense<0.000000e+00> : vector<16x16xf32>
    %564 = tpu.matmul %11, %563, %cst_319 {dimension_numbers = #tpu.dot_dimension_numbers<[1], [1], [0], [0], [0, 0, 1, 0], [], []>} : vector<16x16xf32>, vector<16x16xf32>, vector<16x16xf32> -> vector<16x16xf32>
    %cst_320 = arith.constant dense<0.000000e+00> : vector<16x16xf32>
    %565 = tpu.matmul %11, %564, %cst_320 {dimension_numbers = #tpu.dot_dimension_numbers<[1], [1], [0], [0], [0, 0, 1, 0], [], []>} : vector<16x16xf32>, vector<16x16xf32>, vector<16x16xf32> -> vector<16x16xf32>
    %cst_321 = arith.constant dense<0.000000e+00> : vector<16x16xf32>
    %566 = tpu.matmul %5, %17, %cst_321 {dimension_numbers = #tpu.dot_dimension_numbers<[1], [1], [0], [0], [0, 0, 1, 0], [], []>} : vector<16x16xf32>, vector<16x16xf32>, vector<16x16xf32> -> vector<16x16xf32>
    %cst_322 = arith.constant dense<0.000000e+00> : vector<16x16xf32>
    %567 = tpu.matmul %11, %566, %cst_322 {dimension_numbers = #tpu.dot_dimension_numbers<[1], [1], [0], [0], [0, 0, 1, 0], [], []>} : vector<16x16xf32>, vector<16x16xf32>, vector<16x16xf32> -> vector<16x16xf32>
    %cst_323 = arith.constant dense<0.000000e+00> : vector<16x16xf32>
    %568 = tpu.matmul %11, %567, %cst_323 {dimension_numbers = #tpu.dot_dimension_numbers<[1], [1], [0], [0], [0, 0, 1, 0], [], []>} : vector<16x16xf32>, vector<16x16xf32>, vector<16x16xf32> -> vector<16x16xf32>
    %cst_324 = arith.constant dense<0.000000e+00> : vector<16x16xf32>
    %569 = tpu.matmul %5, %19, %cst_324 {dimension_numbers = #tpu.dot_dimension_numbers<[1], [1], [0], [0], [0, 0, 1, 0], [], []>} : vector<16x16xf32>, vector<16x16xf32>, vector<16x16xf32> -> vector<16x16xf32>
    %cst_325 = arith.constant dense<0.000000e+00> : vector<16x16xf32>
    %570 = tpu.matmul %11, %569, %cst_325 {dimension_numbers = #tpu.dot_dimension_numbers<[1], [1], [0], [0], [0, 0, 1, 0], [], []>} : vector<16x16xf32>, vector<16x16xf32>, vector<16x16xf32> -> vector<16x16xf32>
    %cst_326 = arith.constant dense<0.000000e+00> : vector<16x16xf32>
    %571 = tpu.matmul %11, %570, %cst_326 {dimension_numbers = #tpu.dot_dimension_numbers<[1], [1], [0], [0], [0, 0, 1, 0], [], []>} : vector<16x16xf32>, vector<16x16xf32>, vector<16x16xf32> -> vector<16x16xf32>
    %c0_327 = arith.constant 0 : index
    %c0_328 = arith.constant 0 : index
    %572 = memref.load %arg1[%c0_327, %c0_328] : memref<4x4xf32, #tpu.memory_space<smem>>
    %573 = vector.broadcast %572 : f32 to vector<16x16xf32>
    %574 = arith.mulf %562, %573 : vector<16x16xf32>
    %c0_329 = arith.constant 0 : index
    %c1_330 = arith.constant 1 : index
    %575 = memref.load %arg1[%c0_329, %c1_330] : memref<4x4xf32, #tpu.memory_space<smem>>
    %576 = vector.broadcast %575 : f32 to vector<16x16xf32>
    %577 = arith.mulf %565, %576 : vector<16x16xf32>
    %578 = arith.addf %574, %577 : vector<16x16xf32>
    %c0_331 = arith.constant 0 : index
    %c2_332 = arith.constant 2 : index
    %579 = memref.load %arg1[%c0_331, %c2_332] : memref<4x4xf32, #tpu.memory_space<smem>>
    %580 = vector.broadcast %579 : f32 to vector<16x16xf32>
    %581 = arith.mulf %568, %580 : vector<16x16xf32>
    %582 = arith.addf %578, %581 : vector<16x16xf32>
    %c0_333 = arith.constant 0 : index
    %c3_334 = arith.constant 3 : index
    %583 = memref.load %arg1[%c0_333, %c3_334] : memref<4x4xf32, #tpu.memory_space<smem>>
    %584 = vector.broadcast %583 : f32 to vector<16x16xf32>
    %585 = arith.mulf %571, %584 : vector<16x16xf32>
    %586 = arith.addf %582, %585 : vector<16x16xf32>
    %c0_335 = arith.constant 0 : index
    %587 = memref.load %arg2[%c0_335] : memref<4xf32, #tpu.memory_space<smem>>
    %588 = vector.broadcast %587 : f32 to vector<16x16xf32>
    %589 = arith.addf %586, %588 : vector<16x16xf32>
    %cst_336 = arith.constant dense<0.000000e+00> : vector<16x16xf32>
    %590 = tpu.matmul %11, %589, %cst_336 {dimension_numbers = #tpu.dot_dimension_numbers<[1], [1], [0], [0], [0, 0, 1, 0], [], []>} : vector<16x16xf32>, vector<16x16xf32>, vector<16x16xf32> -> vector<16x16xf32>
    %cst_337 = arith.constant dense<0.000000e+00> : vector<16x16xf32>
    %591 = tpu.matmul %11, %590, %cst_337 {dimension_numbers = #tpu.dot_dimension_numbers<[1], [1], [0], [0], [0, 0, 1, 0], [], []>} : vector<16x16xf32>, vector<16x16xf32>, vector<16x16xf32> -> vector<16x16xf32>
    %cst_338 = arith.constant dense<0.000000e+00> : vector<16x16xf32>
    %592 = tpu.matmul %5, %591, %cst_338 {dimension_numbers = #tpu.dot_dimension_numbers<[1], [1], [0], [0], [0, 0, 1, 0], [], []>} : vector<16x16xf32>, vector<16x16xf32>, vector<16x16xf32> -> vector<16x16xf32>
    %593 = arith.addf %490, %592 : vector<16x16xf32>
    %c1_339 = arith.constant 1 : index
    %c0_340 = arith.constant 0 : index
    %594 = memref.load %arg1[%c1_339, %c0_340] : memref<4x4xf32, #tpu.memory_space<smem>>
    %595 = vector.broadcast %594 : f32 to vector<16x16xf32>
    %596 = arith.mulf %562, %595 : vector<16x16xf32>
    %c1_341 = arith.constant 1 : index
    %c1_342 = arith.constant 1 : index
    %597 = memref.load %arg1[%c1_341, %c1_342] : memref<4x4xf32, #tpu.memory_space<smem>>
    %598 = vector.broadcast %597 : f32 to vector<16x16xf32>
    %599 = arith.mulf %565, %598 : vector<16x16xf32>
    %600 = arith.addf %596, %599 : vector<16x16xf32>
    %c1_343 = arith.constant 1 : index
    %c2_344 = arith.constant 2 : index
    %601 = memref.load %arg1[%c1_343, %c2_344] : memref<4x4xf32, #tpu.memory_space<smem>>
    %602 = vector.broadcast %601 : f32 to vector<16x16xf32>
    %603 = arith.mulf %568, %602 : vector<16x16xf32>
    %604 = arith.addf %600, %603 : vector<16x16xf32>
    %c1_345 = arith.constant 1 : index
    %c3_346 = arith.constant 3 : index
    %605 = memref.load %arg1[%c1_345, %c3_346] : memref<4x4xf32, #tpu.memory_space<smem>>
    %606 = vector.broadcast %605 : f32 to vector<16x16xf32>
    %607 = arith.mulf %571, %606 : vector<16x16xf32>
    %608 = arith.addf %604, %607 : vector<16x16xf32>
    %c1_347 = arith.constant 1 : index
    %609 = memref.load %arg2[%c1_347] : memref<4xf32, #tpu.memory_space<smem>>
    %610 = vector.broadcast %609 : f32 to vector<16x16xf32>
    %611 = arith.addf %608, %610 : vector<16x16xf32>
    %cst_348 = arith.constant dense<0.000000e+00> : vector<16x16xf32>
    %612 = tpu.matmul %11, %611, %cst_348 {dimension_numbers = #tpu.dot_dimension_numbers<[1], [1], [0], [0], [0, 0, 1, 0], [], []>} : vector<16x16xf32>, vector<16x16xf32>, vector<16x16xf32> -> vector<16x16xf32>
    %cst_349 = arith.constant dense<0.000000e+00> : vector<16x16xf32>
    %613 = tpu.matmul %11, %612, %cst_349 {dimension_numbers = #tpu.dot_dimension_numbers<[1], [1], [0], [0], [0, 0, 1, 0], [], []>} : vector<16x16xf32>, vector<16x16xf32>, vector<16x16xf32> -> vector<16x16xf32>
    %cst_350 = arith.constant dense<0.000000e+00> : vector<16x16xf32>
    %614 = tpu.matmul %5, %613, %cst_350 {dimension_numbers = #tpu.dot_dimension_numbers<[1], [1], [0], [0], [0, 0, 1, 0], [], []>} : vector<16x16xf32>, vector<16x16xf32>, vector<16x16xf32> -> vector<16x16xf32>
    %615 = arith.addf %513, %614 : vector<16x16xf32>
    %c2_351 = arith.constant 2 : index
    %c0_352 = arith.constant 0 : index
    %616 = memref.load %arg1[%c2_351, %c0_352] : memref<4x4xf32, #tpu.memory_space<smem>>
    %617 = vector.broadcast %616 : f32 to vector<16x16xf32>
    %618 = arith.mulf %562, %617 : vector<16x16xf32>
    %c2_353 = arith.constant 2 : index
    %c1_354 = arith.constant 1 : index
    %619 = memref.load %arg1[%c2_353, %c1_354] : memref<4x4xf32, #tpu.memory_space<smem>>
    %620 = vector.broadcast %619 : f32 to vector<16x16xf32>
    %621 = arith.mulf %565, %620 : vector<16x16xf32>
    %622 = arith.addf %618, %621 : vector<16x16xf32>
    %c2_355 = arith.constant 2 : index
    %c2_356 = arith.constant 2 : index
    %623 = memref.load %arg1[%c2_355, %c2_356] : memref<4x4xf32, #tpu.memory_space<smem>>
    %624 = vector.broadcast %623 : f32 to vector<16x16xf32>
    %625 = arith.mulf %568, %624 : vector<16x16xf32>
    %626 = arith.addf %622, %625 : vector<16x16xf32>
    %c2_357 = arith.constant 2 : index
    %c3_358 = arith.constant 3 : index
    %627 = memref.load %arg1[%c2_357, %c3_358] : memref<4x4xf32, #tpu.memory_space<smem>>
    %628 = vector.broadcast %627 : f32 to vector<16x16xf32>
    %629 = arith.mulf %571, %628 : vector<16x16xf32>
    %630 = arith.addf %626, %629 : vector<16x16xf32>
    %c2_359 = arith.constant 2 : index
    %631 = memref.load %arg2[%c2_359] : memref<4xf32, #tpu.memory_space<smem>>
    %632 = vector.broadcast %631 : f32 to vector<16x16xf32>
    %633 = arith.addf %630, %632 : vector<16x16xf32>
    %cst_360 = arith.constant dense<0.000000e+00> : vector<16x16xf32>
    %634 = tpu.matmul %11, %633, %cst_360 {dimension_numbers = #tpu.dot_dimension_numbers<[1], [1], [0], [0], [0, 0, 1, 0], [], []>} : vector<16x16xf32>, vector<16x16xf32>, vector<16x16xf32> -> vector<16x16xf32>
    %cst_361 = arith.constant dense<0.000000e+00> : vector<16x16xf32>
    %635 = tpu.matmul %11, %634, %cst_361 {dimension_numbers = #tpu.dot_dimension_numbers<[1], [1], [0], [0], [0, 0, 1, 0], [], []>} : vector<16x16xf32>, vector<16x16xf32>, vector<16x16xf32> -> vector<16x16xf32>
    %cst_362 = arith.constant dense<0.000000e+00> : vector<16x16xf32>
    %636 = tpu.matmul %5, %635, %cst_362 {dimension_numbers = #tpu.dot_dimension_numbers<[1], [1], [0], [0], [0, 0, 1, 0], [], []>} : vector<16x16xf32>, vector<16x16xf32>, vector<16x16xf32> -> vector<16x16xf32>
    %637 = arith.addf %536, %636 : vector<16x16xf32>
    %c3_363 = arith.constant 3 : index
    %c0_364 = arith.constant 0 : index
    %638 = memref.load %arg1[%c3_363, %c0_364] : memref<4x4xf32, #tpu.memory_space<smem>>
    %639 = vector.broadcast %638 : f32 to vector<16x16xf32>
    %640 = arith.mulf %562, %639 : vector<16x16xf32>
    %c3_365 = arith.constant 3 : index
    %c1_366 = arith.constant 1 : index
    %641 = memref.load %arg1[%c3_365, %c1_366] : memref<4x4xf32, #tpu.memory_space<smem>>
    %642 = vector.broadcast %641 : f32 to vector<16x16xf32>
    %643 = arith.mulf %565, %642 : vector<16x16xf32>
    %644 = arith.addf %640, %643 : vector<16x16xf32>
    %c3_367 = arith.constant 3 : index
    %c2_368 = arith.constant 2 : index
    %645 = memref.load %arg1[%c3_367, %c2_368] : memref<4x4xf32, #tpu.memory_space<smem>>
    %646 = vector.broadcast %645 : f32 to vector<16x16xf32>
    %647 = arith.mulf %568, %646 : vector<16x16xf32>
    %648 = arith.addf %644, %647 : vector<16x16xf32>
    %c3_369 = arith.constant 3 : index
    %c3_370 = arith.constant 3 : index
    %649 = memref.load %arg1[%c3_369, %c3_370] : memref<4x4xf32, #tpu.memory_space<smem>>
    %650 = vector.broadcast %649 : f32 to vector<16x16xf32>
    %651 = arith.mulf %571, %650 : vector<16x16xf32>
    %652 = arith.addf %648, %651 : vector<16x16xf32>
    %c3_371 = arith.constant 3 : index
    %653 = memref.load %arg2[%c3_371] : memref<4xf32, #tpu.memory_space<smem>>
    %654 = vector.broadcast %653 : f32 to vector<16x16xf32>
    %655 = arith.addf %652, %654 : vector<16x16xf32>
    %cst_372 = arith.constant dense<0.000000e+00> : vector<16x16xf32>
    %656 = tpu.matmul %11, %655, %cst_372 {dimension_numbers = #tpu.dot_dimension_numbers<[1], [1], [0], [0], [0, 0, 1, 0], [], []>} : vector<16x16xf32>, vector<16x16xf32>, vector<16x16xf32> -> vector<16x16xf32>
    %cst_373 = arith.constant dense<0.000000e+00> : vector<16x16xf32>
    %657 = tpu.matmul %11, %656, %cst_373 {dimension_numbers = #tpu.dot_dimension_numbers<[1], [1], [0], [0], [0, 0, 1, 0], [], []>} : vector<16x16xf32>, vector<16x16xf32>, vector<16x16xf32> -> vector<16x16xf32>
    %cst_374 = arith.constant dense<0.000000e+00> : vector<16x16xf32>
    %658 = tpu.matmul %5, %657, %cst_374 {dimension_numbers = #tpu.dot_dimension_numbers<[1], [1], [0], [0], [0, 0, 1, 0], [], []>} : vector<16x16xf32>, vector<16x16xf32>, vector<16x16xf32> -> vector<16x16xf32>
    %659 = arith.addf %559, %658 : vector<16x16xf32>
    %cst_375 = arith.constant dense<0.000000e+00> : vector<16x16xf32>
    %660 = tpu.matmul %5, %13, %cst_375 {dimension_numbers = #tpu.dot_dimension_numbers<[1], [1], [0], [0], [0, 0, 1, 0], [], []>} : vector<16x16xf32>, vector<16x16xf32>, vector<16x16xf32> -> vector<16x16xf32>
    %cst_376 = arith.constant dense<0.000000e+00> : vector<16x16xf32>
    %661 = tpu.matmul %11, %660, %cst_376 {dimension_numbers = #tpu.dot_dimension_numbers<[1], [1], [0], [0], [0, 0, 1, 0], [], []>} : vector<16x16xf32>, vector<16x16xf32>, vector<16x16xf32> -> vector<16x16xf32>
    %cst_377 = arith.constant dense<0.000000e+00> : vector<16x16xf32>
    %662 = tpu.matmul %11, %661, %cst_377 {dimension_numbers = #tpu.dot_dimension_numbers<[1], [1], [0], [0], [0, 0, 1, 0], [], []>} : vector<16x16xf32>, vector<16x16xf32>, vector<16x16xf32> -> vector<16x16xf32>
    %cst_378 = arith.constant dense<0.000000e+00> : vector<16x16xf32>
    %663 = tpu.matmul %11, %662, %cst_378 {dimension_numbers = #tpu.dot_dimension_numbers<[1], [1], [0], [0], [0, 0, 1, 0], [], []>} : vector<16x16xf32>, vector<16x16xf32>, vector<16x16xf32> -> vector<16x16xf32>
    %cst_379 = arith.constant dense<0.000000e+00> : vector<16x16xf32>
    %664 = tpu.matmul %5, %15, %cst_379 {dimension_numbers = #tpu.dot_dimension_numbers<[1], [1], [0], [0], [0, 0, 1, 0], [], []>} : vector<16x16xf32>, vector<16x16xf32>, vector<16x16xf32> -> vector<16x16xf32>
    %cst_380 = arith.constant dense<0.000000e+00> : vector<16x16xf32>
    %665 = tpu.matmul %11, %664, %cst_380 {dimension_numbers = #tpu.dot_dimension_numbers<[1], [1], [0], [0], [0, 0, 1, 0], [], []>} : vector<16x16xf32>, vector<16x16xf32>, vector<16x16xf32> -> vector<16x16xf32>
    %cst_381 = arith.constant dense<0.000000e+00> : vector<16x16xf32>
    %666 = tpu.matmul %11, %665, %cst_381 {dimension_numbers = #tpu.dot_dimension_numbers<[1], [1], [0], [0], [0, 0, 1, 0], [], []>} : vector<16x16xf32>, vector<16x16xf32>, vector<16x16xf32> -> vector<16x16xf32>
    %cst_382 = arith.constant dense<0.000000e+00> : vector<16x16xf32>
    %667 = tpu.matmul %11, %666, %cst_382 {dimension_numbers = #tpu.dot_dimension_numbers<[1], [1], [0], [0], [0, 0, 1, 0], [], []>} : vector<16x16xf32>, vector<16x16xf32>, vector<16x16xf32> -> vector<16x16xf32>
    %cst_383 = arith.constant dense<0.000000e+00> : vector<16x16xf32>
    %668 = tpu.matmul %5, %17, %cst_383 {dimension_numbers = #tpu.dot_dimension_numbers<[1], [1], [0], [0], [0, 0, 1, 0], [], []>} : vector<16x16xf32>, vector<16x16xf32>, vector<16x16xf32> -> vector<16x16xf32>
    %cst_384 = arith.constant dense<0.000000e+00> : vector<16x16xf32>
    %669 = tpu.matmul %11, %668, %cst_384 {dimension_numbers = #tpu.dot_dimension_numbers<[1], [1], [0], [0], [0, 0, 1, 0], [], []>} : vector<16x16xf32>, vector<16x16xf32>, vector<16x16xf32> -> vector<16x16xf32>
    %cst_385 = arith.constant dense<0.000000e+00> : vector<16x16xf32>
    %670 = tpu.matmul %11, %669, %cst_385 {dimension_numbers = #tpu.dot_dimension_numbers<[1], [1], [0], [0], [0, 0, 1, 0], [], []>} : vector<16x16xf32>, vector<16x16xf32>, vector<16x16xf32> -> vector<16x16xf32>
    %cst_386 = arith.constant dense<0.000000e+00> : vector<16x16xf32>
    %671 = tpu.matmul %11, %670, %cst_386 {dimension_numbers = #tpu.dot_dimension_numbers<[1], [1], [0], [0], [0, 0, 1, 0], [], []>} : vector<16x16xf32>, vector<16x16xf32>, vector<16x16xf32> -> vector<16x16xf32>
    %cst_387 = arith.constant dense<0.000000e+00> : vector<16x16xf32>
    %672 = tpu.matmul %5, %19, %cst_387 {dimension_numbers = #tpu.dot_dimension_numbers<[1], [1], [0], [0], [0, 0, 1, 0], [], []>} : vector<16x16xf32>, vector<16x16xf32>, vector<16x16xf32> -> vector<16x16xf32>
    %cst_388 = arith.constant dense<0.000000e+00> : vector<16x16xf32>
    %673 = tpu.matmul %11, %672, %cst_388 {dimension_numbers = #tpu.dot_dimension_numbers<[1], [1], [0], [0], [0, 0, 1, 0], [], []>} : vector<16x16xf32>, vector<16x16xf32>, vector<16x16xf32> -> vector<16x16xf32>
    %cst_389 = arith.constant dense<0.000000e+00> : vector<16x16xf32>
    %674 = tpu.matmul %11, %673, %cst_389 {dimension_numbers = #tpu.dot_dimension_numbers<[1], [1], [0], [0], [0, 0, 1, 0], [], []>} : vector<16x16xf32>, vector<16x16xf32>, vector<16x16xf32> -> vector<16x16xf32>
    %cst_390 = arith.constant dense<0.000000e+00> : vector<16x16xf32>
    %675 = tpu.matmul %11, %674, %cst_390 {dimension_numbers = #tpu.dot_dimension_numbers<[1], [1], [0], [0], [0, 0, 1, 0], [], []>} : vector<16x16xf32>, vector<16x16xf32>, vector<16x16xf32> -> vector<16x16xf32>
    %c0_391 = arith.constant 0 : index
    %c0_392 = arith.constant 0 : index
    %676 = memref.load %arg1[%c0_391, %c0_392] : memref<4x4xf32, #tpu.memory_space<smem>>
    %677 = vector.broadcast %676 : f32 to vector<16x16xf32>
    %678 = arith.mulf %663, %677 : vector<16x16xf32>
    %c0_393 = arith.constant 0 : index
    %c1_394 = arith.constant 1 : index
    %679 = memref.load %arg1[%c0_393, %c1_394] : memref<4x4xf32, #tpu.memory_space<smem>>
    %680 = vector.broadcast %679 : f32 to vector<16x16xf32>
    %681 = arith.mulf %667, %680 : vector<16x16xf32>
    %682 = arith.addf %678, %681 : vector<16x16xf32>
    %c0_395 = arith.constant 0 : index
    %c2_396 = arith.constant 2 : index
    %683 = memref.load %arg1[%c0_395, %c2_396] : memref<4x4xf32, #tpu.memory_space<smem>>
    %684 = vector.broadcast %683 : f32 to vector<16x16xf32>
    %685 = arith.mulf %671, %684 : vector<16x16xf32>
    %686 = arith.addf %682, %685 : vector<16x16xf32>
    %c0_397 = arith.constant 0 : index
    %c3_398 = arith.constant 3 : index
    %687 = memref.load %arg1[%c0_397, %c3_398] : memref<4x4xf32, #tpu.memory_space<smem>>
    %688 = vector.broadcast %687 : f32 to vector<16x16xf32>
    %689 = arith.mulf %675, %688 : vector<16x16xf32>
    %690 = arith.addf %686, %689 : vector<16x16xf32>
    %c0_399 = arith.constant 0 : index
    %691 = memref.load %arg2[%c0_399] : memref<4xf32, #tpu.memory_space<smem>>
    %692 = vector.broadcast %691 : f32 to vector<16x16xf32>
    %693 = arith.addf %690, %692 : vector<16x16xf32>
    %cst_400 = arith.constant dense<0.000000e+00> : vector<16x16xf32>
    %694 = tpu.matmul %11, %693, %cst_400 {dimension_numbers = #tpu.dot_dimension_numbers<[1], [1], [0], [0], [0, 0, 1, 0], [], []>} : vector<16x16xf32>, vector<16x16xf32>, vector<16x16xf32> -> vector<16x16xf32>
    %cst_401 = arith.constant dense<0.000000e+00> : vector<16x16xf32>
    %695 = tpu.matmul %5, %694, %cst_401 {dimension_numbers = #tpu.dot_dimension_numbers<[1], [1], [0], [0], [0, 0, 1, 0], [], []>} : vector<16x16xf32>, vector<16x16xf32>, vector<16x16xf32> -> vector<16x16xf32>
    %696 = arith.addf %593, %695 : vector<16x16xf32>
    %c1_402 = arith.constant 1 : index
    %c0_403 = arith.constant 0 : index
    %697 = memref.load %arg1[%c1_402, %c0_403] : memref<4x4xf32, #tpu.memory_space<smem>>
    %698 = vector.broadcast %697 : f32 to vector<16x16xf32>
    %699 = arith.mulf %663, %698 : vector<16x16xf32>
    %c1_404 = arith.constant 1 : index
    %c1_405 = arith.constant 1 : index
    %700 = memref.load %arg1[%c1_404, %c1_405] : memref<4x4xf32, #tpu.memory_space<smem>>
    %701 = vector.broadcast %700 : f32 to vector<16x16xf32>
    %702 = arith.mulf %667, %701 : vector<16x16xf32>
    %703 = arith.addf %699, %702 : vector<16x16xf32>
    %c1_406 = arith.constant 1 : index
    %c2_407 = arith.constant 2 : index
    %704 = memref.load %arg1[%c1_406, %c2_407] : memref<4x4xf32, #tpu.memory_space<smem>>
    %705 = vector.broadcast %704 : f32 to vector<16x16xf32>
    %706 = arith.mulf %671, %705 : vector<16x16xf32>
    %707 = arith.addf %703, %706 : vector<16x16xf32>
    %c1_408 = arith.constant 1 : index
    %c3_409 = arith.constant 3 : index
    %708 = memref.load %arg1[%c1_408, %c3_409] : memref<4x4xf32, #tpu.memory_space<smem>>
    %709 = vector.broadcast %708 : f32 to vector<16x16xf32>
    %710 = arith.mulf %675, %709 : vector<16x16xf32>
    %711 = arith.addf %707, %710 : vector<16x16xf32>
    %c1_410 = arith.constant 1 : index
    %712 = memref.load %arg2[%c1_410] : memref<4xf32, #tpu.memory_space<smem>>
    %713 = vector.broadcast %712 : f32 to vector<16x16xf32>
    %714 = arith.addf %711, %713 : vector<16x16xf32>
    %cst_411 = arith.constant dense<0.000000e+00> : vector<16x16xf32>
    %715 = tpu.matmul %11, %714, %cst_411 {dimension_numbers = #tpu.dot_dimension_numbers<[1], [1], [0], [0], [0, 0, 1, 0], [], []>} : vector<16x16xf32>, vector<16x16xf32>, vector<16x16xf32> -> vector<16x16xf32>
    %cst_412 = arith.constant dense<0.000000e+00> : vector<16x16xf32>
    %716 = tpu.matmul %5, %715, %cst_412 {dimension_numbers = #tpu.dot_dimension_numbers<[1], [1], [0], [0], [0, 0, 1, 0], [], []>} : vector<16x16xf32>, vector<16x16xf32>, vector<16x16xf32> -> vector<16x16xf32>
    %717 = arith.addf %615, %716 : vector<16x16xf32>
    %c2_413 = arith.constant 2 : index
    %c0_414 = arith.constant 0 : index
    %718 = memref.load %arg1[%c2_413, %c0_414] : memref<4x4xf32, #tpu.memory_space<smem>>
    %719 = vector.broadcast %718 : f32 to vector<16x16xf32>
    %720 = arith.mulf %663, %719 : vector<16x16xf32>
    %c2_415 = arith.constant 2 : index
    %c1_416 = arith.constant 1 : index
    %721 = memref.load %arg1[%c2_415, %c1_416] : memref<4x4xf32, #tpu.memory_space<smem>>
    %722 = vector.broadcast %721 : f32 to vector<16x16xf32>
    %723 = arith.mulf %667, %722 : vector<16x16xf32>
    %724 = arith.addf %720, %723 : vector<16x16xf32>
    %c2_417 = arith.constant 2 : index
    %c2_418 = arith.constant 2 : index
    %725 = memref.load %arg1[%c2_417, %c2_418] : memref<4x4xf32, #tpu.memory_space<smem>>
    %726 = vector.broadcast %725 : f32 to vector<16x16xf32>
    %727 = arith.mulf %671, %726 : vector<16x16xf32>
    %728 = arith.addf %724, %727 : vector<16x16xf32>
    %c2_419 = arith.constant 2 : index
    %c3_420 = arith.constant 3 : index
    %729 = memref.load %arg1[%c2_419, %c3_420] : memref<4x4xf32, #tpu.memory_space<smem>>
    %730 = vector.broadcast %729 : f32 to vector<16x16xf32>
    %731 = arith.mulf %675, %730 : vector<16x16xf32>
    %732 = arith.addf %728, %731 : vector<16x16xf32>
    %c2_421 = arith.constant 2 : index
    %733 = memref.load %arg2[%c2_421] : memref<4xf32, #tpu.memory_space<smem>>
    %734 = vector.broadcast %733 : f32 to vector<16x16xf32>
    %735 = arith.addf %732, %734 : vector<16x16xf32>
    %cst_422 = arith.constant dense<0.000000e+00> : vector<16x16xf32>
    %736 = tpu.matmul %11, %735, %cst_422 {dimension_numbers = #tpu.dot_dimension_numbers<[1], [1], [0], [0], [0, 0, 1, 0], [], []>} : vector<16x16xf32>, vector<16x16xf32>, vector<16x16xf32> -> vector<16x16xf32>
    %cst_423 = arith.constant dense<0.000000e+00> : vector<16x16xf32>
    %737 = tpu.matmul %5, %736, %cst_423 {dimension_numbers = #tpu.dot_dimension_numbers<[1], [1], [0], [0], [0, 0, 1, 0], [], []>} : vector<16x16xf32>, vector<16x16xf32>, vector<16x16xf32> -> vector<16x16xf32>
    %738 = arith.addf %637, %737 : vector<16x16xf32>
    %c3_424 = arith.constant 3 : index
    %c0_425 = arith.constant 0 : index
    %739 = memref.load %arg1[%c3_424, %c0_425] : memref<4x4xf32, #tpu.memory_space<smem>>
    %740 = vector.broadcast %739 : f32 to vector<16x16xf32>
    %741 = arith.mulf %663, %740 : vector<16x16xf32>
    %c3_426 = arith.constant 3 : index
    %c1_427 = arith.constant 1 : index
    %742 = memref.load %arg1[%c3_426, %c1_427] : memref<4x4xf32, #tpu.memory_space<smem>>
    %743 = vector.broadcast %742 : f32 to vector<16x16xf32>
    %744 = arith.mulf %667, %743 : vector<16x16xf32>
    %745 = arith.addf %741, %744 : vector<16x16xf32>
    %c3_428 = arith.constant 3 : index
    %c2_429 = arith.constant 2 : index
    %746 = memref.load %arg1[%c3_428, %c2_429] : memref<4x4xf32, #tpu.memory_space<smem>>
    %747 = vector.broadcast %746 : f32 to vector<16x16xf32>
    %748 = arith.mulf %671, %747 : vector<16x16xf32>
    %749 = arith.addf %745, %748 : vector<16x16xf32>
    %c3_430 = arith.constant 3 : index
    %c3_431 = arith.constant 3 : index
    %750 = memref.load %arg1[%c3_430, %c3_431] : memref<4x4xf32, #tpu.memory_space<smem>>
    %751 = vector.broadcast %750 : f32 to vector<16x16xf32>
    %752 = arith.mulf %675, %751 : vector<16x16xf32>
    %753 = arith.addf %749, %752 : vector<16x16xf32>
    %c3_432 = arith.constant 3 : index
    %754 = memref.load %arg2[%c3_432] : memref<4xf32, #tpu.memory_space<smem>>
    %755 = vector.broadcast %754 : f32 to vector<16x16xf32>
    %756 = arith.addf %753, %755 : vector<16x16xf32>
    %cst_433 = arith.constant dense<0.000000e+00> : vector<16x16xf32>
    %757 = tpu.matmul %11, %756, %cst_433 {dimension_numbers = #tpu.dot_dimension_numbers<[1], [1], [0], [0], [0, 0, 1, 0], [], []>} : vector<16x16xf32>, vector<16x16xf32>, vector<16x16xf32> -> vector<16x16xf32>
    %cst_434 = arith.constant dense<0.000000e+00> : vector<16x16xf32>
    %758 = tpu.matmul %5, %757, %cst_434 {dimension_numbers = #tpu.dot_dimension_numbers<[1], [1], [0], [0], [0, 0, 1, 0], [], []>} : vector<16x16xf32>, vector<16x16xf32>, vector<16x16xf32> -> vector<16x16xf32>
    %759 = arith.addf %659, %758 : vector<16x16xf32>
    %cst_435 = arith.constant 1.250000e-01 : f32
    %760 = vector.broadcast %cst_435 : f32 to vector<16x16xf32>
    %761 = arith.mulf %696, %760 : vector<16x16xf32>
    %c0_436 = arith.constant 0 : index
    %c0_437 = arith.constant 0 : index
    %c0_438 = arith.constant 0 : index
    %c0_439 = arith.constant 0 : index
    %762 = vector.load %arg4[%c0_436, %c0_437, %c0_438, %c0_439] : memref<1x4x16x16xf32, #tpu.memory_space<vmem>>, vector<1x1x16x16xf32>
    %763 = vector.shape_cast %762 : vector<1x1x16x16xf32> to vector<16x16xf32>
    %764 = vector.shape_cast %761 : vector<16x16xf32> to vector<1x1x16x16xf32>
    tpu.vector_store %arg4[%c0_436, %c0_437, %c0_438, %c0_439], %764 {strides = array<i32>} : memref<1x4x16x16xf32, #tpu.memory_space<vmem>>, vector<1x1x16x16xf32>,
    %cst_440 = arith.constant 1.250000e-01 : f32
    %765 = vector.broadcast %cst_440 : f32 to vector<16x16xf32>
    %766 = arith.mulf %717, %765 : vector<16x16xf32>
    %c0_441 = arith.constant 0 : index
    %c1_442 = arith.constant 1 : index
    %c0_443 = arith.constant 0 : index
    %c0_444 = arith.constant 0 : index
    %767 = vector.load %arg4[%c0_441, %c1_442, %c0_443, %c0_444] : memref<1x4x16x16xf32, #tpu.memory_space<vmem>>, vector<1x1x16x16xf32>
    %768 = vector.shape_cast %767 : vector<1x1x16x16xf32> to vector<16x16xf32>
    %769 = vector.shape_cast %766 : vector<16x16xf32> to vector<1x1x16x16xf32>
    tpu.vector_store %arg4[%c0_441, %c1_442, %c0_443, %c0_444], %769 {strides = array<i32>} : memref<1x4x16x16xf32, #tpu.memory_space<vmem>>, vector<1x1x16x16xf32>,
    %cst_445 = arith.constant 1.250000e-01 : f32
    %770 = vector.broadcast %cst_445 : f32 to vector<16x16xf32>
    %771 = arith.mulf %738, %770 : vector<16x16xf32>
    %c0_446 = arith.constant 0 : index
    %c2_447 = arith.constant 2 : index
    %c0_448 = arith.constant 0 : index
    %c0_449 = arith.constant 0 : index
    %772 = vector.load %arg4[%c0_446, %c2_447, %c0_448, %c0_449] : memref<1x4x16x16xf32, #tpu.memory_space<vmem>>, vector<1x1x16x16xf32>
    %773 = vector.shape_cast %772 : vector<1x1x16x16xf32> to vector<16x16xf32>
    %774 = vector.shape_cast %771 : vector<16x16xf32> to vector<1x1x16x16xf32>
    tpu.vector_store %arg4[%c0_446, %c2_447, %c0_448, %c0_449], %774 {strides = array<i32>} : memref<1x4x16x16xf32, #tpu.memory_space<vmem>>, vector<1x1x16x16xf32>,
    %cst_450 = arith.constant 1.250000e-01 : f32
    %775 = vector.broadcast %cst_450 : f32 to vector<16x16xf32>
    %776 = arith.mulf %759, %775 : vector<16x16xf32>
    %c0_451 = arith.constant 0 : index
    %c3_452 = arith.constant 3 : index
    %c0_453 = arith.constant 0 : index
    %c0_454 = arith.constant 0 : index
    %777 = vector.load %arg4[%c0_451, %c3_452, %c0_453, %c0_454] : memref<1x4x16x16xf32, #tpu.memory_space<vmem>>, vector<1x1x16x16xf32>
    %778 = vector.shape_cast %777 : vector<1x1x16x16xf32> to vector<16x16xf32>
    %779 = vector.shape_cast %776 : vector<16x16xf32> to vector<1x1x16x16xf32>
    tpu.vector_store %arg4[%c0_451, %c3_452, %c0_453, %c0_454], %779 {strides = array<i32>} : memref<1x4x16x16xf32, #tpu.memory_space<vmem>>, vector<1x1x16x16xf32>,
    return
  }
  func.func @transform_0(%arg0: i32) -> (i32, i32) {
    %c0_i32 = arith.constant 0 : i32
    %c0_i32_0 = arith.constant 0 : i32
    %c0_i32_1 = arith.constant 0 : i32
    return %c0_i32, %c0_i32_0 : i32, i32
  }
  func.func @transform_1(%arg0: i32) -> i32 {
    %c0_i32 = arith.constant 0 : i32
    %c0_i32_0 = arith.constant 0 : i32
    return %c0_i32 : i32
  }
  func.func @transform_2(%arg0: i32) -> (i32, i32, i32, i32) {
    %c0_i32 = arith.constant 0 : i32
    %c0_i32_0 = arith.constant 0 : i32
    %c0_i32_1 = arith.constant 0 : i32
    %c0_i32_2 = arith.constant 0 : i32
    return %arg0, %c0_i32, %c0_i32_0, %c0_i32_1 : i32, i32, i32, i32
  }
  func.func @transform_3(%arg0: i32) -> (i32, i32, i32, i32) {
    %c0_i32 = arith.constant 0 : i32
    %c0_i32_0 = arith.constant 0 : i32
    %c0_i32_1 = arith.constant 0 : i32
    %c0_i32_2 = arith.constant 0 : i32
    return %arg0, %c0_i32, %c0_i32_0, %c0_i32_1 : i32, i32, i32, i32
  }
}

</mosaic_0001>

<bundles_post_ra>
// kernel: _lambda_.1
= control target key start
LH: loop header
LB: loop body
LE: loop exit
PB: predicated region body
PF: predicated region fallthrough
CT: control target
= control target key end

     0   :  { %8 = vsyncpa [#allocation5], 0  ;;  %s11982_s0 = inlined_call_operand.hbm [shape: f32[4,4], index: 0, kind: input, shape index: {}]   ;;  %s11983_s1 = inlined_call_operand.vmem [shape: f32[4], index: 1, kind: input, shape index: {}]   ;;  %s11984_s2 = inlined_call_operand.hbm [shape: f32[2,4,16,16], index: 2, kind: input, shape index: {}]   ;;  %s11985_s3 = inlined_call_operand.hbm [shape: f32[2,4,16,16], index: 3, kind: output, shape index: {}]  }
   0x1   :  { %9 = vsyncpa [#allocation6], 0 }
   0x2   :  { %10 = vsyncpa [#allocation3], 0 }
   0x3   :  { %12 = vsyncpa [#allocation3 + $0x1], 0 }
   0x4   :  { %13 = vsyncpa [#allocation4], 0 }
   0x5   :  { %15 = vsyncpa [#allocation4 + $0x1], 0  ;;  %s10094_s12 = smov 0   ;;  %s10096_s13 = smov 0  }
   0x6   :  { %s10098_s14 = smov 0   ;;  %s10100_s15 = smov 0  }
   0x7 LB: > { %s10115_s16 = sadd.s32 4294967295, %s10063_s15   ;;  %s8427_s17 = sadd.s32 4294967294, %s10063_s15   ;;  %s10063_s15 = sphi %s10100_s15, %s12077_s15   ;;  %s10059_s14 = sphi %s10098_s14, %s12076_s14   ;;  %s10055_s13 = sphi %s10096_s13, %s12075_s13   ;;  %s10051_s12 = sphi %s10094_s12, %s12074_s12  }
   0x8   : > { %s10119_s18 = sadd.s32 1, %s10063_s15   ;;  %s70_s19 = sadd.s32 1, %s10059_s14 }
   0x9   : > { %s67_s20 = ssub.s32 %s10063_s15, %s10119_s18  ;;  %p77_p0 = scmp.ne.s32.totalorder %s10059_s14, %s10055_s13 }
   0xa   : > { %p68_p1 = scmp.eq.s32.totalorder %s67_s20, 0  ;;  %p78_p2 = scmp.eq.s32.totalorder %s10063_s15, 0 }
   0xb   : > { %p83_p3 = scmp.ne.s32.totalorder %s10055_s13, %s10051_s12  ;;  %p11986_p4 = scmp.eq.s32.totalorder %s10115_s16, 0 }
   0xc   : > { %s10131_s21 = scalar_select %p68_p1, %s10059_s14, %s70_s19  }
   0xd   : > { %p10133_p5 = por %p78_p2, %p77_p0  ;;  %p10139_p6 = por %p11986_p4, %p83_p3 }
   0xe   : > { %p107_p7 = scmp.eq.s32.totalorder %s10115_s16, 1  ;;  %p113_p8 = scmp.eq.s32.totalorder %s8427_s17, 1 }
   0xf   : > { %s12021_s23 = scalar_select %p10139_p6, 1, 0 }
  0x10   : > { %p8428_p9 = scmp.ge.s32.totalorder %s10063_s15, 1  ;;  %p120_p10 = scmp.lt.s32.totalorder %s10063_s15, 3 }
  0x11   : > { %p10146_p11 = por %p107_p7, %p77_p0  ;;  %p10150_p12 = por %p113_p8, %p83_p3 }
  0x12   : > { %p10154_p13 = pnand %p8428_p9, %p120_p10  ;;  %p9886_p4 = scmp.lt.s32.totalorder %s10063_s15, 2 }
  0x13   : > { %s12022_s24 = scalar_select %p10146_p11, 1, 0 }
  0x14   : > { %s12023_s25 = scalar_select %p10150_p12, 1, 0 }
  0x15   : > { %s12024_s26 = scalar_select %p10154_p13, 1, 0 }
  0x16   : > { %p9869_p2 = pneg %p10154_p13  ;;  %s142_s29 = sshll.u32 %s11983_s1, 4  ;;  %s143_s29 = int_to_ptr.vmem [resolvable:$true] %s142_s29 }
  0x17   : > { %p12025_p0 = scmp.eq.s32.totalorder %s10115_s16, 0  ;;  %p10173_p3 = pnand %p9886_p4, %p10133_p5 }
  0x18   : > { %s153_s5 = sand.u32 1, %s10059_s14   ;;  %s10065_s6 = smov [#allocation2]  }
  0x19   : > { %p10167_p7 = pnand %p9869_p2, %p12025_p0  ;;  %s9948_s9 = scalar_lea.vmem %s143_s29, 16 }
  0x1a   : > { %p9949_p8 = scmp.ne.s32.totalorder %s143_s29, %s9948_s9  ;;  %p9956_p0 = scmp.lt.s32.totalorder %s143_s29, %s143_s29 }
  0x1b   : > { %9872 = dma.hbm_to_smem (!%p10167_p7), %s11982_s0, 64, %s10065_s6, [#allocation5]  }
  0x1c   : > { %p9950_p9 = pneg %p10167_p7  ;;  %p9957_p1 = scmp.lt.s32.totalorder %s9948_s9, %s9948_s9 }
  0x1e   : > { %p9951_p10 = pnand %p9950_p9, %p9949_p8  ;;  %p9958_p4 = por %p9957_p1, %p9956_p0 }
  0x20   : > { %p9952_p2 = pneg %p9951_p10 }
  0x22   : > { %p9959_p5 = pnand %p9958_p4, %p9952_p2 }
  0x24   : > { %9962 = shalt.err (!%p9959_p5)
}
  0x25   : > { %s10066_s10 = smov [#allocation7]   ;;  %s8432_s11 = sshll.u32 %s153_s5, 6 }
  0x26   : > { %9875 = dma.vmem_to_smem (!%p10167_p7), %s143_s29, 16, %s10066_s10, [#allocation6]  }
  0x27   : > { %s8843_s17 = sshll.u32 %s10063_s15, 10  ;;  %s157_s27 = scalar_lea.vmem [#allocation8], %s8432_s11 }
  0x28   : > { %s10191_s22 = scalar_lea.hbm %s11984_s2, %s8843_s17  ;;  %s164_s28 = sshll.u32 %s157_s27, 4  ;;  %s10193_s28 = int_to_ptr.vmem [resolvable:$true] %s164_s28 }
  0x29   : > { %s10195_s6 = scalar_lea.sflag [#allocation3], %s153_s5  ;;  %s9963_s30 = scalar_lea.hbm %s10191_s22, 1024 }
  0x2a   : > { %p9964_p1 = scmp.ne.s32.totalorder %s10191_s22, %s9963_s30  ;;  %p9965_p7 = pneg %p10173_p3 }
  0x2b   : > { %s9968_s8 = scalar_lea.hbm %s11984_s2, 2048  ;;  %p9969_p10 = scmp.lt.s32.totalorder %s10191_s22, %s11984_s2 }
  0x2c   : > { %p9966_p8 = pnand %p9965_p7, %p9964_p1  ;;  %p9970_p2 = scmp.lt.s32.totalorder %s9968_s8, %s9963_s30 }
  0x2e   : > { %p9967_p9 = pneg %p9966_p8  ;;  %p9971_p0 = por %p9970_p2, %p9969_p10 }
  0x30   : > { %p9972_p4 = pnand %p9971_p0, %p9967_p9 }
  0x32   : > { %9975 = shalt.err (!%p9972_p4)
}
  0x33   : > { %s9976_s5 = scalar_lea.vmem %s10193_s28, 1024  ;;  %s10067_s11 = smov [#allocation8]  }
  0x34   : > { %p9977_p5 = scmp.ne.s32.totalorder %s10193_s28, %s9976_s5  ;;  %s9981_s17 = sshll.u32 %s10067_s11, 4  ;;  %s9982_s17 = int_to_ptr.vmem [resolvable:$false] %s9981_s17 }
  0x35   : > { %s9983_s19 = scalar_lea.vmem %s9982_s17, 2048  ;;  %p9984_p8 = scmp.lt.s32.totalorder %s10193_s28, %s9982_s17 }
  0x36   : > { %p9979_p12 = pnand %p9977_p5, %p9965_p7  ;;  %p9985_p11 = scmp.lt.s32.totalorder %s9983_s19, %s9976_s5 }
  0x38   : > { %p9980_p1 = pneg %p9979_p12  ;;  %p9986_p6 = por %p9985_p11, %p9984_p8 }
  0x3a   : > { %p9987_p13 = pnand %p9986_p6, %p9980_p1 }
  0x3c   : > { %9990 = shalt.err (!%p9987_p13)
}
  0x3d   : > { %s10068_s20 = smov 128   ;;  %s10069_s27 = smov 8  }
  0x3e   : > { %9879 = dma.hbm_to_vmem [thread:$0]  (!%p10173_p3), %s10191_s22, 1024, %s10193_s28, %s10195_s6, %s10068_s20, %s10068_s20, %s10069_s27  }
  0x3f   : > { %p12028_p7 = scmp.ne.s32.totalorder %s12024_s26, 0 }
  0x41   : > { %176 = sbr.rel (%p12028_p7) target bundleno = 6223 (0x184f), region = 32 }
  0x46   : > { %p12029_p12 = scmp.eq.s32.totalorder %s10115_s16, 0 }
  0x48   : > { %10034 = dma.done.wait (%p12029_p12), [#allocation5], 64   ;;  %p12030_p9 = pmov %p12029_p12 }
  0x4a   : > { %10036 = vsyncadd (%p12030_p9), [#allocation5], 4294967232  ;;  %p12031_p6 = pmov %p12030_p9 }
  0x4c   : > { %10038 = dma.done.wait (%p12031_p6), [#allocation6], 16   ;;  %p12032_p11 = pmov %p12031_p6 }
  0x4d   : > { %s10227_s30 = sand.u32 1, %s10055_s13   ;;  %p12033_p13 = scmp.ne.s32.totalorder %s12021_s23, 0 }
  0x4e   : > { %10040 = vsyncadd (%p12032_p11), [#allocation6], 4294967280  ;;  %s8438_s26 = sshll.u32 %s10227_s30, 6  ;;  %s187_s4 = scalar_lea.sflag [#allocation3], %s10227_s30 }
  0x4f   : > { %s10233_s22 = scalar_lea.vmem [#allocation8], %s8438_s26 }
  0x50   : > { %10042 = dma.done.wait (%p12033_p13), %s187_s4, 1024  }
  0x51   : > { %10044 = vsyncadd (%p12033_p13), %s187_s4, 4294966272 }
  0x52   : > { %195 = sfence }
  0x53   : > { %v10240_v0 = vld [vmem:[%s10233_s22 + $0x8] sm:$0xff]  ;;  %vm352_vm0 = vcmask 130048   ;;  %v10243_v1 = vld [vmem:[%s10233_s22 + $0x18] sm:$0xff]  ;;  %v10246_v2 = vld [vmem:[%s10233_s22] sm:$0xff]  ;;  %v214_v3 = vlaneseq  ;;  %v11990_v12 = vmov 0.0   ;;  %s240_s23 = sld [smem:[#allocation2]] }
  0x54   : > { %9213 = vmatprep.subr.msk.mxu0 %vm352_vm0, %v10240_v0  ;;  %9220 = vmatprep.subr.msk.mxu1 %vm352_vm0, %v10243_v1  ;;  %v10253_v4 = vld [vmem:[%s10233_s22 + $0x10] sm:$0xff]  ;;  %v10270_v8 = vld [vmem:[%s10233_s22 + $0x28] sm:$0xff]  ;;  %v10273_v9 = vld [vmem:[%s10233_s22 + $0x38] sm:$0xff]  ;;  %s8446_s28 = sld [smem:[#allocation2 + $0x1]]  ;;  %p12071_p10 = scmp.ne.s32.totalorder %s12022_s24, 0 }
  0x55   : > { %9214 = vmatpush3.xpose.msk.msra.mxu0 %vm352_vm0, %v10240_v0  ;;  %9221 = vmatpush3.xpose.msk.msra.mxu1 %vm352_vm0, %v10243_v1  ;;  %v10259_v5 = vshrl.u32 %v214_v3, 7  ;;  %v10261_v6 = vand.u32 127, %v214_v3  ;;  %v10299_v15 = vld [vmem:[%s10233_s22 + $0x20] sm:$0xff]  ;;  %v10302_v16 = vld [vmem:[%s10233_s22 + $0x30] sm:$0xff]  ;;  %s8447_s6 = sld [smem:[#allocation2 + $0x2]] }
  0x56   : > { %9215 = vmatprep.subr.msk.mxu0 %vm352_vm0, %v10246_v2  ;;  %9222 = vmatprep.subr.msk.mxu1 %vm352_vm0, %v10253_v4  ;;  %s8448_s29 = sld [smem:[#allocation2 + $0x3]] }
  0x57   : > { %12034 = vst [vmem:[#allocation14_spill] sm:$0xff] %v10259_v5  ;;  %12035 = vst [vmem:[#allocation15_spill] sm:$0xff] %v10261_v6  ;;  %v223_v7 = vadd.s32 %v10261_v6, %v10259_v5  ;;  %v10276_v10 = vadd.s32 8, %v10259_v5  ;;  %s262_s7 = sld [smem:[#allocation7]] }
  0x58   : > { %s8449_s8 = sld [smem:[#allocation2 + $0x80]] }
  0x59   : > { %12036 = vst [vmem:[#allocation16_spill] sm:$0xff] %v10276_v10  ;;  %9216 = vmatpush3.xpose.msk.msra.mxu0 %vm352_vm0, %v10246_v2  ;;  %9223 = vmatpush3.xpose.msk.msra.mxu1 %vm352_vm0, %v10253_v4  ;;  %vm225_vm1 = vcmp.eq.s32.totalorder %v223_v7, 15  ;;  %v224_v11 = vadd.s32 %v10261_v6, %v10276_v10  ;;  %v10336_v19 = vstv %s240_s23  ;;  %s8450_s9 = sld [smem:[#allocation2 + $0x81]] }
  0x5a   : > { %v10285_v13 = vsel %vm225_vm1, 1.0, %v11990_v12  ;;  %9227 = vmatprep.subr.msk.mxu0 %vm352_vm0, %v10270_v8  ;;  %9234 = vmatprep.subr.msk.mxu1 %vm352_vm0, %v10273_v9  ;;  %12037 = vst [vmem:[#allocation17_spill] sm:$0xff] %v10336_v19  ;;  %v10338_v20 = vstv %s8446_s28  ;;  %s8451_s10 = sld [smem:[#allocation2 + $0x82]] }
  0x5b   : > { %9217 = vmatprep.mubr.msk.f32.mxu0 %vm352_vm0, %v10285_v13  ;;  %9224 = vmatprep.mubr.msk.f32.mxu1 %vm352_vm0, %v10285_v13  ;;  %vm226_vm2 = vcmp.eq.s32.totalorder %v224_v11, 15  ;;  %12038 = vst [vmem:[#allocation18_spill] sm:$0xff] %v10338_v20  ;;  %v10348_v25 = vstv %s8447_s6  ;;  %s8452_s5 = sld [smem:[#allocation2 + $0x83]] }
  0x5c   : > { %v10296_v14 = vsel %vm226_vm2, 1.0, %v11990_v12  ;;  %12039 = vst [vmem:[#allocation19_spill] sm:$0xff] %v10348_v25  ;;  %v10354_v28 = vstv %s8448_s29  ;;  %s8453_s11 = sld [smem:[#allocation7 + $0x1]] }
  0x5d   : > { %9218 = vmatmul.mubr.msk.f32.vlgmr.msra.gmra.mxu0 %vm352_vm0, %v10296_v14  ;;  %9225 = vmatmul.mubr.msk.f32.vlgmr.msra.gmra.mxu1 %vm352_vm0, %v10296_v14  ;;  %v10370_v39 = vstv %s262_s7  ;;  %s8454_s17 = sld [smem:[#allocation2 + $0x100]] }
  0x5e   : > { %9228 = vmatpush3.xpose.msk.msra.mxu0 %vm352_vm0, %v10270_v8  ;;  %9235 = vmatpush3.xpose.msk.msra.mxu1 %vm352_vm0, %v10273_v9  ;;  %v10384_v46 = vstv %s8449_s8  ;;  %s8455_s19 = sld [smem:[#allocation2 + $0x101]] }
  0x5f   : > { %9229 = vmatprep.subr.msk.mxu0 %vm352_vm0, %v10299_v15  ;;  %9236 = vmatprep.subr.msk.mxu1 %vm352_vm0, %v10302_v16  ;;  %12040 = vst [vmem:[#allocation20_spill] sm:$0xff] %v10384_v46  ;;  %v10386_v47 = vstv %s8450_s9  ;;  %s8456_s20 = sld [smem:[#allocation2 + $0x102]] }
  0x60   : > { %9231 = vmatprep.mubr.msk.f32.mxu0 %vm352_vm0, %v10285_v13  ;;  %9238 = vmatprep.mubr.msk.f32.mxu1 %vm352_vm0, %v10285_v13  ;;  %12041 = vst [vmem:[#allocation21_spill] sm:$0xff] %v10386_v47  ;;  %v10388_v48 = vstv %s8451_s10  ;;  %s8457_s27 = sld [smem:[#allocation2 + $0x103]] }
  0x61   : > { %12042 = vst [vmem:[#allocation22_spill] sm:$0xff] %v10388_v48  ;;  %v10396_v52 = vstv %s8452_s5  ;;  %s8458_s4 = sld [smem:[#allocation7 + $0x2]] }
  0x62   : > { %9230 = vmatpush3.xpose.msk.msra.mxu0 %vm352_vm0, %v10299_v15  ;;  %9237 = vmatpush3.xpose.msk.msra.mxu1 %vm352_vm0, %v10302_v16  ;;  %v10408_v3 = vstv %s8453_s11  ;;  %s8459_s23 = sld [smem:[#allocation2 + $0x180]] }
  0x63   : > { %s8460_s28 = sld [smem:[#allocation2 + $0x181]] }
  0x64   : > { %s8461_s6 = sld [smem:[#allocation2 + $0x182]] }
  0x65   : > { %9232 = vmatmul.mubr.msk.f32.vlgmr.msra.gmra.mxu0 %vm352_vm0, %v10296_v14  ;;  %9239 = vmatmul.mubr.msk.f32.vlgmr.msra.gmra.mxu1 %vm352_vm0, %v10296_v14  ;;  %s8462_s29 = sld [smem:[#allocation2 + $0x183]] }
  0x66   : > { %9245 = vmatprep.mubr.msk.f32.mxu0 %vm352_vm0, %v10285_v13  ;;  %9252 = vmatprep.mubr.msk.f32.mxu1 %vm352_vm0, %v10285_v13  ;;  %s8463_s7 = sld [smem:[#allocation7 + $0x3]] }
 0x11d   : > { %v10332_v17 = vpop.f32.mrf.mxu0  ;;  %v10334_v18 = vpop.f32.mrf.mxu1 }
 0x11e   : > { %v684_v23 = vmul.f32 %v10332_v17, %v10336_v19  ;;  %v686_v24 = vmul.f32 %v10334_v18, %v10338_v20  ;;  %v945_v49 = vmul.f32 %v10332_v17, %v10384_v46  ;;  %v947_v50 = vmul.f32 %v10334_v18, %v10386_v47 }
 0x11f   : > { %v10340_v21 = vpop.f32.mrf.mxu0  ;;  %v10342_v22 = vpop.f32.mrf.mxu1 }
 0x120   : > { %v683_v26 = vmul.f32 %v10340_v21, %v10336_v19  ;;  %v685_v27 = vmul.f32 %v10342_v22, %v10338_v20  ;;  %v688_v34 = vadd.f32 %v686_v24, %v684_v23  ;;  %v944_v53 = vmul.f32 %v10340_v21, %v10384_v46 }
 0x121   : > { %v946_v54 = vmul.f32 %v10342_v22, %v10386_v47  ;;  %v949_v55 = vadd.f32 %v947_v50, %v945_v49 }
 0x122   : > { %v687_v37 = vadd.f32 %v685_v27, %v683_v26  ;;  %v10428_v26 = vstv %s8454_s17  ;;  %v10430_v27 = vstv %s8455_s19  ;;  %s10071_s17 = smov [#allocation9]  }
 0x123   : > { %v948_v59 = vadd.f32 %v946_v54, %v944_v53  ;;  %12043 = vst [vmem:[#allocation23_spill] sm:$0xff] %v10428_v26  ;;  %12044 = vst [vmem:[#allocation24_spill] sm:$0xff] %v10430_v27  ;;  %s9995_s19 = sshll.u32 %s10071_s17, 4  ;;  %s9996_s19 = int_to_ptr.vmem [resolvable:$false] %s9995_s19 }
 0x125   : > { %v10356_v29 = vpop.f32.mrf.mxu0  ;;  %v10358_v30 = vpop.f32.mrf.mxu1 }
 0x126   : > { %v690_v31 = vmul.f32 %v10356_v29, %v10348_v25  ;;  %v694_v35 = vmul.f32 %v10358_v30, %v10354_v28  ;;  %v951_v51 = vmul.f32 %v10356_v29, %v10388_v48  ;;  %v955_v58 = vmul.f32 %v10358_v30, %v10396_v52 }
 0x127   : > { %v10362_v32 = vpop.f32.mrf.mxu0  ;;  %v10364_v33 = vpop.f32.mrf.mxu1 }
 0x128   : > { %v689_v36 = vmul.f32 %v10362_v32, %v10348_v25  ;;  %v692_v38 = vadd.f32 %v690_v31, %v688_v34  ;;  %v693_v41 = vmul.f32 %v10364_v33, %v10354_v28  ;;  %v950_v56 = vmul.f32 %v10362_v32, %v10388_v48 }
 0x129   : > { %v953_v57 = vadd.f32 %v951_v51, %v949_v55  ;;  %v954_v7 = vmul.f32 %v10364_v33, %v10396_v52  ;;  %v10432_v31 = vstv %s8456_s20  ;;  %v1206_v34 = vmul.f32 %v10332_v17, %v10428_v26  ;;  %s9997_s20 = scalar_lea.vmem %s9996_s19, 2048 }
 0x12a   : > { %v691_v40 = vadd.f32 %v689_v36, %v687_v37  ;;  %v696_v42 = vadd.f32 %v694_v35, %v692_v38  ;;  %v952_v62 = vadd.f32 %v950_v56, %v948_v59  ;;  %12045 = vst [vmem:[#allocation25_spill] sm:$0xff] %v10432_v31  ;;  %v1208_v35 = vmul.f32 %v10334_v18, %v10430_v27 }
 0x12b   : > { %v957_v61 = vadd.f32 %v955_v58, %v953_v57  ;;  %v1212_v37 = vmul.f32 %v10356_v29, %v10432_v31  ;;  %v10458_v56 = vstv %s8458_s4 }
 0x12c   : > { %v695_v43 = vadd.f32 %v693_v41, %v691_v40  ;;  %v698_v44 = vadd.f32 %v696_v42, %v10370_v39  ;;  %v956_v23 = vadd.f32 %v954_v7, %v952_v62  ;;  %v10442_v40 = vstv %s8457_s27 }
 0x12d   : > { %v959_v11 = vadd.f32 %v957_v61, %v10408_v3  ;;  %v1205_v41 = vmul.f32 %v10340_v21, %v10428_v26  ;;  %v1207_v42 = vmul.f32 %v10342_v22, %v10430_v27  ;;  %v1216_v49 = vmul.f32 %v10358_v30, %v10442_v40 }
 0x12e   : > { %v697_v45 = vadd.f32 %v695_v43, %v10370_v39  ;;  %9241 = vmatprep.subr.msk.mxu0 %vm352_vm0, %v698_v44  ;;  %v958_v24 = vadd.f32 %v956_v23, %v10408_v3  ;;  %v1210_v43 = vadd.f32 %v1208_v35, %v1206_v34  ;;  %v1215_v57 = vmul.f32 %v10364_v33, %v10442_v40 }
 0x12f   : > { %9242 = vmatpush3.xpose.msk.msra.mxu0 %vm352_vm0, %v698_v44  ;;  %v1211_v44 = vmul.f32 %v10362_v32, %v10432_v31  ;;  %v1209_v50 = vadd.f32 %v1207_v42, %v1205_v41  ;;  %v10482_v62 = vstv %s8459_s23  ;;  %v10486_v7 = vstv %s8461_s6 }
 0x130   : > { %9243 = vmatprep.subr.msk.mxu0 %vm352_vm0, %v697_v45  ;;  %12046 = vst [vmem:[#allocation26_spill] sm:$0xff] %v10482_v62  ;;  %12048 = vst [vmem:[#allocation28_spill] sm:$0xff] %v10486_v7  ;;  %v1467_v23 = vmul.f32 %v10332_v17, %v10482_v62  ;;  %v1473_v35 = vmul.f32 %v10356_v29, %v10486_v7 }
 0x131   : > { %v1213_v54 = vadd.f32 %v1211_v44, %v1209_v50 }
 0x133   : > { %9244 = vmatpush3.xpose.msk.msra.mxu0 %vm352_vm0, %v697_v45  ;;  %v1214_v45 = vadd.f32 %v1212_v37, %v1210_v43  ;;  %v1217_v59 = vadd.f32 %v1215_v57, %v1213_v54  ;;  %v10498_v37 = vstv %s8462_s29  ;;  %v1472_v43 = vmul.f32 %v10362_v32, %v10486_v7 }
 0x134   : > { %v1476_v57 = vmul.f32 %v10364_v33, %v10498_v37 }
 0x135   : > { %v1218_v53 = vadd.f32 %v1216_v49, %v1214_v45  ;;  %v1477_v45 = vmul.f32 %v10358_v30, %v10498_v37 }
 0x136   : > { %9246 = vmatmul.mubr.msk.f32.vlgmr.msra.gmra.mxu0 %vm352_vm0, %v10296_v14 }
 0x137   : > { %9259 = vmatprep.mubr.msk.f32.mxu0 %vm352_vm0, %v10285_v13  ;;  %v1220_v58 = vadd.f32 %v1218_v53, %v10458_v56 }
 0x1f6   : > { %v9247_v60 = vpop.f32.mrf.mxu0 }
 0x1f7   : > { %9248 = vmatprep.subr.msk.mxu1 %vm352_vm0, %v9247_v60 }
 0x1f8   : > { %v771_v63 = vpop.f32.mrf.mxu0  ;;  %9249 = vmatpush3.xpose.msk.msra.mxu1 %vm352_vm0, %v9247_v60  ;;  %v1219_v60 = vadd.f32 %v1217_v59, %v10458_v56 }
 0x1f9   : > { %9250 = vmatprep.subr.msk.mxu1 %vm352_vm0, %v771_v63 }
 0x1fc   : > { %9251 = vmatpush3.xpose.msk.msra.mxu1 %vm352_vm0, %v771_v63  ;;  %v10484_v63 = vstv %s8460_s28 }
 0x1fd   : > { %9262 = vmatprep.subr.msk.mxu1 %vm352_vm0, %v959_v11  ;;  %12047 = vst [vmem:[#allocation27_spill] sm:$0xff] %v10484_v63  ;;  %v1468_v41 = vmul.f32 %v10342_v22, %v10484_v63 }
 0x1ff   : > { %9253 = vmatmul.mubr.msk.f32.vlgmr.msra.gmra.mxu1 %vm352_vm0, %v10296_v14 }
 0x200   : > { %9263 = vmatpush3.xpose.msk.msra.mxu1 %vm352_vm0, %v959_v11  ;;  %9266 = vmatprep.mubr.msk.f32.mxu1 %vm352_vm0, %v10285_v13 }
 0x201   : > { %9264 = vmatprep.subr.msk.mxu1 %vm352_vm0, %v958_v24 }
 0x204   : > { %9265 = vmatpush3.xpose.msk.msra.mxu1 %vm352_vm0, %v958_v24  ;;  %v1469_v24 = vmul.f32 %v10334_v18, %v10484_v63 }
 0x206   : > { %v1471_v42 = vadd.f32 %v1469_v24, %v1467_v23 }
 0x207   : > { %9267 = vmatmul.mubr.msk.f32.vlgmr.msra.gmra.mxu1 %vm352_vm0, %v10296_v14 }
 0x208   : > { %9280 = vmatprep.mubr.msk.f32.mxu1 %vm352_vm0, %v10285_v13  ;;  %v1475_v44 = vadd.f32 %v1473_v35, %v1471_v42 }
 0x2bf   : > { %v9254_v36 = vpop.f32.mrf.mxu1 }
 0x2c0   : > { %9255 = vmatprep.subr.msk.mxu0 %vm352_vm0, %v9254_v36 }
 0x2c1   : > { %v852_v38 = vpop.f32.mrf.mxu1  ;;  %9256 = vmatpush3.xpose.msk.msra.mxu0 %vm352_vm0, %v9254_v36 }
 0x2c2   : > { %9257 = vmatprep.subr.msk.mxu0 %vm352_vm0, %v852_v38 }
 0x2c5   : > { %9258 = vmatpush3.xpose.msk.msra.mxu0 %vm352_vm0, %v852_v38  ;;  %v1466_v38 = vmul.f32 %v10340_v21, %v10482_v62 }
 0x2c7   : > { %v9268_v51 = vpop.f32.mrf.mxu1  ;;  %v1470_v49 = vadd.f32 %v1468_v41, %v1466_v38 }
 0x2c8   : > { %9260 = vmatmul.mubr.msk.f32.vlgmr.msra.gmra.mxu0 %vm352_vm0, %v10296_v14  ;;  %9269 = vmatprep.subr.msk.mxu0 %vm352_vm0, %v9268_v51 }
 0x2c9   : > { %v1032_v55 = vpop.f32.mrf.mxu1  ;;  %9270 = vmatpush3.xpose.msk.msra.mxu0 %vm352_vm0, %v9268_v51  ;;  %9273 = vmatprep.mubr.msk.f32.mxu0 %vm352_vm0, %v10285_v13  ;;  %v1479_v51 = vadd.f32 %v1477_v45, %v1475_v44  ;;  %v1474_v53 = vadd.f32 %v1472_v43, %v1470_v49 }
 0x2ca   : > { %9271 = vmatprep.subr.msk.mxu0 %vm352_vm0, %v1032_v55 }
 0x2cb   : > { %v1478_v59 = vadd.f32 %v1476_v57, %v1474_v53 }
 0x2cd   : > { %9272 = vmatpush3.xpose.msk.msra.mxu0 %vm352_vm0, %v1032_v55  ;;  %v10514_v55 = vstv %s8463_s7 }
 0x2ce   : > { %9283 = vmatprep.subr.msk.mxu0 %vm352_vm0, %v1220_v58 }
 0x2d0   : > { %9274 = vmatmul.mubr.msk.f32.vlgmr.msra.gmra.mxu0 %vm352_vm0, %v10296_v14 }
 0x2d1   : > { %9284 = vmatpush3.xpose.msk.msra.mxu0 %vm352_vm0, %v1220_v58  ;;  %9287 = vmatprep.mubr.msk.f32.mxu0 %vm352_vm0, %v10285_v13  ;;  %v1481_v58 = vadd.f32 %v1479_v51, %v10514_v55 }
 0x2d2   : > { %9285 = vmatprep.subr.msk.mxu0 %vm352_vm0, %v1219_v60 }
 0x2d5   : > { %9286 = vmatpush3.xpose.msk.msra.mxu0 %vm352_vm0, %v1219_v60  ;;  %v1480_v60 = vadd.f32 %v1478_v59, %v10514_v55 }
 0x2d8   : > { %9288 = vmatmul.mubr.msk.f32.vlgmr.msra.gmra.mxu0 %vm352_vm0, %v10296_v14 }
 0x2d9   : > { %9301 = vmatprep.mubr.msk.f32.mxu0 %vm352_vm0, %v10285_v13 }
 0x388   : > { %v10480_v61 = vpop.f32.mrf.mxu0 }
 0x38a   : > { %v10488_v11 = vpop.f32.mrf.mxu0 }
 0x390   : > { %v9275_v34 = vpop.f32.mrf.mxu0 }
 0x391   : > { %9276 = vmatprep.subr.msk.mxu1 %vm352_vm0, %v9275_v34 }
 0x392   : > { %v1113_v36 = vpop.f32.mrf.mxu0  ;;  %9277 = vmatpush3.xpose.msk.msra.mxu1 %vm352_vm0, %v9275_v34 }
 0x393   : > { %9278 = vmatprep.subr.msk.mxu1 %vm352_vm0, %v1113_v36 }
 0x396   : > { %9279 = vmatpush3.xpose.msk.msra.mxu1 %vm352_vm0, %v1113_v36 }
 0x398   : > { %v9289_v50 = vpop.f32.mrf.mxu0 }
 0x399   : > { %9281 = vmatmul.mubr.msk.f32.vlgmr.msra.gmra.mxu1 %vm352_vm0, %v10296_v14  ;;  %9290 = vmatprep.subr.msk.mxu1 %vm352_vm0, %v9289_v50 }
 0x39a   : > { %v1293_v54 = vpop.f32.mrf.mxu0  ;;  %9291 = vmatpush3.xpose.msk.msra.mxu1 %vm352_vm0, %v9289_v50  ;;  %9294 = vmatprep.mubr.msk.f32.mxu1 %vm352_vm0, %v10285_v13 }
 0x39b   : > { %9292 = vmatprep.subr.msk.mxu1 %vm352_vm0, %v1293_v54 }
 0x39e   : > { %9293 = vmatpush3.xpose.msk.msra.mxu1 %vm352_vm0, %v1293_v54 }
 0x39f   : > { %9304 = vmatprep.subr.msk.mxu1 %vm352_vm0, %v1481_v58 }
 0x3a1   : > { %9295 = vmatmul.mubr.msk.f32.vlgmr.msra.gmra.mxu1 %vm352_vm0, %v10296_v14 }
 0x3a2   : > { %9305 = vmatpush3.xpose.msk.msra.mxu1 %vm352_vm0, %v1481_v58  ;;  %9308 = vmatprep.mubr.msk.f32.mxu1 %vm352_vm0, %v10285_v13 }
 0x3a3   : > { %9306 = vmatprep.subr.msk.mxu1 %vm352_vm0, %v1480_v60 }
 0x3a6   : > { %9307 = vmatpush3.xpose.msk.msra.mxu1 %vm352_vm0, %v1480_v60 }
 0x3a9   : > { %9309 = vmatmul.mubr.msk.f32.vlgmr.msra.gmra.mxu1 %vm352_vm0, %v10296_v14 }
 0x3aa   : > { %9322 = vmatprep.mubr.msk.f32.mxu1 %vm352_vm0, %v10285_v13 }
 0x459   : > { %v10536_v23 = vpop.f32.mrf.mxu1 }
 0x45b   : > { %v10538_v24 = vpop.f32.mrf.mxu1 }
 0x461   : > { %v9296_v34 = vpop.f32.mrf.mxu1 }
 0x462   : > { %9297 = vmatprep.subr.msk.mxu0 %vm352_vm0, %v9296_v34 }
 0x463   : > { %v1374_v35 = vpop.f32.mrf.mxu1  ;;  %9298 = vmatpush3.xpose.msk.msra.mxu0 %vm352_vm0, %v9296_v34 }
 0x464   : > { %9299 = vmatprep.subr.msk.mxu0 %vm352_vm0, %v1374_v35 }
 0x467   : > { %9300 = vmatpush3.xpose.msk.msra.mxu0 %vm352_vm0, %v1374_v35 }
 0x469   : > { %v9310_v36 = vpop.f32.mrf.mxu1 }
 0x46a   : > { %9302 = vmatmul.mubr.msk.f32.vlgmr.msra.gmra.mxu0 %vm352_vm0, %v10296_v14  ;;  %9311 = vmatprep.subr.msk.mxu0 %vm352_vm0, %v9310_v36 }
 0x46b   : > { %v1554_v38 = vpop.f32.mrf.mxu1  ;;  %9312 = vmatpush3.xpose.msk.msra.mxu0 %vm352_vm0, %v9310_v36  ;;  %9315 = vmatprep.mubr.msk.f32.mxu0 %vm352_vm0, %v10285_v13 }
 0x46c   : > { %9313 = vmatprep.subr.msk.mxu0 %vm352_vm0, %v1554_v38 }
 0x46f   : > { %9314 = vmatpush3.xpose.msk.msra.mxu0 %vm352_vm0, %v1554_v38 }
 0x470   : > { %9325 = vmatprep.subr.msk.mxu0 %vm352_vm0, %v10332_v17 }
 0x472   : > { %9316 = vmatmul.mubr.msk.f32.vlgmr.msra.gmra.mxu0 %vm352_vm0, %v10296_v14 }
 0x473   : > { %9326 = vmatpush3.xpose.msk.msra.mxu0 %vm352_vm0, %v10332_v17  ;;  %9329 = vmatprep.mubr.msk.f32.mxu0 %vm352_vm0, %v10285_v13 }
 0x474   : > { %9327 = vmatprep.subr.msk.mxu0 %vm352_vm0, %v10340_v21 }
 0x477   : > { %9328 = vmatpush3.xpose.msk.msra.mxu0 %vm352_vm0, %v10340_v21 }
 0x478   : > { %9339 = vmatprep.subr.msk.mxu0 %vm352_vm0, %v10356_v29 }
 0x47a   : > { %9330 = vmatmul.mubr.msk.f32.vlgmr.msra.gmra.mxu0 %vm352_vm0, %v10296_v14 }
 0x47b   : > { %9340 = vmatpush3.xpose.msk.msra.mxu0 %vm352_vm0, %v10356_v29  ;;  %9343 = vmatprep.mubr.msk.f32.mxu0 %vm352_vm0, %v10285_v13 }
 0x47c   : > { %9341 = vmatprep.subr.msk.mxu0 %vm352_vm0, %v10362_v32 }
 0x47f   : > { %9342 = vmatpush3.xpose.msk.msra.mxu0 %vm352_vm0, %v10362_v32 }
 0x482   : > { %9344 = vmatmul.mubr.msk.f32.vlgmr.msra.gmra.mxu0 %vm352_vm0, %v10296_v14 }
 0x483   : > { %9357 = vmatprep.mubr.msk.f32.mxu0 %vm352_vm0, %v10285_v13 }
 0x52a   : > { %v10580_v17 = vpop.f32.mrf.mxu0 }
 0x52c   : > { %v10582_v21 = vpop.f32.mrf.mxu0 }
 0x532   : > { %v9317_v29 = vpop.f32.mrf.mxu0 }
 0x533   : > { %9318 = vmatprep.subr.msk.mxu1 %vm352_vm0, %v9317_v29 }
 0x534   : > { %v1635_v41 = vpop.f32.mrf.mxu0  ;;  %9319 = vmatpush3.xpose.msk.msra.mxu1 %vm352_vm0, %v9317_v29 }
 0x535   : > { %9320 = vmatprep.subr.msk.mxu1 %vm352_vm0, %v1635_v41 }
 0x538   : > { %9321 = vmatpush3.xpose.msk.msra.mxu1 %vm352_vm0, %v1635_v41 }
 0x539   : > { %9332 = vmatprep.subr.msk.mxu1 %vm352_vm0, %v10334_v18 }
 0x53b   : > { %9323 = vmatmul.mubr.msk.f32.vlgmr.msra.gmra.mxu1 %vm352_vm0, %v10296_v14 }
 0x53c   : > { %9333 = vmatpush3.xpose.msk.msra.mxu1 %vm352_vm0, %v10334_v18  ;;  %9336 = vmatprep.mubr.msk.f32.mxu1 %vm352_vm0, %v10285_v13  ;;  %v10616_v18 = vpop.f32.mrf.mxu0 }
 0x53d   : > { %9334 = vmatprep.subr.msk.mxu1 %vm352_vm0, %v10342_v22  ;;  %v2232_v50 = vmul.f32 %v10616_v18, %v10384_v46 }
 0x540   : > { %9335 = vmatpush3.xpose.msk.msra.mxu1 %vm352_vm0, %v10342_v22 }
 0x541   : > { %9346 = vmatprep.subr.msk.mxu1 %vm352_vm0, %v10358_v30 }
 0x543   : > { %9337 = vmatmul.mubr.msk.f32.vlgmr.msra.gmra.mxu1 %vm352_vm0, %v10296_v14 }
 0x544   : > { %9347 = vmatpush3.xpose.msk.msra.mxu1 %vm352_vm0, %v10358_v30  ;;  %9350 = vmatprep.mubr.msk.f32.mxu1 %vm352_vm0, %v10285_v13  ;;  %v10620_v30 = vpop.f32.mrf.mxu0 }
 0x545   : > { %9348 = vmatprep.subr.msk.mxu1 %vm352_vm0, %v10364_v33  ;;  %v2051_v53 = vmul.f32 %v10620_v30, %v10336_v19 }
 0x546   : > { %v10626_v43 = vpop.f32.mrf.mxu0 }
 0x547   : > { %v2058_v57 = vmul.f32 %v10626_v43, %v10348_v25  ;;  %v2238_v34 = vmul.f32 %v10626_v43, %v10388_v48 }
 0x548   : > { %9349 = vmatpush3.xpose.msk.msra.mxu1 %vm352_vm0, %v10364_v33  ;;  %v2052_v33 = vmul.f32 %v10616_v18, %v10336_v19  ;;  %v10638_v51 = vpop.f32.mrf.mxu0 }
 0x549   : > { %v2057_v59 = vmul.f32 %v10638_v51, %v10348_v25 }
 0x54b   : > { %9351 = vmatmul.mubr.msk.f32.vlgmr.msra.gmra.mxu1 %vm352_vm0, %v10296_v14 }
 0x54c   : > { %9364 = vmatprep.mubr.msk.f32.mxu1 %vm352_vm0, %v10285_v13 }
 0x5fb   : > { %v10618_v22 = vpop.f32.mrf.mxu1 }
 0x5fc   : > { %12049 = vst [vmem:[#allocation29_spill] sm:$0xff] %v10618_v22  ;;  %v2418_v22 = vmul.f32 %v10626_v43, %v10432_v31 }
 0x5fd   : > { %v10622_v32 = vpop.f32.mrf.mxu1 }
 0x5fe   : > { %12050 = vst [vmem:[#allocation30_spill] sm:$0xff] %v10622_v32 }
 0x603   : > { %v10624_v42 = vpop.f32.mrf.mxu1 }
 0x604   : > { %v2054_v44 = vmul.f32 %v10624_v42, %v10338_v20  ;;  %v2234_v54 = vmul.f32 %v10624_v42, %v10386_v47 }
 0x605   : > { %v10632_v45 = vpop.f32.mrf.mxu1 }
 0x606   : > { %v2053_v49 = vmul.f32 %v10632_v45, %v10338_v20  ;;  %v2056_v58 = vadd.f32 %v2054_v44, %v2052_v33  ;;  %v2233_v36 = vmul.f32 %v10632_v45, %v10386_v47  ;;  %v2236_v41 = vadd.f32 %v2234_v54, %v2232_v50 }
 0x607   : > { %v2231_v33 = vmul.f32 %v10620_v30, %v10384_v46  ;;  %v2237_v50 = vmul.f32 %v10638_v51, %v10388_v48  ;;  %v2413_v32 = vmul.f32 %v10632_v45, %v10430_v27 }
 0x608   : > { %v2055_v60 = vadd.f32 %v2053_v49, %v2051_v53  ;;  %v2060_v38 = vadd.f32 %v2058_v57, %v2056_v58  ;;  %v2412_v57 = vmul.f32 %v10616_v18, %v10428_v26  ;;  %v2414_v58 = vmul.f32 %v10624_v42, %v10430_v27 }
 0x60a   : > { %v2059_v49 = vadd.f32 %v2057_v59, %v2055_v60  ;;  %v2235_v59 = vadd.f32 %v2233_v36, %v2231_v33  ;;  %v2411_v36 = vmul.f32 %v10620_v30, %v10428_v26  ;;  %v2592_v33 = vmul.f32 %v10616_v18, %v10482_v62 }
 0x60b   : > { %v10650_v35 = vpop.f32.mrf.mxu1 }
 0x60c   : > { %v2062_v29 = vmul.f32 %v10650_v35, %v10354_v28  ;;  %v2242_v10 = vmul.f32 %v10650_v35, %v10396_v52 }
 0x60d   : > { %v10658_v44 = vpop.f32.mrf.mxu1 }
 0x60e   : > { %v2064_v12 = vadd.f32 %v2062_v29, %v2060_v38  ;;  %v2061_v53 = vmul.f32 %v10658_v44, %v10354_v28  ;;  %v2240_v38 = vadd.f32 %v2238_v34, %v2236_v41  ;;  %v2241_v6 = vmul.f32 %v10658_v44, %v10396_v52 }
 0x60f   : > { %v2416_v34 = vadd.f32 %v2414_v58, %v2412_v57  ;;  %v2422_v41 = vmul.f32 %v10650_v35, %v10442_v40  ;;  %v2415_v58 = vadd.f32 %v2413_v32, %v2411_v36  ;;  %v2597_v36 = vmul.f32 %v10638_v51, %v10486_v7 }
 0x610   : > { %v2066_v54 = vadd.f32 %v2064_v12, %v10370_v39  ;;  %v2063_v5 = vadd.f32 %v2061_v53, %v2059_v49  ;;  %v2244_v29 = vadd.f32 %v2242_v10, %v2240_v38  ;;  %v2239_v12 = vadd.f32 %v2237_v50, %v2235_v59 }
 0x611   : > { %v2594_v49 = vmul.f32 %v10624_v42, %v10484_v63  ;;  %v2417_v53 = vmul.f32 %v10638_v51, %v10432_v31  ;;  %v2420_v57 = vadd.f32 %v2418_v22, %v2416_v34  ;;  %v2593_v38 = vmul.f32 %v10632_v45, %v10484_v63 }
 0x612   : > { %9353 = vmatprep.subr.msk.mxu0 %vm352_vm0, %v2066_v54  ;;  %v2065_v60 = vadd.f32 %v2063_v5, %v10370_v39  ;;  %v2246_v5 = vadd.f32 %v2244_v29, %v10408_v3  ;;  %v2243_v10 = vadd.f32 %v2241_v6, %v2239_v12  ;;  %v2598_v22 = vmul.f32 %v10626_v43, %v10486_v7 }
 0x613   : > { %9354 = vmatpush3.xpose.msk.msra.mxu0 %vm352_vm0, %v2066_v54  ;;  %v2424_v50 = vadd.f32 %v2422_v41, %v2420_v57  ;;  %v2421_v54 = vmul.f32 %v10658_v44, %v10442_v40  ;;  %v2419_v32 = vadd.f32 %v2417_v53, %v2415_v58  ;;  %v2596_v59 = vadd.f32 %v2594_v49, %v2592_v33 }
 0x614   : > { %9355 = vmatprep.subr.msk.mxu0 %vm352_vm0, %v2065_v60  ;;  %v2245_v6 = vadd.f32 %v2243_v10, %v10408_v3  ;;  %v2602_v34 = vmul.f32 %v10650_v35, %v10498_v37  ;;  %v2601_v49 = vmul.f32 %v10658_v44, %v10498_v37 }
 0x615   : > { %v2426_v29 = vadd.f32 %v2424_v50, %v10458_v56  ;;  %v2423_v12 = vadd.f32 %v2421_v54, %v2419_v32  ;;  %v246_v32 = vmul.f32 %v10253_v4, %v10338_v20 }
 0x617   : > { %9356 = vmatpush3.xpose.msk.msra.mxu0 %vm352_vm0, %v2065_v60  ;;  %v2591_v60 = vmul.f32 %v10620_v30, %v10482_v62  ;;  %v2425_v41 = vadd.f32 %v2423_v12, %v10458_v56  ;;  %v271_v12 = vmul.f32 %v10384_v46, %v10240_v0 }
 0x618   : > { %9367 = vmatprep.subr.msk.mxu0 %vm352_vm0, %v2246_v5 }
 0x619   : > { %v2595_v10 = vadd.f32 %v2593_v38, %v2591_v60 }
 0x61a   : > { %9358 = vmatmul.mubr.msk.f32.vlgmr.msra.gmra.mxu0 %vm352_vm0, %v10296_v14 }
 0x61b   : > { %9368 = vmatpush3.xpose.msk.msra.mxu0 %vm352_vm0, %v2246_v5  ;;  %9371 = vmatprep.mubr.msk.f32.mxu0 %vm352_vm0, %v10285_v13  ;;  %v2600_v5 = vadd.f32 %v2598_v22, %v2596_v59  ;;  %v2599_v53 = vadd.f32 %v2597_v36, %v2595_v10  ;;  %v270_v10 = vmul.f32 %v10384_v46, %v10246_v2 }
 0x61c   : > { %9369 = vmatprep.subr.msk.mxu0 %vm352_vm0, %v2245_v6 }
 0x61d   : > { %v2604_v33 = vadd.f32 %v2602_v34, %v2600_v5  ;;  %v2603_v58 = vadd.f32 %v2601_v49, %v2599_v53  ;;  %v275_v34 = vmul.f32 %v10243_v1, %v10386_v47  ;;  %v259_v5 = vmul.f32 %v10273_v9, %v10354_v28 }
 0x61e   : > { %v258_v49 = vmul.f32 %v10302_v16, %v10354_v28 }
 0x61f   : > { %9370 = vmatpush3.xpose.msk.msra.mxu0 %vm352_vm0, %v2245_v6  ;;  %v2606_v57 = vadd.f32 %v2604_v33, %v10514_v55  ;;  %v2605_v6 = vadd.f32 %v2603_v58, %v10514_v55  ;;  %v277_v53 = vadd.f32 %v275_v34, %v271_v12 }
 0x620   : > { %9381 = vmatprep.subr.msk.mxu0 %vm352_vm0, %v2426_v29 }
 0x622   : > { %9372 = vmatmul.mubr.msk.f32.vlgmr.msra.gmra.mxu0 %vm352_vm0, %v10296_v14 }
 0x623   : > { %9382 = vmatpush3.xpose.msk.msra.mxu0 %vm352_vm0, %v2426_v29  ;;  %9385 = vmatprep.mubr.msk.f32.mxu0 %vm352_vm0, %v10285_v13  ;;  %v252_v29 = vmul.f32 %v10299_v15, %v10348_v25 }
 0x624   : > { %9383 = vmatprep.subr.msk.mxu0 %vm352_vm0, %v2425_v41 }
 0x627   : > { %9384 = vmatpush3.xpose.msk.msra.mxu0 %vm352_vm0, %v2425_v41  ;;  %v274_v41 = vmul.f32 %v10253_v4, %v10386_v47 }
 0x628   : > { %9395 = vmatprep.subr.msk.mxu0 %vm352_vm0, %v2606_v57 }
 0x62a   : > { %9386 = vmatmul.mubr.msk.f32.vlgmr.msra.gmra.mxu0 %vm352_vm0, %v10296_v14 }
 0x62b   : > { %9396 = vmatpush3.xpose.msk.msra.mxu0 %vm352_vm0, %v2606_v57  ;;  %9399 = vmatprep.mubr.msk.f32.mxu0 %vm352_vm0, %v10285_v13  ;;  %v281_v57 = vmul.f32 %v10270_v8, %v10388_v48 }
 0x62c   : > { %9397 = vmatprep.subr.msk.mxu0 %vm352_vm0, %v2605_v6 }
 0x62f   : > { %9398 = vmatpush3.xpose.msk.msra.mxu0 %vm352_vm0, %v2605_v6  ;;  %v276_v6 = vadd.f32 %v274_v41, %v270_v10  ;;  %v308_v10 = vmul.f32 %v10299_v15, %v10432_v31 }
 0x630   : > { %9409 = vmatprep.subr.msk.mxu0 %vm352_vm0, %v10616_v18 }
 0x632   : > { %9400 = vmatmul.mubr.msk.f32.vlgmr.msra.gmra.mxu0 %vm352_vm0, %v10296_v14 }
 0x633   : > { %9410 = vmatpush3.xpose.msk.msra.mxu0 %vm352_vm0, %v10616_v18  ;;  %9413 = vmatprep.mubr.msk.f32.mxu0 %vm352_vm0, %v10285_v13 }
 0x634   : > { %9411 = vmatprep.subr.msk.mxu0 %vm352_vm0, %v10620_v30 }
 0x637   : > { %9412 = vmatpush3.xpose.msk.msra.mxu0 %vm352_vm0, %v10620_v30 }
 0x638   : > { %9423 = vmatprep.subr.msk.mxu0 %vm352_vm0, %v10626_v43 }
 0x63a   : > { %9414 = vmatmul.mubr.msk.f32.vlgmr.msra.gmra.mxu0 %vm352_vm0, %v10296_v14 }
 0x63b   : > { %9424 = vmatpush3.xpose.msk.msra.mxu0 %vm352_vm0, %v10626_v43  ;;  %9427 = vmatprep.mubr.msk.f32.mxu0 %vm352_vm0, %v10285_v13 }
 0x63c   : > { %9425 = vmatprep.subr.msk.mxu0 %vm352_vm0, %v10638_v51 }
 0x63f   : > { %9426 = vmatpush3.xpose.msk.msra.mxu0 %vm352_vm0, %v10638_v51 }
 0x642   : > { %9428 = vmatmul.mubr.msk.f32.vlgmr.msra.gmra.mxu0 %vm352_vm0, %v10296_v14 }
 0x643   : > { %9441 = vmatprep.mubr.msk.f32.mxu0 %vm352_vm0, %v10285_v13 }
 0x6da   : > { %v9359_v18 = vpop.f32.mrf.mxu0 }
 0x6db   : > { %9360 = vmatprep.subr.msk.mxu1 %vm352_vm0, %v9359_v18 }
 0x6dc   : > { %v2139_v30 = vpop.f32.mrf.mxu0  ;;  %9361 = vmatpush3.xpose.msk.msra.mxu1 %vm352_vm0, %v9359_v18  ;;  %v280_v18 = vmul.f32 %v10299_v15, %v10388_v48 }
 0x6dd   : > { %9362 = vmatprep.subr.msk.mxu1 %vm352_vm0, %v2139_v30 }
 0x6e0   : > { %9363 = vmatpush3.xpose.msk.msra.mxu1 %vm352_vm0, %v2139_v30 }
 0x6e2   : > { %v9373_v43 = vpop.f32.mrf.mxu0 }
 0x6e3   : > { %9365 = vmatmul.mubr.msk.f32.vlgmr.msra.gmra.mxu1 %vm352_vm0, %v10296_v14  ;;  %9374 = vmatprep.subr.msk.mxu1 %vm352_vm0, %v9373_v43 }
 0x6e4   : > { %v2319_v51 = vpop.f32.mrf.mxu0  ;;  %9375 = vmatpush3.xpose.msk.msra.mxu1 %vm352_vm0, %v9373_v43  ;;  %9378 = vmatprep.mubr.msk.f32.mxu1 %vm352_vm0, %v10285_v13  ;;  %v283_v43 = vadd.f32 %v281_v57, %v277_v53  ;;  %v327_v57 = vmul.f32 %v10482_v62, %v10240_v0 }
 0x6e5   : > { %9376 = vmatprep.subr.msk.mxu1 %vm352_vm0, %v2319_v51 }
 0x6e8   : > { %9377 = vmatpush3.xpose.msk.msra.mxu1 %vm352_vm0, %v2319_v51  ;;  %v287_v51 = vmul.f32 %v10273_v9, %v10396_v52 }
 0x6ea   : > { %v9387_v50 = vpop.f32.mrf.mxu0 }
 0x6eb   : > { %9379 = vmatmul.mubr.msk.f32.vlgmr.msra.gmra.mxu1 %vm352_vm0, %v10296_v14  ;;  %9388 = vmatprep.subr.msk.mxu1 %vm352_vm0, %v9387_v50 }
 0x6ec   : > { %v2499_v54 = vpop.f32.mrf.mxu0  ;;  %9389 = vmatpush3.xpose.msk.msra.mxu1 %vm352_vm0, %v9387_v50  ;;  %9392 = vmatprep.mubr.msk.f32.mxu1 %vm352_vm0, %v10285_v13 }
 0x6ed   : > { %9390 = vmatprep.subr.msk.mxu1 %vm352_vm0, %v2499_v54 }
 0x6f0   : > { %9391 = vmatpush3.xpose.msk.msra.mxu1 %vm352_vm0, %v2499_v54  ;;  %v299_v54 = vmul.f32 %v10428_v26, %v10240_v0 }
 0x6f2   : > { %v9401_v38 = vpop.f32.mrf.mxu0 }
 0x6f3   : > { %9393 = vmatmul.mubr.msk.f32.vlgmr.msra.gmra.mxu1 %vm352_vm0, %v10296_v14  ;;  %9402 = vmatprep.subr.msk.mxu1 %vm352_vm0, %v9401_v38 }
 0x6f4   : > { %v2679_v22 = vpop.f32.mrf.mxu0  ;;  %9403 = vmatpush3.xpose.msk.msra.mxu1 %vm352_vm0, %v9401_v38  ;;  %9406 = vmatprep.mubr.msk.f32.mxu1 %vm352_vm0, %v10285_v13  ;;  %v303_v38 = vmul.f32 %v10243_v1, %v10430_v27 }
 0x6f5   : > { %9404 = vmatprep.subr.msk.mxu1 %vm352_vm0, %v2679_v22 }
 0x6f8   : > { %9405 = vmatpush3.xpose.msk.msra.mxu1 %vm352_vm0, %v2679_v22  ;;  %v282_v22 = vadd.f32 %v280_v18, %v276_v6 }
 0x6f9   : > { %9416 = vmatprep.subr.msk.mxu1 %vm352_vm0, %v10624_v42 }
 0x6fb   : > { %9407 = vmatmul.mubr.msk.f32.vlgmr.msra.gmra.mxu1 %vm352_vm0, %v10296_v14 }
 0x6fc   : > { %9417 = vmatpush3.xpose.msk.msra.mxu1 %vm352_vm0, %v10624_v42  ;;  %9420 = vmatprep.mubr.msk.f32.mxu1 %vm352_vm0, %v10285_v13  ;;  %v243_v42 = vmul.f32 %v10336_v19, %v10240_v0 }
 0x6fd   : > { %9418 = vmatprep.subr.msk.mxu1 %vm352_vm0, %v10632_v45 }
 0x700   : > { %9419 = vmatpush3.xpose.msk.msra.mxu1 %vm352_vm0, %v10632_v45  ;;  %v247_v45 = vmul.f32 %v10243_v1, %v10338_v20 }
 0x701   : > { %9430 = vmatprep.subr.msk.mxu1 %vm352_vm0, %v10650_v35 }
 0x702   : > { %v249_v59 = vadd.f32 %v247_v45, %v243_v42  ;;  %v286_v42 = vmul.f32 %v10302_v16, %v10396_v52 }
 0x703   : > { %9421 = vmatmul.mubr.msk.f32.vlgmr.msra.gmra.mxu1 %vm352_vm0, %v10296_v14 }
 0x704   : > { %9431 = vmatpush3.xpose.msk.msra.mxu1 %vm352_vm0, %v10650_v35  ;;  %9434 = vmatprep.mubr.msk.f32.mxu1 %vm352_vm0, %v10285_v13  ;;  %v242_v35 = vmul.f32 %v10336_v19, %v10246_v2  ;;  %v288_v12 = vadd.f32 %v286_v42, %v282_v22 }
 0x705   : > { %9432 = vmatprep.subr.msk.mxu1 %vm352_vm0, %v10658_v44 }
 0x706   : > { %v248_v60 = vadd.f32 %v246_v32, %v242_v35  ;;  %v298_v35 = vmul.f32 %v10428_v26, %v10246_v2  ;;  %v302_v32 = vmul.f32 %v10253_v4, %v10430_v27  ;;  %v292_v6 = vadd.f32 %v10408_v3, %v288_v12 }
 0x708   : > { %9433 = vmatpush3.xpose.msk.msra.mxu1 %vm352_vm0, %v10658_v44  ;;  %v253_v44 = vmul.f32 %v10270_v8, %v10348_v25  ;;  %v254_v33 = vadd.f32 %v252_v29, %v248_v60  ;;  %v305_v60 = vadd.f32 %v303_v38, %v299_v54  ;;  %v309_v29 = vmul.f32 %v10270_v8, %v10432_v31 }
 0x709   : > { %v1203_v38 = vadd.f32 %v10538_v24, %v292_v6 }
 0x70a   : > { %v255_v36 = vadd.f32 %v253_v44, %v249_v59  ;;  %v260_v30 = vadd.f32 %v258_v49, %v254_v33  ;;  %v289_v59 = vadd.f32 %v287_v51, %v283_v43  ;;  %v315_v49 = vmul.f32 %v10273_v9, %v10442_v40 }
 0x70b   : > { %9435 = vmatmul.mubr.msk.f32.vlgmr.msra.gmra.mxu1 %vm352_vm0, %v10296_v14  ;;  %v311_v53 = vadd.f32 %v309_v29, %v305_v60  ;;  %v326_v43 = vmul.f32 %v10482_v62, %v10246_v2  ;;  %v330_v51 = vmul.f32 %v10253_v4, %v10484_v63  ;;  %v342_v60 = vmul.f32 %v10302_v16, %v10498_v37 }
 0x70c   : > { %9448 = vmatprep.mubr.msk.f32.mxu1 %vm352_vm0, %v10285_v13  ;;  %v261_v58 = vadd.f32 %v259_v5, %v255_v36  ;;  %v264_v45 = vadd.f32 %v10370_v39, %v260_v30  ;;  %v304_v5 = vadd.f32 %v302_v32, %v298_v35  ;;  %v293_v33 = vadd.f32 %v10408_v3, %v289_v59 }
 0x70d   : > { %v314_v30 = vmul.f32 %v10302_v16, %v10442_v40  ;;  %v317_v0 = vadd.f32 %v315_v49, %v311_v53  ;;  %v336_v35 = vmul.f32 %v10299_v15, %v10486_v7  ;;  %v9415_v16 = vpop.f32.mrf.mxu0 }
 0x70e   : > { %v265_v50 = vadd.f32 %v10370_v39, %v261_v58  ;;  %v942_v36 = vadd.f32 %v10488_v11, %v264_v45  ;;  %v331_v58 = vmul.f32 %v10243_v1, %v10484_v63  ;;  %v310_v18 = vadd.f32 %v308_v10, %v304_v5 }
 0x70f   : > { %v337_v1 = vmul.f32 %v10270_v8, %v10486_v7  ;;  %v332_v45 = vadd.f32 %v330_v51, %v326_v43  ;;  %v321_v4 = vadd.f32 %v10458_v56, %v317_v0  ;;  %v3195_v0 = vmul.f32 %v9415_v16, %v10384_v46 }
 0x710   : > { %v943_v44 = vadd.f32 %v10480_v61, %v265_v50  ;;  %v1204_v50 = vadd.f32 %v10536_v23, %v293_v33  ;;  %v333_v54 = vadd.f32 %v331_v58, %v327_v57  ;;  %v316_v42 = vadd.f32 %v314_v30, %v310_v18  ;;  %v12052_v58 = vld [vmem:[#allocation30_spill] sm:$0xff]  ;;  %v2843_v30 = vpop.f32.mrf.mxu0 }
 0x711   : > { %v343_v23 = vmul.f32 %v10273_v9, %v10498_v37  ;;  %v338_v24 = vadd.f32 %v336_v35, %v332_v45  ;;  %v1465_v29 = vadd.f32 %v10580_v17, %v321_v4  ;;  %v3393_v45 = vmul.f32 %v9415_v16, %v10482_v62 }
 0x712   : > { %v339_v59 = vadd.f32 %v337_v1, %v333_v54  ;;  %v320_v8 = vadd.f32 %v10458_v56, %v316_v42  ;;  %v9429_v51 = vpop.f32.mrf.mxu0  ;;  %v3194_v4 = vmul.f32 %v2843_v30, %v10384_v46 }
 0x714   : > { %v345_v15 = vadd.f32 %v343_v23, %v339_v59 }
 0x716   : > { %v349_v9 = vadd.f32 %v10514_v55, %v345_v15  ;;  %v3201_v15 = vmul.f32 %v9429_v51, %v10388_v48 }
 0x7a3   : > { %v9366_v34 = vpop.f32.mrf.mxu1 }
 0x7a4   : > { %v10868_v41 = vadd.f32 %v9366_v34, %v943_v44  ;;  %v1464_v34 = vadd.f32 %v10582_v21, %v320_v8  ;;  %v3005_v8 = vpop.f32.mrf.mxu0 }
 0x7a5   : > { %v2220_v61 = vpop.f32.mrf.mxu1 }
 0x7a6   : > { %v10877_v11 = vadd.f32 %v2220_v61, %v942_v36  ;;  %v344_v36 = vadd.f32 %v342_v60, %v338_v24  ;;  %v12051_v61 = vld [vmem:[#allocation29_spill] sm:$0xff] }
 0x7a7   : > { %v1726_v53 = vadd.f32 %v12051_v61, %v349_v9  ;;  %v3101_v61 = vmul.f32 %v3005_v8, %v10348_v25 }
 0x7a8   : > { %v348_v49 = vadd.f32 %v10514_v55, %v344_v36 }
 0x7aa   : > { %v1725_v17 = vadd.f32 %v12052_v58, %v348_v49  ;;  %v3399_v49 = vmul.f32 %v9429_v51, %v10486_v7 }
 0x7ab   : > { %v9380_v22 = vpop.f32.mrf.mxu1 }
 0x7ac   : > { %v10892_v32 = vadd.f32 %v9380_v22, %v1204_v50  ;;  %v3096_v50 = vmul.f32 %v9415_v16, %v10336_v19 }
 0x7ad   : > { %v2400_v2 = vpop.f32.mrf.mxu1 }
 0x7ae   : > { %v10897_v44 = vadd.f32 %v2400_v2, %v1203_v38  ;;  %v3294_v38 = vmul.f32 %v9415_v16, %v10428_v26  ;;  %v3095_v2 = vmul.f32 %v2843_v30, %v10336_v19 }
 0x7b3   : > { %v9394_v12 = vpop.f32.mrf.mxu1 }
 0x7b4   : > { %v10904_v5 = vadd.f32 %v9394_v12, %v1465_v29  ;;  %v3102_v29 = vmul.f32 %v9429_v51, %v10348_v25  ;;  %v3293_v12 = vmul.f32 %v2843_v30, %v10428_v26 }
 0x7b5   : > { %v2580_v10 = vpop.f32.mrf.mxu1 }
 0x7b6   : > { %v10907_v33 = vadd.f32 %v2580_v10, %v1464_v34  ;;  %v3392_v34 = vmul.f32 %v2843_v30, %v10482_v62  ;;  %v3300_v10 = vmul.f32 %v9429_v51, %v10432_v31  ;;  %v3299_v51 = vmul.f32 %v3005_v8, %v10432_v31 }
 0x7bb   : > { %v9408_v57 = vpop.f32.mrf.mxu1 }
 0x7bc   : > { %v10912_v6 = vadd.f32 %v9408_v57, %v1726_v53  ;;  %v3200_v53 = vmul.f32 %v3005_v8, %v10388_v48 }
 0x7bd   : > { %v2760_v18 = vpop.f32.mrf.mxu1 }
 0x7be   : > { %v10914_v21 = vadd.f32 %v2760_v18, %v1725_v17 }
 0x7c3   : > { %v9422_v43 = vpop.f32.mrf.mxu1 }
 0x7c4   : > { %v3098_v54 = vmul.f32 %v9422_v43, %v10338_v20  ;;  %v3197_v1 = vmul.f32 %v9422_v43, %v10386_v47  ;;  %v3296_v22 = vmul.f32 %v9422_v43, %v10430_v27  ;;  %v3395_v35 = vmul.f32 %v9422_v43, %v10484_v63 }
 0x7c5   : > { %v2924_v42 = vpop.f32.mrf.mxu1 }
 0x7c6   : > { %v3097_v59 = vmul.f32 %v2924_v42, %v10338_v20  ;;  %v3196_v23 = vmul.f32 %v2924_v42, %v10386_v47  ;;  %v3100_v24 = vadd.f32 %v3098_v54, %v3096_v50  ;;  %v3199_v60 = vadd.f32 %v3197_v1, %v3195_v0 }
 0x7c7   : > { %v3298_v36 = vadd.f32 %v3296_v22, %v3294_v38  ;;  %v3397_v9 = vadd.f32 %v3395_v35, %v3393_v45  ;;  %v3295_v58 = vmul.f32 %v2924_v42, %v10430_v27  ;;  %v3394_v17 = vmul.f32 %v2924_v42, %v10484_v63 }
 0x7c8   : > { %v3099_v57 = vadd.f32 %v3097_v59, %v3095_v2  ;;  %v3198_v16 = vadd.f32 %v3196_v23, %v3194_v4  ;;  %v3104_v43 = vadd.f32 %v3102_v29, %v3100_v24  ;;  %v3203_v50 = vadd.f32 %v3201_v15, %v3199_v60 }
 0x7c9   : > { %v3302_v54 = vadd.f32 %v3300_v10, %v3298_v36  ;;  %v3398_v1 = vmul.f32 %v3005_v8, %v10486_v7  ;;  %v3401_v45 = vadd.f32 %v3399_v49, %v3397_v9  ;;  %v3297_v60 = vadd.f32 %v3295_v58, %v3293_v12 }
 0x7ca   : > { %v3103_v4 = vadd.f32 %v3101_v61, %v3099_v57  ;;  %v3202_v59 = vadd.f32 %v3200_v53, %v3198_v16  ;;  %v3396_v29 = vadd.f32 %v3394_v17, %v3392_v34 }
 0x7cb   : > { %v9436_v18 = vpop.f32.mrf.mxu1  ;;  %v3301_v61 = vadd.f32 %v3299_v51, %v3297_v60  ;;  %v12055_v51 = vmov 0.0  }
 0x7cc   : > { %v3106_v30 = vmul.f32 %v9436_v18, %v10354_v28  ;;  %v3205_v0 = vmul.f32 %v9436_v18, %v10396_v52  ;;  %v3304_v38 = vmul.f32 %v9436_v18, %v10442_v40  ;;  %v3403_v42 = vmul.f32 %v9436_v18, %v10498_v37 }
 0x7cd   : > { %v3086_v22 = vpop.f32.mrf.mxu1  ;;  %v3400_v53 = vadd.f32 %v3398_v1, %v3396_v29 }
 0x7ce   : > { %v3108_v35 = vadd.f32 %v3106_v30, %v3104_v43  ;;  %v3207_v2 = vadd.f32 %v3205_v0, %v3203_v50  ;;  %v3105_v23 = vmul.f32 %v3086_v22, %v10354_v28  ;;  %v3204_v24 = vmul.f32 %v3086_v22, %v10396_v52  ;;  %v12053_v50 = vld [vmem:[#allocation15_spill] sm:$0xff]  ;;  %v12054_v30 = vld [vmem:[#allocation14_spill] sm:$0xff] }
 0x7cf   : > { %v3306_v36 = vadd.f32 %v3304_v38, %v3302_v54  ;;  %v3405_v9 = vadd.f32 %v3403_v42, %v3401_v45  ;;  %v3303_v49 = vmul.f32 %v3086_v22, %v10442_v40  ;;  %v3402_v18 = vmul.f32 %v3086_v22, %v10498_v37  ;;  %v9929_v0 = vld [vmem:[%s10233_s22 + $0x8] sm:$0xff]  ;;  %v9930_v54 = vld [vmem:[%s10233_s22 + $0x18] sm:$0xff]  ;;  %v9931_v38 = vld [vmem:[%s10233_s22] sm:$0xff] }
 0x7d0   : > { %v3110_v15 = vadd.f32 %v3108_v35, %v10370_v39  ;;  %v3209_v8 = vadd.f32 %v3207_v2, %v10408_v3  ;;  %v3107_v10 = vadd.f32 %v3105_v23, %v3103_v4  ;;  %v3206_v7 = vadd.f32 %v3204_v24, %v3202_v59  ;;  %v9932_v22 = vld [vmem:[%s10233_s22 + $0x10] sm:$0xff]  ;;  %v9933_v2 = vld [vmem:[%s10233_s22 + $0x28] sm:$0xff]  ;;  %v9934_v42 = vld [vmem:[%s10233_s22 + $0x38] sm:$0xff] }
 0x7d1   : > { %v3305_v57 = vadd.f32 %v3303_v49, %v3301_v61  ;;  %v3404_v16 = vadd.f32 %v3402_v18, %v3400_v53  ;;  %v3308_v58 = vadd.f32 %v3306_v36, %v10458_v56  ;;  %v3407_v17 = vadd.f32 %v3405_v9, %v10514_v55  ;;  %v12056_v45 = vld [vmem:[#allocation16_spill] sm:$0xff]  ;;  %v9935_v4 = vld [vmem:[%s10233_s22 + $0x20] sm:$0xff] }
 0x7d2   : > { %9437 = vmatprep.subr.msk.mxu0 %vm352_vm0, %v3110_v15  ;;  %9444 = vmatprep.subr.msk.mxu1 %vm352_vm0, %v3209_v8  ;;  %v3109_v12 = vadd.f32 %v3107_v10, %v10370_v39  ;;  %v3208_v34 = vadd.f32 %v3206_v7, %v10408_v3  ;;  %vm219_vm3 = vcmp.eq.s32.totalorder %v12054_v30, %v12053_v50  ;;  %v9936_v59 = vld [vmem:[%s10233_s22 + $0x30] sm:$0xff]  ;;  %s11908_s22 = scalar_lea.vmem [#allocation9], %s8438_s26  ;;  %s8844_s26 = sshll.u32 %s10115_s16, 10 }
 0x7d3   : > { %9438 = vmatpush3.xpose.msk.msra.mxu0 %vm352_vm0, %v3110_v15  ;;  %9445 = vmatpush3.xpose.msk.msra.mxu1 %vm352_vm0, %v3209_v8  ;;  %v3307_v7 = vadd.f32 %v3305_v57, %v10458_v56  ;;  %v3406_v43 = vadd.f32 %v3404_v16, %v10514_v55  ;;  %v10991_v1 = vsel %vm219_vm3, 1.0, %v12055_v51  ;;  %vm220_vm4 = vcmp.eq.s32.totalorder %v12056_v45, %v12053_v50  ;;  %s8330_s8 = sshll.u32 %s11908_s22, 4  ;;  %s11933_s5 = scalar_lea.hbm %s11985_s3, %s8844_s26  ;;  %s11935_s8 = int_to_ptr.vmem [resolvable:$true] %s8330_s8 }
 0x7d4   : > { %9439 = vmatprep.subr.msk.mxu0 %vm352_vm0, %v3109_v12  ;;  %9446 = vmatprep.subr.msk.mxu1 %vm352_vm0, %v3208_v34  ;;  %v11008_v35 = vsel %vm220_vm4, 1.0, %v12055_v51  ;;  %s8317_s16 = scalar_lea.sflag [#allocation4], %s10227_s30  ;;  %s9991_s11 = scalar_lea.vmem %s11935_s8, 1024 }
 0x7d5   : > { %p9992_p3 = scmp.ne.s32.totalorder %s11935_s8, %s9991_s11  ;;  %p9998_p4 = scmp.lt.s32.totalorder %s11935_s8, %s9996_s19 }
 0x7d6   : > { %p9999_p5 = scmp.lt.s32.totalorder %s9997_s20, %s9991_s11 }
 0x7d7   : > { %9440 = vmatpush3.xpose.msk.msra.mxu0 %vm352_vm0, %v3109_v12  ;;  %9447 = vmatpush3.xpose.msk.msra.mxu1 %vm352_vm0, %v3208_v34  ;;  %p9993_p2 = pnand %p9992_p3, %p12071_p10 }
 0x7d8   : > { %9451 = vmatprep.subr.msk.mxu0 %vm352_vm0, %v3308_v58  ;;  %9458 = vmatprep.subr.msk.mxu1 %vm352_vm0, %v3407_v17  ;;  %p10000_p1 = por %p9999_p5, %p9998_p4 }
 0x7d9   : > { %p9994_p0 = pneg %p9993_p2 }
 0x7da   : > { %9442 = vmatmul.mubr.msk.f32.vlgmr.msra.gmra.mxu0 %vm352_vm0, %v10296_v14  ;;  %9449 = vmatmul.mubr.msk.f32.vlgmr.msra.gmra.mxu1 %vm352_vm0, %v10296_v14 }
 0x7db   : > { %9452 = vmatpush3.xpose.msk.msra.mxu0 %vm352_vm0, %v3308_v58  ;;  %9459 = vmatpush3.xpose.msk.msra.mxu1 %vm352_vm0, %v3407_v17  ;;  %p10001_p8 = pnand %p10000_p1, %p9994_p0 }
 0x7dc   : > { %9453 = vmatprep.subr.msk.mxu0 %vm352_vm0, %v3307_v7  ;;  %9460 = vmatprep.subr.msk.mxu1 %vm352_vm0, %v3406_v43 }
 0x7dd   : > { %9455 = vmatprep.mubr.msk.f32.mxu0 %vm352_vm0, %v10285_v13  ;;  %9462 = vmatprep.mubr.msk.f32.mxu1 %vm352_vm0, %v10285_v13 }
 0x7df   : > { %9454 = vmatpush3.xpose.msk.msra.mxu0 %vm352_vm0, %v3307_v7  ;;  %9461 = vmatpush3.xpose.msk.msra.mxu1 %vm352_vm0, %v3406_v43 }
 0x7e0   : > { %9465 = vmatprep.subr.msk.mxu0 %vm352_vm0, %v9929_v0  ;;  %9472 = vmatprep.subr.msk.mxu1 %vm352_vm0, %v9930_v54 }
 0x7e2   : > { %9456 = vmatmul.mubr.msk.f32.vlgmr.msra.gmra.mxu0 %vm352_vm0, %v10296_v14  ;;  %9463 = vmatmul.mubr.msk.f32.vlgmr.msra.gmra.mxu1 %vm352_vm0, %v10296_v14 }
 0x7e3   : > { %9466 = vmatpush3.xpose.msk.msra.mxu0 %vm352_vm0, %v9929_v0  ;;  %9473 = vmatpush3.xpose.msk.msra.mxu1 %vm352_vm0, %v9930_v54 }
 0x7e4   : > { %9467 = vmatprep.subr.msk.mxu0 %vm352_vm0, %v9931_v38  ;;  %9474 = vmatprep.subr.msk.mxu1 %vm352_vm0, %v9932_v22 }
 0x7e5   : > { %9469 = vmatprep.mubr.msk.f32.mxu0 %vm352_vm0, %v10991_v1  ;;  %9476 = vmatprep.mubr.msk.f32.mxu1 %vm352_vm0, %v10991_v1 }
 0x7e7   : > { %9468 = vmatpush3.xpose.msk.msra.mxu0 %vm352_vm0, %v9931_v38  ;;  %9475 = vmatpush3.xpose.msk.msra.mxu1 %vm352_vm0, %v9932_v22 }
 0x7e8   : > { %9479 = vmatprep.subr.msk.mxu0 %vm352_vm0, %v9933_v2  ;;  %9486 = vmatprep.subr.msk.mxu1 %vm352_vm0, %v9934_v42 }
 0x7ea   : > { %9470 = vmatmul.mubr.msk.f32.vlgmr.msra.gmra.mxu0 %vm352_vm0, %v11008_v35  ;;  %9477 = vmatmul.mubr.msk.f32.vlgmr.msra.gmra.mxu1 %vm352_vm0, %v11008_v35 }
 0x7eb   : > { %9480 = vmatpush3.xpose.msk.msra.mxu0 %vm352_vm0, %v9933_v2  ;;  %9487 = vmatpush3.xpose.msk.msra.mxu1 %vm352_vm0, %v9934_v42 }
 0x7ec   : > { %9481 = vmatprep.subr.msk.mxu0 %vm352_vm0, %v9935_v4  ;;  %9488 = vmatprep.subr.msk.mxu1 %vm352_vm0, %v9936_v59 }
 0x7ed   : > { %9483 = vmatprep.mubr.msk.f32.mxu0 %vm352_vm0, %v10991_v1  ;;  %9490 = vmatprep.mubr.msk.f32.mxu1 %vm352_vm0, %v10991_v1 }
 0x7ef   : > { %9482 = vmatpush3.xpose.msk.msra.mxu0 %vm352_vm0, %v9935_v4  ;;  %9489 = vmatpush3.xpose.msk.msra.mxu1 %vm352_vm0, %v9936_v59 }
 0x7f2   : > { %9484 = vmatmul.mubr.msk.f32.vlgmr.msra.gmra.mxu0 %vm352_vm0, %v11008_v35  ;;  %9491 = vmatmul.mubr.msk.f32.vlgmr.msra.gmra.mxu1 %vm352_vm0, %v11008_v35 }
 0x7f3   : > { %9497 = vmatprep.mubr.msk.f32.mxu0 %vm352_vm0, %v10991_v1  ;;  %9504 = vmatprep.mubr.msk.f32.mxu1 %vm352_vm0, %v10991_v1 }
 0x89a   : > { %v9443_v23 = vpop.f32.mrf.mxu0  ;;  %v9450_v24 = vpop.f32.mrf.mxu1 }
 0x89b   : > { %v11039_v60 = vadd.f32 %v9443_v23, %v10868_v41  ;;  %v11042_v29 = vadd.f32 %v9450_v24, %v10892_v32 }
 0x89c   : > { %v3183_v15 = vpop.f32.mrf.mxu0  ;;  %v3282_v8 = vpop.f32.mrf.mxu1 }
 0x89d   : > { %v11045_v36 = vadd.f32 %v3183_v15, %v10877_v11  ;;  %v11048_v10 = vadd.f32 %v3282_v8, %v10897_v44 }
 0x8a2   : > { %v9457_v9 = vpop.f32.mrf.mxu0  ;;  %v9464_v49 = vpop.f32.mrf.mxu1 }
 0x8a3   : > { %v11051_v18 = vadd.f32 %v9457_v9, %v10904_v5  ;;  %v11054_v12 = vadd.f32 %v9464_v49, %v10912_v6 }
 0x8a4   : > { %v3381_v41 = vpop.f32.mrf.mxu0  ;;  %v3480_v34 = vpop.f32.mrf.mxu1 }
 0x8a5   : > { %v11057_v32 = vadd.f32 %v3381_v41, %v10907_v33  ;;  %v11060_v61 = vadd.f32 %v3480_v34, %v10914_v21  ;;  %v12058_v41 = vld [vmem:[#allocation28_spill] sm:$0xff] }
 0x8a7   : > { %12057 = vst [vmem:[#allocation29_spill] sm:$0xff] %v11060_v61 }
 0x8aa   : > { %v11062_v11 = vpop.f32.mrf.mxu0  ;;  %v11064_v44 = vpop.f32.mrf.mxu1 }
 0x8ab   : > { %v3798_v5 = vmul.f32 %v11062_v11, %v10336_v19  ;;  %v3897_v6 = vmul.f32 %v11062_v11, %v10384_v46  ;;  %v3996_v33 = vmul.f32 %v11062_v11, %v10428_v26  ;;  %v4095_v21 = vmul.f32 %v11062_v11, %v10482_v62 }
 0x8ac   : > { %v11066_v53 = vpop.f32.mrf.mxu0  ;;  %v11068_v57 = vpop.f32.mrf.mxu1  ;;  %v3800_v16 = vmul.f32 %v11064_v44, %v10338_v20  ;;  %v3899_v58 = vmul.f32 %v11064_v44, %v10386_v47  ;;  %v3998_v17 = vmul.f32 %v11064_v44, %v10430_v27  ;;  %v4097_v7 = vmul.f32 %v11064_v44, %v10484_v63 }
 0x8ad   : > { %v3797_v43 = vmul.f32 %v11066_v53, %v10336_v19  ;;  %v3896_v50 = vmul.f32 %v11066_v53, %v10384_v46  ;;  %v3799_v30 = vmul.f32 %v11068_v57, %v10338_v20  ;;  %v3898_v0 = vmul.f32 %v11068_v57, %v10386_v47 }
 0x8ae   : > { %v3995_v54 = vmul.f32 %v11066_v53, %v10428_v26  ;;  %v4094_v51 = vmul.f32 %v11066_v53, %v10482_v62  ;;  %v3997_v38 = vmul.f32 %v11068_v57, %v10430_v27  ;;  %v4096_v22 = vmul.f32 %v11068_v57, %v10484_v63 }
 0x8af   : > { %v3802_v42 = vadd.f32 %v3800_v16, %v3798_v5  ;;  %v3901_v4 = vadd.f32 %v3899_v58, %v3897_v6  ;;  %v4000_v59 = vadd.f32 %v3998_v17, %v3996_v33  ;;  %v4099_v23 = vadd.f32 %v4097_v7, %v4095_v21 }
 0x8b0   : > { %v3801_v8 = vadd.f32 %v3799_v30, %v3797_v43  ;;  %v3900_v9 = vadd.f32 %v3898_v0, %v3896_v50 }
 0x8b2   : > { %v11102_v45 = vpop.f32.mrf.mxu0  ;;  %v11104_v2 = vpop.f32.mrf.mxu1 }
 0x8b3   : > { %v3804_v24 = vmul.f32 %v11102_v45, %v10348_v25  ;;  %v3903_v15 = vmul.f32 %v11102_v45, %v10388_v48  ;;  %v4002_v49 = vmul.f32 %v11102_v45, %v10432_v31  ;;  %v4101_v34 = vmul.f32 %v11102_v45, %v12058_v41 }
 0x8b4   : > { %v11114_v63 = vpop.f32.mrf.mxu0  ;;  %v11116_v5 = vpop.f32.mrf.mxu1  ;;  %v3808_v6 = vmul.f32 %v11104_v2, %v10354_v28  ;;  %v3907_v33 = vmul.f32 %v11104_v2, %v10396_v52  ;;  %v4006_v58 = vmul.f32 %v11104_v2, %v10442_v40  ;;  %v4105_v17 = vmul.f32 %v11104_v2, %v10498_v37 }
 0x8b5   : > { %v3803_v21 = vmul.f32 %v11114_v63, %v10348_v25  ;;  %v3902_v16 = vmul.f32 %v11114_v63, %v10388_v48  ;;  %v4001_v7 = vmul.f32 %v11114_v63, %v10432_v31  ;;  %v4100_v43 = vmul.f32 %v11114_v63, %v12058_v41 }
 0x8b6   : > { %v3806_v50 = vadd.f32 %v3804_v24, %v3802_v42  ;;  %v3905_v30 = vadd.f32 %v3903_v15, %v3901_v4  ;;  %v3807_v62 = vmul.f32 %v11116_v5, %v10354_v28  ;;  %v3906_v26 = vmul.f32 %v11116_v5, %v10396_v52 }
 0x8b7   : > { %v3805_v0 = vadd.f32 %v3803_v21, %v3801_v8  ;;  %v3904_v27 = vadd.f32 %v3902_v16, %v3900_v9  ;;  %v4004_v46 = vadd.f32 %v4002_v49, %v4000_v59  ;;  %v4103_v25 = vadd.f32 %v4101_v34, %v4099_v23 }
 0x8b8   : > { %v3810_v48 = vadd.f32 %v3808_v6, %v3806_v50  ;;  %v3909_v47 = vadd.f32 %v3907_v33, %v3905_v30  ;;  %v3999_v31 = vadd.f32 %v3997_v38, %v3995_v54  ;;  %v4098_v4 = vadd.f32 %v4096_v22, %v4094_v51  ;;  %v12061_v6 = vld [vmem:[#allocation18_spill] sm:$0xff] }
 0x8b9   : > { %v3809_v20 = vadd.f32 %v3807_v62, %v3805_v0  ;;  %v3908_v19 = vadd.f32 %v3906_v26, %v3904_v27  ;;  %v4008_v9 = vadd.f32 %v4006_v58, %v4004_v46  ;;  %v4107_v59 = vadd.f32 %v4105_v17, %v4103_v25  ;;  %v12062_v17 = vld [vmem:[#allocation19_spill] sm:$0xff] }
 0x8ba   : > { %v3812_v61 = vadd.f32 %v3810_v48, %v10370_v39  ;;  %v3911_v42 = vadd.f32 %v3909_v47, %v10408_v3  ;;  %v4003_v8 = vadd.f32 %v4001_v7, %v3999_v31  ;;  %v4102_v23 = vadd.f32 %v4100_v43, %v4098_v4 }
 0x8bb   : > { %v3811_v24 = vadd.f32 %v3809_v20, %v10370_v39  ;;  %v3910_v15 = vadd.f32 %v3908_v19, %v10408_v3  ;;  %v4005_v20 = vmul.f32 %v11116_v5, %v10442_v40  ;;  %v4104_v19 = vmul.f32 %v11116_v5, %v10498_v37 }
 0x8bc   : > { %9493 = vmatprep.subr.msk.mxu0 %vm352_vm0, %v3812_v61  ;;  %9500 = vmatprep.subr.msk.mxu1 %vm352_vm0, %v3911_v42  ;;  %v4010_v47 = vadd.f32 %v4008_v9, %v10458_v56  ;;  %v4109_v46 = vadd.f32 %v4107_v59, %v10514_v55 }
 0x8bd   : > { %9494 = vmatpush3.xpose.msk.msra.mxu0 %vm352_vm0, %v3812_v61  ;;  %9501 = vmatpush3.xpose.msk.msra.mxu1 %vm352_vm0, %v3911_v42  ;;  %v4007_v25 = vadd.f32 %v4005_v20, %v4003_v8  ;;  %v4106_v48 = vadd.f32 %v4104_v19, %v4102_v23 }
 0x8be   : > { %9495 = vmatprep.subr.msk.mxu0 %vm352_vm0, %v3811_v24  ;;  %9502 = vmatprep.subr.msk.mxu1 %vm352_vm0, %v3910_v15 }
 0x8bf   : > { %v4009_v26 = vadd.f32 %v4007_v25, %v10458_v56  ;;  %v4108_v27 = vadd.f32 %v4106_v48, %v10514_v55  ;;  %v12064_v48 = vld [vmem:[#allocation21_spill] sm:$0xff] }
 0x8c1   : > { %9496 = vmatpush3.xpose.msk.msra.mxu0 %vm352_vm0, %v3811_v24  ;;  %9503 = vmatpush3.xpose.msk.msra.mxu1 %vm352_vm0, %v3910_v15 }
 0x8c2   : > { %9507 = vmatprep.subr.msk.mxu0 %vm352_vm0, %v4010_v47  ;;  %9514 = vmatprep.subr.msk.mxu1 %vm352_vm0, %v4109_v46 }
 0x8c4   : > { %9498 = vmatmul.mubr.msk.f32.vlgmr.msra.gmra.mxu0 %vm352_vm0, %v11008_v35  ;;  %9505 = vmatmul.mubr.msk.f32.vlgmr.msra.gmra.mxu1 %vm352_vm0, %v11008_v35 }
 0x8c5   : > { %9508 = vmatpush3.xpose.msk.msra.mxu0 %vm352_vm0, %v4010_v47  ;;  %9515 = vmatpush3.xpose.msk.msra.mxu1 %vm352_vm0, %v4109_v46  ;;  %v12063_v46 = vld [vmem:[#allocation20_spill] sm:$0xff] }
 0x8c6   : > { %9509 = vmatprep.subr.msk.mxu0 %vm352_vm0, %v4009_v26  ;;  %9516 = vmatprep.subr.msk.mxu1 %vm352_vm0, %v4108_v27 }
 0x8c7   : > { %9511 = vmatprep.mubr.msk.f32.mxu0 %vm352_vm0, %v10991_v1  ;;  %9518 = vmatprep.mubr.msk.f32.mxu1 %vm352_vm0, %v10991_v1 }
 0x8c9   : > { %9510 = vmatpush3.xpose.msk.msra.mxu0 %vm352_vm0, %v4009_v26  ;;  %9517 = vmatpush3.xpose.msk.msra.mxu1 %vm352_vm0, %v4108_v27  ;;  %v12065_v27 = vld [vmem:[#allocation22_spill] sm:$0xff] }
 0x8ca   : > { %9521 = vmatprep.subr.msk.mxu0 %vm352_vm0, %v11062_v11  ;;  %9528 = vmatprep.subr.msk.mxu1 %vm352_vm0, %v11064_v44 }
 0x8cc   : > { %9512 = vmatmul.mubr.msk.f32.vlgmr.msra.gmra.mxu0 %vm352_vm0, %v11008_v35  ;;  %9519 = vmatmul.mubr.msk.f32.vlgmr.msra.gmra.mxu1 %vm352_vm0, %v11008_v35 }
 0x8cd   : > { %9522 = vmatpush3.xpose.msk.msra.mxu0 %vm352_vm0, %v11062_v11  ;;  %9529 = vmatpush3.xpose.msk.msra.mxu1 %vm352_vm0, %v11064_v44 }
 0x8ce   : > { %9523 = vmatprep.subr.msk.mxu0 %vm352_vm0, %v11066_v53  ;;  %9530 = vmatprep.subr.msk.mxu1 %vm352_vm0, %v11068_v57 }
 0x8cf   : > { %9525 = vmatprep.mubr.msk.f32.mxu0 %vm352_vm0, %v10285_v13  ;;  %9532 = vmatprep.mubr.msk.f32.mxu1 %vm352_vm0, %v10285_v13 }
 0x8d1   : > { %9524 = vmatpush3.xpose.msk.msra.mxu0 %vm352_vm0, %v11066_v53  ;;  %9531 = vmatpush3.xpose.msk.msra.mxu1 %vm352_vm0, %v11068_v57 }
 0x8d2   : > { %9535 = vmatprep.subr.msk.mxu0 %vm352_vm0, %v11102_v45  ;;  %9542 = vmatprep.subr.msk.mxu1 %vm352_vm0, %v11104_v2 }
 0x8d4   : > { %9526 = vmatmul.mubr.msk.f32.vlgmr.msra.gmra.mxu0 %vm352_vm0, %v10296_v14  ;;  %9533 = vmatmul.mubr.msk.f32.vlgmr.msra.gmra.mxu1 %vm352_vm0, %v10296_v14 }
 0x8d5   : > { %9536 = vmatpush3.xpose.msk.msra.mxu0 %vm352_vm0, %v11102_v45  ;;  %9543 = vmatpush3.xpose.msk.msra.mxu1 %vm352_vm0, %v11104_v2  ;;  %v12059_v2 = vld [vmem:[#allocation29_spill] sm:$0xff] }
 0x8d6   : > { %9537 = vmatprep.subr.msk.mxu0 %vm352_vm0, %v11114_v63  ;;  %9544 = vmatprep.subr.msk.mxu1 %vm352_vm0, %v11116_v5 }
 0x8d7   : > { %9539 = vmatprep.mubr.msk.f32.mxu0 %vm352_vm0, %v10285_v13  ;;  %9546 = vmatprep.mubr.msk.f32.mxu1 %vm352_vm0, %v10285_v13 }
 0x8d9   : > { %9538 = vmatpush3.xpose.msk.msra.mxu0 %vm352_vm0, %v11114_v63  ;;  %9545 = vmatpush3.xpose.msk.msra.mxu1 %vm352_vm0, %v11116_v5 }
 0x8dc   : > { %9540 = vmatmul.mubr.msk.f32.vlgmr.msra.gmra.mxu0 %vm352_vm0, %v10296_v14  ;;  %9547 = vmatmul.mubr.msk.f32.vlgmr.msra.gmra.mxu1 %vm352_vm0, %v10296_v14 }
 0x8dd   : > { %9553 = vmatprep.mubr.msk.f32.mxu0 %vm352_vm0, %v10285_v13  ;;  %9560 = vmatprep.mubr.msk.f32.mxu1 %vm352_vm0, %v10285_v13 }
 0x984   : > { %v9499_v31 = vpop.f32.mrf.mxu0  ;;  %v9506_v62 = vpop.f32.mrf.mxu1 }
 0x985   : > { %v11231_v61 = vadd.f32 %v9499_v31, %v11039_v60  ;;  %v11234_v63 = vadd.f32 %v9506_v62, %v11042_v29 }
 0x986   : > { %v3885_v11 = vpop.f32.mrf.mxu0  ;;  %v3984_v44 = vpop.f32.mrf.mxu1 }
 0x987   : > { %v11237_v53 = vadd.f32 %v3885_v11, %v11045_v36  ;;  %v11240_v57 = vadd.f32 %v3984_v44, %v11048_v10 }
 0x98c   : > { %v9513_v54 = vpop.f32.mrf.mxu0  ;;  %v9520_v51 = vpop.f32.mrf.mxu1 }
 0x98d   : > { %v11243_v38 = vadd.f32 %v9513_v54, %v11051_v18  ;;  %v11246_v22 = vadd.f32 %v9520_v51, %v11054_v12  ;;  %v12060_v18 = vld [vmem:[#allocation17_spill] sm:$0xff] }
 0x98e   : > { %v4083_v60 = vpop.f32.mrf.mxu0  ;;  %v4182_v45 = vpop.f32.mrf.mxu1 }
 0x98f   : > { %v11249_v29 = vadd.f32 %v4083_v60, %v11057_v32  ;;  %v11252_v49 = vadd.f32 %v4182_v45, %v12059_v2 }
 0x994   : > { %v11254_v36 = vpop.f32.mrf.mxu0  ;;  %v11256_v10 = vpop.f32.mrf.mxu1 }
 0x995   : > { %v4518_v12 = vmul.f32 %v11254_v36, %v12060_v18  ;;  %v4520_v33 = vmul.f32 %v11256_v10, %v12061_v6  ;;  %v4860_v25 = vmul.f32 %v11254_v36, %v12063_v46  ;;  %v4862_v26 = vmul.f32 %v11256_v10, %v12064_v48 }
 0x996   : > { %v11258_v34 = vpop.f32.mrf.mxu0  ;;  %v11260_v5 = vpop.f32.mrf.mxu1 }
 0x997   : > { %v4517_v32 = vmul.f32 %v11258_v34, %v12060_v18  ;;  %v4519_v21 = vmul.f32 %v11260_v5, %v12061_v6  ;;  %v4522_v30 = vadd.f32 %v4520_v33, %v4518_v12  ;;  %v4859_v62 = vmul.f32 %v11258_v34, %v12063_v46 }
 0x998   : > { %v4861_v11 = vmul.f32 %v11260_v5, %v12064_v48  ;;  %v4864_v44 = vadd.f32 %v4862_v26, %v4860_v25 }
 0x999   : > { %v4521_v4 = vadd.f32 %v4519_v21, %v4517_v32 }
 0x99a   : > { %v4863_v45 = vadd.f32 %v4861_v11, %v4859_v62 }
 0x99c   : > { %v11270_v16 = vpop.f32.mrf.mxu0  ;;  %v11272_v58 = vpop.f32.mrf.mxu1 }
 0x99d   : > { %v4524_v7 = vmul.f32 %v11270_v16, %v12062_v17  ;;  %v4528_v0 = vmul.f32 %v11272_v58, %v10354_v28  ;;  %v4866_v31 = vmul.f32 %v11270_v16, %v12065_v27  ;;  %v4870_v60 = vmul.f32 %v11272_v58, %v10396_v52 }
 0x99e   : > { %v11276_v43 = vpop.f32.mrf.mxu0  ;;  %v11278_v50 = vpop.f32.mrf.mxu1 }
 0x99f   : > { %v4523_v42 = vmul.f32 %v11276_v43, %v12062_v17  ;;  %v4526_v24 = vadd.f32 %v4524_v7, %v4522_v30  ;;  %v4527_v8 = vmul.f32 %v11278_v50, %v10354_v28  ;;  %v4865_v54 = vmul.f32 %v11276_v43, %v12065_v27 }
 0x9a0   : > { %v4868_v51 = vadd.f32 %v4866_v31, %v4864_v44  ;;  %v4869_v21 = vmul.f32 %v11278_v50, %v10396_v52 }
 0x9a1   : > { %v4525_v15 = vadd.f32 %v4523_v42, %v4521_v4  ;;  %v4530_v9 = vadd.f32 %v4528_v0, %v4526_v24  ;;  %v4867_v33 = vadd.f32 %v4865_v54, %v4863_v45 }
 0x9a2   : > { %v4872_v12 = vadd.f32 %v4870_v60, %v4868_v51  ;;  %v5212_v60 = vmul.f32 %v11272_v58, %v10442_v40 }
 0x9a3   : > { %v4529_v59 = vadd.f32 %v4527_v8, %v4525_v15  ;;  %v4532_v23 = vadd.f32 %v4530_v9, %v10370_v39  ;;  %v4871_v30 = vadd.f32 %v4869_v21, %v4867_v33  ;;  %v12066_v8 = vld [vmem:[#allocation23_spill] sm:$0xff] }
 0x9a4   : > { %v4874_v7 = vadd.f32 %v4872_v12, %v10408_v3  ;;  %v5202_v9 = vmul.f32 %v11254_v36, %v12066_v8  ;;  %v5201_v31 = vmul.f32 %v11258_v34, %v12066_v8 }
 0x9a5   : > { %v4531_v20 = vadd.f32 %v4529_v59, %v10370_v39  ;;  %9549 = vmatprep.subr.msk.mxu0 %vm352_vm0, %v4532_v23  ;;  %v4873_v0 = vadd.f32 %v4871_v30, %v10408_v3  ;;  %v12067_v59 = vld [vmem:[#allocation24_spill] sm:$0xff] }
 0x9a6   : > { %9550 = vmatpush3.xpose.msk.msra.mxu0 %vm352_vm0, %v4532_v23  ;;  %v5204_v23 = vmul.f32 %v11256_v10, %v12067_v59  ;;  %v5203_v62 = vmul.f32 %v11260_v5, %v12067_v59 }
 0x9a7   : > { %9551 = vmatprep.subr.msk.mxu0 %vm352_vm0, %v4531_v20 }
 0x9a8   : > { %v5206_v44 = vadd.f32 %v5204_v23, %v5202_v9  ;;  %v12070_v9 = vld [vmem:[#allocation27_spill] sm:$0xff] }
 0x9a9   : > { %v5546_v23 = vmul.f32 %v11256_v10, %v12070_v9 }
 0x9aa   : > { %9552 = vmatpush3.xpose.msk.msra.mxu0 %vm352_vm0, %v4531_v20 }
 0x9ad   : > { %9554 = vmatmul.mubr.msk.f32.vlgmr.msra.gmra.mxu0 %vm352_vm0, %v10296_v14 }
 0x9ae   : > { %9567 = vmatprep.mubr.msk.f32.mxu0 %vm352_vm0, %v10285_v13 }
 0xa6d   : > { %v9555_v19 = vpop.f32.mrf.mxu0 }
 0xa6e   : > { %9556 = vmatprep.subr.msk.mxu1 %vm352_vm0, %v9555_v19 }
 0xa6f   : > { %v4605_v47 = vpop.f32.mrf.mxu0  ;;  %9557 = vmatpush3.xpose.msk.msra.mxu1 %vm352_vm0, %v9555_v19  ;;  %v12068_v19 = vld [vmem:[#allocation25_spill] sm:$0xff] }
 0xa70   : > { %9558 = vmatprep.subr.msk.mxu1 %vm352_vm0, %v4605_v47  ;;  %v5207_v54 = vmul.f32 %v11276_v43, %v12068_v19 }
 0xa73   : > { %9559 = vmatpush3.xpose.msk.msra.mxu1 %vm352_vm0, %v4605_v47  ;;  %v5208_v47 = vmul.f32 %v11270_v16, %v12068_v19 }
 0xa75   : > { %v5210_v51 = vadd.f32 %v5208_v47, %v5206_v44  ;;  %v5550_v47 = vmul.f32 %v11270_v16, %v12058_v41  ;;  %v5545_v44 = vmul.f32 %v11260_v5, %v12070_v9 }
 0xa76   : > { %9561 = vmatmul.mubr.msk.f32.vlgmr.msra.gmra.mxu1 %vm352_vm0, %v10296_v14 }
 0xa77   : > { %9574 = vmatprep.mubr.msk.f32.mxu1 %vm352_vm0, %v10991_v1 }
 0xb36   : > { %v9562_v2 = vpop.f32.mrf.mxu1 }
 0xb37   : > { %9563 = vmatprep.subr.msk.mxu0 %vm352_vm0, %v9562_v2 }
 0xb38   : > { %v4686_v32 = vpop.f32.mrf.mxu1  ;;  %9564 = vmatpush3.xpose.msk.msra.mxu0 %vm352_vm0, %v9562_v2  ;;  %v5214_v2 = vadd.f32 %v5212_v60, %v5210_v51  ;;  %v5549_v60 = vmul.f32 %v11276_v43, %v12058_v41 }
 0xb39   : > { %9565 = vmatprep.subr.msk.mxu0 %vm352_vm0, %v4686_v32 }
 0xb3c   : > { %9566 = vmatpush3.xpose.msk.msra.mxu0 %vm352_vm0, %v4686_v32  ;;  %v5216_v32 = vadd.f32 %v5214_v2, %v10458_v56 }
 0xb3d   : > { %9577 = vmatprep.subr.msk.mxu0 %vm352_vm0, %v4874_v7 }
 0xb3f   : > { %9568 = vmatmul.mubr.msk.f32.vlgmr.msra.gmra.mxu0 %vm352_vm0, %v10296_v14 }
 0xb40   : > { %9578 = vmatpush3.xpose.msk.msra.mxu0 %vm352_vm0, %v4874_v7  ;;  %9581 = vmatprep.mubr.msk.f32.mxu0 %vm352_vm0, %v10285_v13 }
 0xb41   : > { %9579 = vmatprep.subr.msk.mxu0 %vm352_vm0, %v4873_v0 }
 0xb44   : > { %9580 = vmatpush3.xpose.msk.msra.mxu0 %vm352_vm0, %v4873_v0 }
 0xb47   : > { %9582 = vmatmul.mubr.msk.f32.vlgmr.msra.gmra.mxu0 %vm352_vm0, %v10296_v14 }
 0xb48   : > { %9595 = vmatprep.mubr.msk.f32.mxu0 %vm352_vm0, %v10285_v13 }
 0xbff   : > { %v9569_v42 = vpop.f32.mrf.mxu0 }
 0xc00   : > { %9570 = vmatprep.subr.msk.mxu1 %vm352_vm0, %v9569_v42 }
 0xc01   : > { %v4767_v4 = vpop.f32.mrf.mxu0  ;;  %9571 = vmatpush3.xpose.msk.msra.mxu1 %vm352_vm0, %v9569_v42 }
 0xc02   : > { %9572 = vmatprep.subr.msk.mxu1 %vm352_vm0, %v4767_v4 }
 0xc05   : > { %9573 = vmatpush3.xpose.msk.msra.mxu1 %vm352_vm0, %v4767_v4 }
 0xc07   : > { %v9583_v24 = vpop.f32.mrf.mxu0 }
 0xc08   : > { %9575 = vmatmul.mubr.msk.f32.vlgmr.msra.gmra.mxu1 %vm352_vm0, %v11008_v35  ;;  %9584 = vmatprep.subr.msk.mxu1 %vm352_vm0, %v9583_v24 }
 0xc09   : > { %v4947_v15 = vpop.f32.mrf.mxu0  ;;  %9585 = vmatpush3.xpose.msk.msra.mxu1 %vm352_vm0, %v9583_v24  ;;  %9588 = vmatprep.mubr.msk.f32.mxu1 %vm352_vm0, %v10285_v13  ;;  %v12069_v24 = vld [vmem:[#allocation26_spill] sm:$0xff] }
 0xc0a   : > { %9586 = vmatprep.subr.msk.mxu1 %vm352_vm0, %v4947_v15 }
 0xc0d   : > { %9587 = vmatpush3.xpose.msk.msra.mxu1 %vm352_vm0, %v4947_v15  ;;  %v5544_v15 = vmul.f32 %v11254_v36, %v12069_v24 }
 0xc0f   : > { %v5548_v51 = vadd.f32 %v5546_v23, %v5544_v15 }
 0xc10   : > { %9589 = vmatmul.mubr.msk.f32.vlgmr.msra.gmra.mxu1 %vm352_vm0, %v10296_v14 }
 0xc11   : > { %9602 = vmatprep.mubr.msk.f32.mxu1 %vm352_vm0, %v10991_v1 }
 0xcc8   : > { %v9576_v20 = vpop.f32.mrf.mxu1 }
 0xcc9   : > { %v11361_v25 = vadd.f32 %v9576_v20, %v11231_v61  ;;  %v5205_v61 = vadd.f32 %v5203_v62, %v5201_v31  ;;  %v5543_v62 = vmul.f32 %v11258_v34, %v12069_v24 }
 0xcca   : > { %v4848_v26 = vpop.f32.mrf.mxu1 }
 0xccb   : > { %v11368_v11 = vadd.f32 %v4848_v26, %v11237_v53  ;;  %v5209_v12 = vadd.f32 %v5207_v54, %v5205_v61  ;;  %v5211_v53 = vmul.f32 %v11278_v50, %v10442_v40  ;;  %v5552_v61 = vadd.f32 %v5550_v47, %v5548_v51 }
 0xccd   : > { %v5213_v21 = vadd.f32 %v5211_v53, %v5209_v12 }
 0xccf   : > { %v5215_v7 = vadd.f32 %v5213_v21, %v10458_v56 }
 0xcd0   : > { %v9590_v45 = vpop.f32.mrf.mxu1 }
 0xcd1   : > { %9591 = vmatprep.subr.msk.mxu0 %vm352_vm0, %v9590_v45 }
 0xcd2   : > { %v5028_v33 = vpop.f32.mrf.mxu1  ;;  %9592 = vmatpush3.xpose.msk.msra.mxu0 %vm352_vm0, %v9590_v45  ;;  %v5554_v45 = vmul.f32 %v11272_v58, %v10498_v37 }
 0xcd3   : > { %9593 = vmatprep.subr.msk.mxu0 %vm352_vm0, %v5028_v33 }
 0xcd4   : > { %v5556_v12 = vadd.f32 %v5554_v45, %v5552_v61 }
 0xcd6   : > { %9594 = vmatpush3.xpose.msk.msra.mxu0 %vm352_vm0, %v5028_v33 }
 0xcd7   : > { %9605 = vmatprep.subr.msk.mxu0 %vm352_vm0, %v5216_v32 }
 0xcd9   : > { %9596 = vmatmul.mubr.msk.f32.vlgmr.msra.gmra.mxu0 %vm352_vm0, %v10296_v14 }
 0xcda   : > { %9606 = vmatpush3.xpose.msk.msra.mxu0 %vm352_vm0, %v5216_v32  ;;  %9609 = vmatprep.mubr.msk.f32.mxu0 %vm352_vm0, %v10285_v13  ;;  %v5558_v32 = vadd.f32 %v5556_v12, %v10514_v55 }
 0xcdb   : > { %9607 = vmatprep.subr.msk.mxu0 %vm352_vm0, %v5215_v7 }
 0xcde   : > { %9608 = vmatpush3.xpose.msk.msra.mxu0 %vm352_vm0, %v5215_v7 }
 0xce1   : > { %9610 = vmatmul.mubr.msk.f32.vlgmr.msra.gmra.mxu0 %vm352_vm0, %v10296_v14 }
 0xce2   : > { %9623 = vmatprep.mubr.msk.f32.mxu0 %vm352_vm0, %v10285_v13 }
 0xd99   : > { %v9597_v30 = vpop.f32.mrf.mxu0 }
 0xd9a   : > { %9598 = vmatprep.subr.msk.mxu1 %vm352_vm0, %v9597_v30 }
 0xd9b   : > { %v5109_v0 = vpop.f32.mrf.mxu0  ;;  %9599 = vmatpush3.xpose.msk.msra.mxu1 %vm352_vm0, %v9597_v30 }
 0xd9c   : > { %9600 = vmatprep.subr.msk.mxu1 %vm352_vm0, %v5109_v0 }
 0xd9f   : > { %9601 = vmatpush3.xpose.msk.msra.mxu1 %vm352_vm0, %v5109_v0 }
 0xda1   : > { %v9611_v42 = vpop.f32.mrf.mxu0 }
 0xda2   : > { %9603 = vmatmul.mubr.msk.f32.vlgmr.msra.gmra.mxu1 %vm352_vm0, %v11008_v35  ;;  %9612 = vmatprep.subr.msk.mxu1 %vm352_vm0, %v9611_v42 }
 0xda3   : > { %v5289_v4 = vpop.f32.mrf.mxu0  ;;  %9613 = vmatpush3.xpose.msk.msra.mxu1 %vm352_vm0, %v9611_v42  ;;  %9616 = vmatprep.mubr.msk.f32.mxu1 %vm352_vm0, %v10285_v13 }
 0xda4   : > { %9614 = vmatprep.subr.msk.mxu1 %vm352_vm0, %v5289_v4 }
 0xda7   : > { %9615 = vmatpush3.xpose.msk.msra.mxu1 %vm352_vm0, %v5289_v4 }
 0xdaa   : > { %9617 = vmatmul.mubr.msk.f32.vlgmr.msra.gmra.mxu1 %vm352_vm0, %v10296_v14 }
 0xdab   : > { %9630 = vmatprep.mubr.msk.f32.mxu1 %vm352_vm0, %v10991_v1 }
 0xe62   : > { %v9604_v20 = vpop.f32.mrf.mxu1 }
 0xe63   : > { %v11417_v26 = vadd.f32 %v9604_v20, %v11234_v63  ;;  %v5547_v63 = vadd.f32 %v5545_v44, %v5543_v62 }
 0xe64   : > { %v5190_v31 = vpop.f32.mrf.mxu1 }
 0xe65   : > { %v11424_v54 = vadd.f32 %v5190_v31, %v11240_v57  ;;  %v5551_v33 = vadd.f32 %v5549_v60, %v5547_v63  ;;  %v5553_v57 = vmul.f32 %v11278_v50, %v10498_v37 }
 0xe67   : > { %v5555_v21 = vadd.f32 %v5553_v57, %v5551_v33 }
 0xe69   : > { %v5557_v7 = vadd.f32 %v5555_v21, %v10514_v55 }
 0xe6a   : > { %v9618_v2 = vpop.f32.mrf.mxu1 }
 0xe6b   : > { %9619 = vmatprep.subr.msk.mxu0 %vm352_vm0, %v9618_v2 }
 0xe6c   : > { %v5370_v53 = vpop.f32.mrf.mxu1  ;;  %9620 = vmatpush3.xpose.msk.msra.mxu0 %vm352_vm0, %v9618_v2 }
 0xe6d   : > { %9621 = vmatprep.subr.msk.mxu0 %vm352_vm0, %v5370_v53 }
 0xe70   : > { %9622 = vmatpush3.xpose.msk.msra.mxu0 %vm352_vm0, %v5370_v53 }
 0xe71   : > { %9633 = vmatprep.subr.msk.mxu0 %vm352_vm0, %v5558_v32 }
 0xe73   : > { %9624 = vmatmul.mubr.msk.f32.vlgmr.msra.gmra.mxu0 %vm352_vm0, %v10296_v14 }
 0xe74   : > { %9634 = vmatpush3.xpose.msk.msra.mxu0 %vm352_vm0, %v5558_v32  ;;  %9637 = vmatprep.mubr.msk.f32.mxu0 %vm352_vm0, %v10285_v13 }
 0xe75   : > { %9635 = vmatprep.subr.msk.mxu0 %vm352_vm0, %v5557_v7 }
 0xe78   : > { %9636 = vmatpush3.xpose.msk.msra.mxu0 %vm352_vm0, %v5557_v7 }
 0xe7b   : > { %9638 = vmatmul.mubr.msk.f32.vlgmr.msra.gmra.mxu0 %vm352_vm0, %v10296_v14 }
 0xe7c   : > { %9651 = vmatprep.mubr.msk.f32.mxu0 %vm352_vm0, %v10285_v13 }
 0xf33   : > { %v9625_v30 = vpop.f32.mrf.mxu0 }
 0xf34   : > { %9626 = vmatprep.subr.msk.mxu1 %vm352_vm0, %v9625_v30 }
 0xf35   : > { %v5451_v0 = vpop.f32.mrf.mxu0  ;;  %9627 = vmatpush3.xpose.msk.msra.mxu1 %vm352_vm0, %v9625_v30 }
 0xf36   : > { %9628 = vmatprep.subr.msk.mxu1 %vm352_vm0, %v5451_v0 }
 0xf39   : > { %9629 = vmatpush3.xpose.msk.msra.mxu1 %vm352_vm0, %v5451_v0 }
 0xf3b   : > { %v9639_v42 = vpop.f32.mrf.mxu0 }
 0xf3c   : > { %9631 = vmatmul.mubr.msk.f32.vlgmr.msra.gmra.mxu1 %vm352_vm0, %v11008_v35  ;;  %9640 = vmatprep.subr.msk.mxu1 %vm352_vm0, %v9639_v42 }
 0xf3d   : > { %v5631_v4 = vpop.f32.mrf.mxu0  ;;  %9641 = vmatpush3.xpose.msk.msra.mxu1 %vm352_vm0, %v9639_v42  ;;  %9644 = vmatprep.mubr.msk.f32.mxu1 %vm352_vm0, %v10285_v13 }
 0xf3e   : > { %9642 = vmatprep.subr.msk.mxu1 %vm352_vm0, %v5631_v4 }
 0xf41   : > { %9643 = vmatpush3.xpose.msk.msra.mxu1 %vm352_vm0, %v5631_v4 }
 0xf44   : > { %9645 = vmatmul.mubr.msk.f32.vlgmr.msra.gmra.mxu1 %vm352_vm0, %v10296_v14 }
 0xf45   : > { %9658 = vmatprep.mubr.msk.f32.mxu1 %vm352_vm0, %v10991_v1 }
 0xffc   : > { %v9632_v15 = vpop.f32.mrf.mxu1 }
 0xffd   : > { %v11467_v23 = vadd.f32 %v9632_v15, %v11243_v38 }
 0xffe   : > { %v5532_v20 = vpop.f32.mrf.mxu1 }
 0xfff   : > { %v11470_v47 = vadd.f32 %v5532_v20, %v11249_v29 }
0x1004   : > { %v9646_v31 = vpop.f32.mrf.mxu1 }
0x1005   : > { %9647 = vmatprep.subr.msk.mxu0 %vm352_vm0, %v9646_v31 }
0x1006   : > { %v5712_v62 = vpop.f32.mrf.mxu1  ;;  %9648 = vmatpush3.xpose.msk.msra.mxu0 %vm352_vm0, %v9646_v31 }
0x1007   : > { %9649 = vmatprep.subr.msk.mxu0 %vm352_vm0, %v5712_v62 }
0x100a   : > { %9650 = vmatpush3.xpose.msk.msra.mxu0 %vm352_vm0, %v5712_v62 }
0x100b   : > { %9661 = vmatprep.subr.msk.mxu0 %vm352_vm0, %v11254_v36 }
0x100d   : > { %9652 = vmatmul.mubr.msk.f32.vlgmr.msra.gmra.mxu0 %vm352_vm0, %v10296_v14 }
0x100e   : > { %9662 = vmatpush3.xpose.msk.msra.mxu0 %vm352_vm0, %v11254_v36  ;;  %9665 = vmatprep.mubr.msk.f32.mxu0 %vm352_vm0, %v10285_v13 }
0x100f   : > { %9663 = vmatprep.subr.msk.mxu0 %vm352_vm0, %v11258_v34 }
0x1012   : > { %9664 = vmatpush3.xpose.msk.msra.mxu0 %vm352_vm0, %v11258_v34 }
0x1013   : > { %9675 = vmatprep.subr.msk.mxu0 %vm352_vm0, %v11270_v16 }
0x1015   : > { %9666 = vmatmul.mubr.msk.f32.vlgmr.msra.gmra.mxu0 %vm352_vm0, %v10296_v14 }
0x1016   : > { %9676 = vmatpush3.xpose.msk.msra.mxu0 %vm352_vm0, %v11270_v16  ;;  %9679 = vmatprep.mubr.msk.f32.mxu0 %vm352_vm0, %v10285_v13 }
0x1017   : > { %9677 = vmatprep.subr.msk.mxu0 %vm352_vm0, %v11276_v43 }
0x101a   : > { %9678 = vmatpush3.xpose.msk.msra.mxu0 %vm352_vm0, %v11276_v43 }
0x101d   : > { %9680 = vmatmul.mubr.msk.f32.vlgmr.msra.gmra.mxu0 %vm352_vm0, %v10296_v14 }
0x101e   : > { %9693 = vmatprep.mubr.msk.f32.mxu0 %vm352_vm0, %v10285_v13 }
0x10cd   : > { %v9653_v38 = vpop.f32.mrf.mxu0 }
0x10ce   : > { %9654 = vmatprep.subr.msk.mxu1 %vm352_vm0, %v9653_v38 }
0x10cf   : > { %v5793_v29 = vpop.f32.mrf.mxu0  ;;  %9655 = vmatpush3.xpose.msk.msra.mxu1 %vm352_vm0, %v9653_v38 }
0x10d0   : > { %9656 = vmatprep.subr.msk.mxu1 %vm352_vm0, %v5793_v29 }
0x10d3   : > { %9657 = vmatpush3.xpose.msk.msra.mxu1 %vm352_vm0, %v5793_v29 }
0x10d4   : > { %9668 = vmatprep.subr.msk.mxu1 %vm352_vm0, %v11256_v10 }
0x10d6   : > { %9659 = vmatmul.mubr.msk.f32.vlgmr.msra.gmra.mxu1 %vm352_vm0, %v11008_v35 }
0x10d7   : > { %9669 = vmatpush3.xpose.msk.msra.mxu1 %vm352_vm0, %v11256_v10  ;;  %9672 = vmatprep.mubr.msk.f32.mxu1 %vm352_vm0, %v10285_v13  ;;  %v11536_v10 = vpop.f32.mrf.mxu0 }
0x10d8   : > { %9670 = vmatprep.subr.msk.mxu1 %vm352_vm0, %v11260_v5  ;;  %v6210_v44 = vmul.f32 %v11536_v10, %v12060_v18  ;;  %v6471_v15 = vmul.f32 %v11536_v10, %v12063_v46 }
0x10db   : > { %9671 = vmatpush3.xpose.msk.msra.mxu1 %vm352_vm0, %v11260_v5 }
0x10dc   : > { %9682 = vmatprep.subr.msk.mxu1 %vm352_vm0, %v11272_v58 }
0x10de   : > { %9673 = vmatmul.mubr.msk.f32.vlgmr.msra.gmra.mxu1 %vm352_vm0, %v10296_v14 }
0x10df   : > { %9683 = vmatpush3.xpose.msk.msra.mxu1 %vm352_vm0, %v11272_v58  ;;  %9686 = vmatprep.mubr.msk.f32.mxu1 %vm352_vm0, %v10285_v13  ;;  %v11544_v58 = vpop.f32.mrf.mxu0 }
0x10e0   : > { %9684 = vmatprep.subr.msk.mxu1 %vm352_vm0, %v11278_v50  ;;  %v6470_v29 = vmul.f32 %v11544_v58, %v12063_v46 }
0x10e3   : > { %9685 = vmatpush3.xpose.msk.msra.mxu1 %vm352_vm0, %v11278_v50  ;;  %v11548_v50 = vpop.f32.mrf.mxu0 }
0x10e4   : > { %v6216_v45 = vmul.f32 %v11548_v50, %v12062_v17  ;;  %v6477_v62 = vmul.f32 %v11548_v50, %v12065_v27 }
0x10e5   : > { %v11558_v61 = vpop.f32.mrf.mxu0 }
0x10e6   : > { %9687 = vmatmul.mubr.msk.f32.vlgmr.msra.gmra.mxu1 %vm352_vm0, %v10296_v14  ;;  %v6215_v2 = vmul.f32 %v11558_v61, %v12062_v17 }
0x10e7   : > { %9700 = vmatprep.mubr.msk.f32.mxu1 %vm352_vm0, %v10285_v13 }
0x1196   : > { %v9660_v36 = vpop.f32.mrf.mxu1 }
0x1197   : > { %v11539_v34 = vadd.f32 %v9660_v36, %v11246_v22 }
0x1198   : > { %v5874_v5 = vpop.f32.mrf.mxu1 }
0x1199   : > { %v11542_v16 = vadd.f32 %v5874_v5, %v11252_v49  ;;  %v6209_v49 = vmul.f32 %v11544_v58, %v12060_v18  ;;  %v6476_v5 = vmul.f32 %v11558_v61, %v12065_v27 }
0x119e   : > { %v11546_v43 = vpop.f32.mrf.mxu1 }
0x119f   : > { %v6212_v51 = vmul.f32 %v11546_v43, %v12061_v6  ;;  %v6473_v20 = vmul.f32 %v11546_v43, %v12064_v48 }
0x11a0   : > { %v11554_v60 = vpop.f32.mrf.mxu1 }
0x11a1   : > { %v6211_v22 = vmul.f32 %v11554_v60, %v12061_v6  ;;  %v6214_v63 = vadd.f32 %v6212_v51, %v6210_v44  ;;  %v6472_v31 = vmul.f32 %v11554_v60, %v12064_v48  ;;  %v6475_v38 = vadd.f32 %v6473_v20, %v6471_v15 }
0x11a2   : > { %v6731_v20 = vmul.f32 %v11544_v58, %v12066_v8 }
0x11a3   : > { %v6213_v12 = vadd.f32 %v6211_v22, %v6209_v49  ;;  %v6218_v53 = vadd.f32 %v6216_v45, %v6214_v63  ;;  %v6479_v44 = vadd.f32 %v6477_v62, %v6475_v38  ;;  %v6474_v51 = vadd.f32 %v6472_v31, %v6470_v29 }
0x11a4   : > { %v6737_v62 = vmul.f32 %v11558_v61, %v12068_v19 }
0x11a5   : > { %v6217_v7 = vadd.f32 %v6215_v2, %v6213_v12  ;;  %v6478_v2 = vadd.f32 %v6476_v5, %v6474_v51 }
0x11a6   : > { %v11566_v33 = vpop.f32.mrf.mxu1 }
0x11a7   : > { %v6220_v57 = vmul.f32 %v11566_v33, %v10354_v28  ;;  %v6481_v36 = vmul.f32 %v11566_v33, %v10396_v52  ;;  %v6742_v31 = vmul.f32 %v11566_v33, %v10442_v40 }
0x11a8   : > { %v11570_v32 = vpop.f32.mrf.mxu1 }
0x11a9   : > { %v6222_v21 = vadd.f32 %v6220_v57, %v6218_v53  ;;  %v6219_v30 = vmul.f32 %v11570_v32, %v10354_v28  ;;  %v6483_v49 = vadd.f32 %v6481_v36, %v6479_v44  ;;  %v6480_v45 = vmul.f32 %v11570_v32, %v10396_v52 }
0x11aa   : > { %v6741_v44 = vmul.f32 %v11570_v32, %v10442_v40 }
0x11ab   : > { %v6224_v0 = vadd.f32 %v6222_v21, %v10370_v39  ;;  %v6221_v42 = vadd.f32 %v6219_v30, %v6217_v7  ;;  %v6485_v12 = vadd.f32 %v6483_v49, %v10408_v3  ;;  %v6482_v53 = vadd.f32 %v6480_v45, %v6478_v2 }
0x11ac   : > { %v6732_v21 = vmul.f32 %v11536_v10, %v12066_v8  ;;  %v6734_v7 = vmul.f32 %v11546_v43, %v12067_v59 }
0x11ad   : > { %9689 = vmatprep.subr.msk.mxu0 %vm352_vm0, %v6224_v0  ;;  %v6223_v4 = vadd.f32 %v6221_v42, %v10370_v39  ;;  %v6484_v57 = vadd.f32 %v6482_v53, %v10408_v3  ;;  %v6733_v42 = vmul.f32 %v11554_v60, %v12067_v59 }
0x11ae   : > { %9690 = vmatpush3.xpose.msk.msra.mxu0 %vm352_vm0, %v6224_v0  ;;  %v6736_v15 = vadd.f32 %v6734_v7, %v6732_v21  ;;  %v6993_v21 = vmul.f32 %v11536_v10, %v12069_v24  ;;  %v6995_v7 = vmul.f32 %v11546_v43, %v12070_v9 }
0x11af   : > { %9691 = vmatprep.subr.msk.mxu0 %vm352_vm0, %v6223_v4  ;;  %v6735_v29 = vadd.f32 %v6733_v42, %v6731_v20  ;;  %v6999_v42 = vmul.f32 %v11548_v50, %v12058_v41  ;;  %v6998_v20 = vmul.f32 %v11558_v61, %v12058_v41 }
0x11b2   : > { %9692 = vmatpush3.xpose.msk.msra.mxu0 %vm352_vm0, %v6223_v4  ;;  %v6738_v4 = vmul.f32 %v11548_v50, %v12068_v19 }
0x11b4   : > { %v6740_v38 = vadd.f32 %v6738_v4, %v6736_v15  ;;  %v6992_v4 = vmul.f32 %v11544_v58, %v12069_v24  ;;  %v7003_v15 = vmul.f32 %v11566_v33, %v10498_v37 }
0x11b5   : > { %9694 = vmatmul.mubr.msk.f32.vlgmr.msra.gmra.mxu0 %vm352_vm0, %v10296_v14 }
0x11b6   : > { %9707 = vmatprep.mubr.msk.f32.mxu0 %vm352_vm0, %v10991_v1  ;;  %v6744_v5 = vadd.f32 %v6742_v31, %v6740_v38 }
0x11b8   : > { %v6746_v49 = vadd.f32 %v6744_v5, %v10458_v56 }
0x1275   : > { %v9695_v22 = vpop.f32.mrf.mxu0 }
0x1276   : > { %9696 = vmatprep.subr.msk.mxu1 %vm352_vm0, %v9695_v22 }
0x1277   : > { %v6297_v63 = vpop.f32.mrf.mxu0  ;;  %9697 = vmatpush3.xpose.msk.msra.mxu1 %vm352_vm0, %v9695_v22  ;;  %v6739_v22 = vadd.f32 %v6737_v62, %v6735_v29 }
0x1278   : > { %9698 = vmatprep.subr.msk.mxu1 %vm352_vm0, %v6297_v63 }
0x1279   : > { %v6743_v45 = vadd.f32 %v6741_v44, %v6739_v22 }
0x127b   : > { %9699 = vmatpush3.xpose.msk.msra.mxu1 %vm352_vm0, %v6297_v63  ;;  %v6745_v63 = vadd.f32 %v6743_v45, %v10458_v56 }
0x127c   : > { %9710 = vmatprep.subr.msk.mxu1 %vm352_vm0, %v6485_v12 }
0x127e   : > { %9701 = vmatmul.mubr.msk.f32.vlgmr.msra.gmra.mxu1 %vm352_vm0, %v10296_v14 }
0x127f   : > { %9711 = vmatpush3.xpose.msk.msra.mxu1 %vm352_vm0, %v6485_v12  ;;  %9714 = vmatprep.mubr.msk.f32.mxu1 %vm352_vm0, %v10285_v13 }
0x1280   : > { %9712 = vmatprep.subr.msk.mxu1 %vm352_vm0, %v6484_v57 }
0x1283   : > { %9713 = vmatpush3.xpose.msk.msra.mxu1 %vm352_vm0, %v6484_v57 }
0x1286   : > { %9715 = vmatmul.mubr.msk.f32.vlgmr.msra.gmra.mxu1 %vm352_vm0, %v10296_v14 }
0x1287   : > { %9728 = vmatprep.mubr.msk.f32.mxu1 %vm352_vm0, %v10991_v1 }
0x133e   : > { %v9702_v30 = vpop.f32.mrf.mxu1 }
0x133f   : > { %9703 = vmatprep.subr.msk.mxu0 %vm352_vm0, %v9702_v30 }
0x1340   : > { %v6378_v0 = vpop.f32.mrf.mxu1  ;;  %9704 = vmatpush3.xpose.msk.msra.mxu0 %vm352_vm0, %v9702_v30 }
0x1341   : > { %9705 = vmatprep.subr.msk.mxu0 %vm352_vm0, %v6378_v0 }
0x1344   : > { %9706 = vmatpush3.xpose.msk.msra.mxu0 %vm352_vm0, %v6378_v0 }
0x1346   : > { %v9716_v36 = vpop.f32.mrf.mxu1 }
0x1347   : > { %9708 = vmatmul.mubr.msk.f32.vlgmr.msra.gmra.mxu0 %vm352_vm0, %v11008_v35  ;;  %9717 = vmatprep.subr.msk.mxu0 %vm352_vm0, %v9716_v36 }
0x1348   : > { %v6558_v51 = vpop.f32.mrf.mxu1  ;;  %9718 = vmatpush3.xpose.msk.msra.mxu0 %vm352_vm0, %v9716_v36  ;;  %9721 = vmatprep.mubr.msk.f32.mxu0 %vm352_vm0, %v10285_v13  ;;  %v7002_v36 = vmul.f32 %v11570_v32, %v10498_v37 }
0x1349   : > { %9719 = vmatprep.subr.msk.mxu0 %vm352_vm0, %v6558_v51 }
0x134c   : > { %9720 = vmatpush3.xpose.msk.msra.mxu0 %vm352_vm0, %v6558_v51 }
0x134d   : > { %9731 = vmatprep.subr.msk.mxu0 %vm352_vm0, %v6746_v49 }
0x134f   : > { %9722 = vmatmul.mubr.msk.f32.vlgmr.msra.gmra.mxu0 %vm352_vm0, %v10296_v14 }
0x1350   : > { %9732 = vmatpush3.xpose.msk.msra.mxu0 %vm352_vm0, %v6746_v49  ;;  %9735 = vmatprep.mubr.msk.f32.mxu0 %vm352_vm0, %v10285_v13 }
0x1351   : > { %9733 = vmatprep.subr.msk.mxu0 %vm352_vm0, %v6745_v63 }
0x1354   : > { %9734 = vmatpush3.xpose.msk.msra.mxu0 %vm352_vm0, %v6745_v63 }
0x1357   : > { %9736 = vmatmul.mubr.msk.f32.vlgmr.msra.gmra.mxu0 %vm352_vm0, %v10296_v14 }
0x1358   : > { %9749 = vmatprep.mubr.msk.f32.mxu0 %vm352_vm0, %v10991_v1 }
0x1407   : > { %v9709_v2 = vpop.f32.mrf.mxu0 }
0x1408   : > { %v11661_v12 = vadd.f32 %v9709_v2, %v11361_v25  ;;  %v6994_v25 = vmul.f32 %v11554_v60, %v12070_v9 }
0x1409   : > { %v6459_v53 = vpop.f32.mrf.mxu0 }
0x140a   : > { %v11664_v57 = vadd.f32 %v6459_v53, %v11368_v11  ;;  %v6997_v11 = vadd.f32 %v6995_v7, %v6993_v21  ;;  %v6996_v62 = vadd.f32 %v6994_v25, %v6992_v4 }
0x140c   : > { %v7001_v31 = vadd.f32 %v6999_v42, %v6997_v11  ;;  %v7000_v44 = vadd.f32 %v6998_v20, %v6996_v62 }
0x140e   : > { %v7005_v29 = vadd.f32 %v7003_v15, %v7001_v31  ;;  %v7004_v22 = vadd.f32 %v7002_v36, %v7000_v44 }
0x140f   : > { %v9723_v30 = vpop.f32.mrf.mxu0 }
0x1410   : > { %9724 = vmatprep.subr.msk.mxu1 %vm352_vm0, %v9723_v30  ;;  %v7007_v51 = vadd.f32 %v7005_v29, %v10514_v55  ;;  %v7006_v49 = vadd.f32 %v7004_v22, %v10514_v55 }
0x1411   : > { %v6639_v0 = vpop.f32.mrf.mxu0  ;;  %9725 = vmatpush3.xpose.msk.msra.mxu1 %vm352_vm0, %v9723_v30 }
0x1412   : > { %9726 = vmatprep.subr.msk.mxu1 %vm352_vm0, %v6639_v0 }
0x1415   : > { %9727 = vmatpush3.xpose.msk.msra.mxu1 %vm352_vm0, %v6639_v0 }
0x1417   : > { %v9737_v38 = vpop.f32.mrf.mxu0 }
0x1418   : > { %9729 = vmatmul.mubr.msk.f32.vlgmr.msra.gmra.mxu1 %vm352_vm0, %v11008_v35  ;;  %9738 = vmatprep.subr.msk.mxu1 %vm352_vm0, %v9737_v38 }
0x1419   : > { %v6819_v5 = vpop.f32.mrf.mxu0  ;;  %9739 = vmatpush3.xpose.msk.msra.mxu1 %vm352_vm0, %v9737_v38  ;;  %9742 = vmatprep.mubr.msk.f32.mxu1 %vm352_vm0, %v10285_v13 }
0x141a   : > { %9740 = vmatprep.subr.msk.mxu1 %vm352_vm0, %v6819_v5 }
0x141d   : > { %9741 = vmatpush3.xpose.msk.msra.mxu1 %vm352_vm0, %v6819_v5 }
0x141e   : > { %9752 = vmatprep.subr.msk.mxu1 %vm352_vm0, %v7007_v51 }
0x1420   : > { %9743 = vmatmul.mubr.msk.f32.vlgmr.msra.gmra.mxu1 %vm352_vm0, %v10296_v14 }
0x1421   : > { %9753 = vmatpush3.xpose.msk.msra.mxu1 %vm352_vm0, %v7007_v51  ;;  %9756 = vmatprep.mubr.msk.f32.mxu1 %vm352_vm0, %v10285_v13 }
0x1422   : > { %9754 = vmatprep.subr.msk.mxu1 %vm352_vm0, %v7006_v49 }
0x1425   : > { %9755 = vmatpush3.xpose.msk.msra.mxu1 %vm352_vm0, %v7006_v49 }
0x1428   : > { %9757 = vmatmul.mubr.msk.f32.vlgmr.msra.gmra.mxu1 %vm352_vm0, %v10296_v14 }
0x1429   : > { %9770 = vmatprep.mubr.msk.f32.mxu1 %vm352_vm0, %v10991_v1 }
0x14d8   : > { %v9730_v45 = vpop.f32.mrf.mxu1 }
0x14d9   : > { %v11709_v63 = vadd.f32 %v9730_v45, %v11417_v26 }
0x14da   : > { %v6720_v2 = vpop.f32.mrf.mxu1 }
0x14db   : > { %v11712_v53 = vadd.f32 %v6720_v2, %v11424_v54 }
0x14e0   : > { %v9744_v21 = vpop.f32.mrf.mxu1 }
0x14e1   : > { %9745 = vmatprep.subr.msk.mxu0 %vm352_vm0, %v9744_v21 }
0x14e2   : > { %v6900_v7 = vpop.f32.mrf.mxu1  ;;  %9746 = vmatpush3.xpose.msk.msra.mxu0 %vm352_vm0, %v9744_v21 }
0x14e3   : > { %9747 = vmatprep.subr.msk.mxu0 %vm352_vm0, %v6900_v7 }
0x14e6   : > { %9748 = vmatpush3.xpose.msk.msra.mxu0 %vm352_vm0, %v6900_v7 }
0x14e8   : > { %v9758_v30 = vpop.f32.mrf.mxu1 }
0x14e9   : > { %9750 = vmatmul.mubr.msk.f32.vlgmr.msra.gmra.mxu0 %vm352_vm0, %v11008_v35  ;;  %9759 = vmatprep.subr.msk.mxu0 %vm352_vm0, %v9758_v30 }
0x14ea   : > { %v7080_v26 = vpop.f32.mrf.mxu1  ;;  %9760 = vmatpush3.xpose.msk.msra.mxu0 %vm352_vm0, %v9758_v30  ;;  %9763 = vmatprep.mubr.msk.f32.mxu0 %vm352_vm0, %v10285_v13 }
0x14eb   : > { %9761 = vmatprep.subr.msk.mxu0 %vm352_vm0, %v7080_v26 }
0x14ee   : > { %9762 = vmatpush3.xpose.msk.msra.mxu0 %vm352_vm0, %v7080_v26 }
0x14ef   : > { %9773 = vmatprep.subr.msk.mxu0 %vm352_vm0, %v11536_v10 }
0x14f1   : > { %9764 = vmatmul.mubr.msk.f32.vlgmr.msra.gmra.mxu0 %vm352_vm0, %v10296_v14 }
0x14f2   : > { %9774 = vmatpush3.xpose.msk.msra.mxu0 %vm352_vm0, %v11536_v10  ;;  %9777 = vmatprep.mubr.msk.f32.mxu0 %vm352_vm0, %v10285_v13 }
0x14f3   : > { %9775 = vmatprep.subr.msk.mxu0 %vm352_vm0, %v11544_v58 }
0x14f6   : > { %9776 = vmatpush3.xpose.msk.msra.mxu0 %vm352_vm0, %v11544_v58 }
0x14f7   : > { %9787 = vmatprep.subr.msk.mxu0 %vm352_vm0, %v11548_v50 }
0x14f9   : > { %9778 = vmatmul.mubr.msk.f32.vlgmr.msra.gmra.mxu0 %vm352_vm0, %v10296_v14 }
0x14fa   : > { %9788 = vmatpush3.xpose.msk.msra.mxu0 %vm352_vm0, %v11548_v50  ;;  %9791 = vmatprep.mubr.msk.f32.mxu0 %vm352_vm0, %v10285_v13 }
0x14fb   : > { %9789 = vmatprep.subr.msk.mxu0 %vm352_vm0, %v11558_v61 }
0x14fe   : > { %9790 = vmatpush3.xpose.msk.msra.mxu0 %vm352_vm0, %v11558_v61 }
0x1501   : > { %9792 = vmatmul.mubr.msk.f32.vlgmr.msra.gmra.mxu0 %vm352_vm0, %v10296_v14 }
0x1502   : > { %9805 = vmatprep.mubr.msk.f32.mxu0 %vm352_vm0, %v10285_v13 }
0x15a9   : > { %v9751_v54 = vpop.f32.mrf.mxu0 }
0x15aa   : > { %v11755_v10 = vadd.f32 %v9751_v54, %v11467_v23 }
0x15ab   : > { %v6981_v58 = vpop.f32.mrf.mxu0 }
0x15ac   : > { %v11758_v50 = vadd.f32 %v6981_v58, %v11470_v47 }
0x15b1   : > { %v9765_v0 = vpop.f32.mrf.mxu0 }
0x15b2   : > { %9766 = vmatprep.subr.msk.mxu1 %vm352_vm0, %v9765_v0 }
0x15b3   : > { %v7161_v25 = vpop.f32.mrf.mxu0  ;;  %9767 = vmatpush3.xpose.msk.msra.mxu1 %vm352_vm0, %v9765_v0 }
0x15b4   : > { %9768 = vmatprep.subr.msk.mxu1 %vm352_vm0, %v7161_v25 }
0x15b7   : > { %9769 = vmatpush3.xpose.msk.msra.mxu1 %vm352_vm0, %v7161_v25 }
0x15b8   : > { %9780 = vmatprep.subr.msk.mxu1 %vm352_vm0, %v11546_v43 }
0x15ba   : > { %9771 = vmatmul.mubr.msk.f32.vlgmr.msra.gmra.mxu1 %vm352_vm0, %v11008_v35 }
0x15bb   : > { %9781 = vmatpush3.xpose.msk.msra.mxu1 %vm352_vm0, %v11546_v43  ;;  %9784 = vmatprep.mubr.msk.f32.mxu1 %vm352_vm0, %v10285_v13  ;;  %v9779_v43 = vpop.f32.mrf.mxu0 }
0x15bc   : > { %9782 = vmatprep.subr.msk.mxu1 %vm352_vm0, %v11554_v60  ;;  %v7758_v31 = vmul.f32 %v9779_v43, %v12063_v46 }
0x15bf   : > { %9783 = vmatpush3.xpose.msk.msra.mxu1 %vm352_vm0, %v11554_v60 }
0x15c0   : > { %9794 = vmatprep.subr.msk.mxu1 %vm352_vm0, %v11566_v33 }
0x15c2   : > { %9785 = vmatmul.mubr.msk.f32.vlgmr.msra.gmra.mxu1 %vm352_vm0, %v10296_v14 }
0x15c3   : > { %9795 = vmatpush3.xpose.msk.msra.mxu1 %vm352_vm0, %v11566_v33  ;;  %9798 = vmatprep.mubr.msk.f32.mxu1 %vm352_vm0, %v10285_v13  ;;  %v11798_v33 = vpop.f32.mrf.mxu0 }
0x15c4   : > { %9796 = vmatprep.subr.msk.mxu1 %vm352_vm0, %v11570_v32  ;;  %v7577_v29 = vmul.f32 %v11798_v33, %v12060_v18  ;;  %v7757_v21 = vmul.f32 %v11798_v33, %v12063_v46 }
0x15c5   : > { %v9793_v4 = vpop.f32.mrf.mxu0 }
0x15c6   : > { %v7584_v38 = vmul.f32 %v9793_v4, %v12062_v17  ;;  %v7764_v5 = vmul.f32 %v9793_v4, %v12065_v27 }
0x15c7   : > { %9797 = vmatpush3.xpose.msk.msra.mxu1 %vm352_vm0, %v11570_v32  ;;  %v7578_v32 = vmul.f32 %v9779_v43, %v12060_v18  ;;  %v7938_v18 = vmul.f32 %v9779_v43, %v12066_v8 }
0x15ca   : > { %9799 = vmatmul.mubr.msk.f32.vlgmr.msra.gmra.mxu1 %vm352_vm0, %v10296_v14 }
0x15cb   : > { %9812 = vmatprep.mubr.msk.f32.mxu1 %vm352_vm0, %v10991_v1 }
0x167a   : > { %v9772_v23 = vpop.f32.mrf.mxu1 }
0x167b   : > { %v11793_v47 = vadd.f32 %v9772_v23, %v11539_v34 }
0x167c   : > { %v7242_v60 = vpop.f32.mrf.mxu1 }
0x167d   : > { %v11796_v61 = vadd.f32 %v7242_v60, %v11542_v16  ;;  %v7487_v16 = vpop.f32.mrf.mxu0 }
0x167e   : > { %v7583_v44 = vmul.f32 %v7487_v16, %v12062_v17  ;;  %v7763_v54 = vmul.f32 %v7487_v16, %v12065_v27 }
0x1682   : > { %v9786_v42 = vpop.f32.mrf.mxu1 }
0x1683   : > { %v7580_v11 = vmul.f32 %v9786_v42, %v12061_v6  ;;  %v7760_v62 = vmul.f32 %v9786_v42, %v12064_v48  ;;  %v7940_v58 = vmul.f32 %v9786_v42, %v12067_v59 }
0x1684   : > { %v7406_v15 = vpop.f32.mrf.mxu1 }
0x1685   : > { %v7579_v20 = vmul.f32 %v7406_v15, %v12061_v6  ;;  %v7582_v34 = vadd.f32 %v7580_v11, %v7578_v32  ;;  %v7762_v22 = vadd.f32 %v7760_v62, %v7758_v31  ;;  %v7759_v6 = vmul.f32 %v7406_v15, %v12064_v48 }
0x1686   : > { %v7942_v11 = vadd.f32 %v7940_v58, %v7938_v18  ;;  %v7939_v27 = vmul.f32 %v7406_v15, %v12067_v59  ;;  %v7937_v31 = vmul.f32 %v11798_v33, %v12066_v8 }
0x1687   : > { %v7581_v36 = vadd.f32 %v7579_v20, %v7577_v29  ;;  %v7586_v49 = vadd.f32 %v7584_v38, %v7582_v34  ;;  %v7761_v48 = vadd.f32 %v7759_v6, %v7757_v21  ;;  %v7766_v0 = vadd.f32 %v7764_v5, %v7762_v22 }
0x1688   : > { %v8118_v38 = vmul.f32 %v9779_v43, %v12069_v24  ;;  %v7941_v59 = vadd.f32 %v7939_v27, %v7937_v31 }
0x1689   : > { %v7585_v26 = vadd.f32 %v7583_v44, %v7581_v36  ;;  %v7765_v20 = vadd.f32 %v7763_v54, %v7761_v48  ;;  %v7943_v36 = vmul.f32 %v7487_v16, %v12068_v19 }
0x168a   : > { %v9800_v51 = vpop.f32.mrf.mxu1 }
0x168b   : > { %v7588_v45 = vmul.f32 %v9800_v51, %v10354_v28  ;;  %v7768_v30 = vmul.f32 %v9800_v51, %v10396_v52  ;;  %v7948_v34 = vmul.f32 %v9800_v51, %v10442_v40  ;;  %v7945_v22 = vadd.f32 %v7943_v36, %v7941_v59 }
0x168c   : > { %v7568_v2 = vpop.f32.mrf.mxu1  ;;  %v8128_v6 = vmul.f32 %v9800_v51, %v10498_v37 }
0x168d   : > { %v7590_v7 = vadd.f32 %v7588_v45, %v7586_v49  ;;  %v7587_v17 = vmul.f32 %v7568_v2, %v10354_v28  ;;  %v7770_v60 = vadd.f32 %v7768_v30, %v7766_v0  ;;  %v7767_v46 = vmul.f32 %v7568_v2, %v10396_v52 }
0x168e   : > { %v7944_v28 = vmul.f32 %v9793_v4, %v12068_v19  ;;  %v7947_v8 = vmul.f32 %v7568_v2, %v10442_v40  ;;  %v8124_v19 = vmul.f32 %v9793_v4, %v12058_v41  ;;  %v8117_v40 = vmul.f32 %v11798_v33, %v12069_v24 }
0x168f   : > { %v7592_v25 = vadd.f32 %v7590_v7, %v10370_v39  ;;  %v7589_v23 = vadd.f32 %v7587_v17, %v7585_v26  ;;  %v7769_v52 = vadd.f32 %v7767_v46, %v7765_v20  ;;  %v7772_v62 = vadd.f32 %v7770_v60, %v10408_v3 }
0x1690   : > { %v7946_v29 = vadd.f32 %v7944_v28, %v7942_v11  ;;  %v7949_v49 = vadd.f32 %v7947_v8, %v7945_v22  ;;  %v8123_v7 = vmul.f32 %v7487_v16, %v12058_v41  ;;  %v8127_v4 = vmul.f32 %v7568_v2, %v10498_v37 }
0x1691   : > { %9801 = vmatprep.subr.msk.mxu0 %vm352_vm0, %v7592_v25  ;;  %v7591_v32 = vadd.f32 %v7589_v23, %v10370_v39  ;;  %v8120_v39 = vmul.f32 %v9786_v42, %v12070_v9  ;;  %v7771_v44 = vadd.f32 %v7769_v52, %v10408_v3  ;;  %v8119_v42 = vmul.f32 %v7406_v15, %v12070_v9 }
0x1692   : > { %9802 = vmatpush3.xpose.msk.msra.mxu0 %vm352_vm0, %v7592_v25  ;;  %v7950_v5 = vadd.f32 %v7948_v34, %v7946_v29  ;;  %v7951_v24 = vadd.f32 %v7949_v49, %v10458_v56 }
0x1693   : > { %9803 = vmatprep.subr.msk.mxu0 %vm352_vm0, %v7591_v32  ;;  %v8122_v43 = vadd.f32 %v8120_v39, %v8118_v38  ;;  %v8121_v45 = vadd.f32 %v8119_v42, %v8117_v40 }
0x1694   : > { %v7952_v3 = vadd.f32 %v7950_v5, %v10458_v56 }
0x1695   : > { %v8126_v21 = vadd.f32 %v8124_v19, %v8122_v43  ;;  %v8125_v33 = vadd.f32 %v8123_v7, %v8121_v45 }
0x1696   : > { %9804 = vmatpush3.xpose.msk.msra.mxu0 %vm352_vm0, %v7591_v32 }
0x1697   : > { %9815 = vmatprep.subr.msk.mxu0 %vm352_vm0, %v7772_v62  ;;  %v8130_v9 = vadd.f32 %v8128_v6, %v8126_v21  ;;  %v8129_v15 = vadd.f32 %v8127_v4, %v8125_v33 }
0x1699   : > { %9806 = vmatmul.mubr.msk.f32.vlgmr.msra.gmra.mxu0 %vm352_vm0, %v10296_v14  ;;  %v8132_v41 = vadd.f32 %v8130_v9, %v10514_v55  ;;  %v8131_v56 = vadd.f32 %v8129_v15, %v10514_v55 }
0x169a   : > { %9816 = vmatpush3.xpose.msk.msra.mxu0 %vm352_vm0, %v7772_v62  ;;  %9819 = vmatprep.mubr.msk.f32.mxu0 %vm352_vm0, %v10285_v13 }
0x169b   : > { %9817 = vmatprep.subr.msk.mxu0 %vm352_vm0, %v7771_v44 }
0x169e   : > { %9818 = vmatpush3.xpose.msk.msra.mxu0 %vm352_vm0, %v7771_v44 }
0x169f   : > { %9829 = vmatprep.subr.msk.mxu0 %vm352_vm0, %v7952_v3 }
0x16a1   : > { %9820 = vmatmul.mubr.msk.f32.vlgmr.msra.gmra.mxu0 %vm352_vm0, %v10296_v14 }
0x16a2   : > { %9830 = vmatpush3.xpose.msk.msra.mxu0 %vm352_vm0, %v7952_v3  ;;  %9833 = vmatprep.mubr.msk.f32.mxu0 %vm352_vm0, %v10285_v13 }
0x16a3   : > { %9831 = vmatprep.subr.msk.mxu0 %vm352_vm0, %v7951_v24 }
0x16a6   : > { %9832 = vmatpush3.xpose.msk.msra.mxu0 %vm352_vm0, %v7951_v24 }
0x16a7   : > { %9843 = vmatprep.subr.msk.mxu0 %vm352_vm0, %v8132_v41 }
0x16a9   : > { %9834 = vmatmul.mubr.msk.f32.vlgmr.msra.gmra.mxu0 %vm352_vm0, %v10296_v14 }
0x16aa   : > { %9844 = vmatpush3.xpose.msk.msra.mxu0 %vm352_vm0, %v8132_v41  ;;  %9847 = vmatprep.mubr.msk.f32.mxu0 %vm352_vm0, %v10285_v13 }
0x16ab   : > { %9845 = vmatprep.subr.msk.mxu0 %vm352_vm0, %v8131_v56 }
0x16ae   : > { %9846 = vmatpush3.xpose.msk.msra.mxu0 %vm352_vm0, %v8131_v56 }
0x16b1   : > { %9848 = vmatmul.mubr.msk.f32.vlgmr.msra.gmra.mxu0 %vm352_vm0, %v10296_v14 }
0x1759   : > { %v9807_v37 = vpop.f32.mrf.mxu0 }
0x175a   : > { %9808 = vmatprep.subr.msk.mxu1 %vm352_vm0, %v9807_v37 }
0x175b   : > { %v7665_v16 = vpop.f32.mrf.mxu0  ;;  %9809 = vmatpush3.xpose.msk.msra.mxu1 %vm352_vm0, %v9807_v37 }
0x175c   : > { %9810 = vmatprep.subr.msk.mxu1 %vm352_vm0, %v7665_v16 }
0x175f   : > { %9811 = vmatpush3.xpose.msk.msra.mxu1 %vm352_vm0, %v7665_v16 }
0x1761   : > { %v9821_v55 = vpop.f32.mrf.mxu0 }
0x1762   : > { %9813 = vmatmul.mubr.msk.f32.vlgmr.msra.gmra.mxu1 %vm352_vm0, %v11008_v35  ;;  %9822 = vmatprep.subr.msk.mxu1 %vm352_vm0, %v9821_v55 }
0x1763   : > { %v7845_v13 = vpop.f32.mrf.mxu0  ;;  %9823 = vmatpush3.xpose.msk.msra.mxu1 %vm352_vm0, %v9821_v55  ;;  %9826 = vmatprep.mubr.msk.f32.mxu1 %vm352_vm0, %v10991_v1 }
0x1764   : > { %9824 = vmatprep.subr.msk.mxu1 %vm352_vm0, %v7845_v13 }
0x1767   : > { %9825 = vmatpush3.xpose.msk.msra.mxu1 %vm352_vm0, %v7845_v13 }
0x1769   : > { %v9835_v14 = vpop.f32.mrf.mxu0 }
0x176a   : > { %9827 = vmatmul.mubr.msk.f32.vlgmr.msra.gmra.mxu1 %vm352_vm0, %v11008_v35  ;;  %9836 = vmatprep.subr.msk.mxu1 %vm352_vm0, %v9835_v14 }
0x176b   : > { %v8025_v51 = vpop.f32.mrf.mxu0  ;;  %9837 = vmatpush3.xpose.msk.msra.mxu1 %vm352_vm0, %v9835_v14  ;;  %9840 = vmatprep.mubr.msk.f32.mxu1 %vm352_vm0, %v10991_v1 }
0x176c   : > { %9838 = vmatprep.subr.msk.mxu1 %vm352_vm0, %v8025_v51 }
0x176f   : > { %9839 = vmatpush3.xpose.msk.msra.mxu1 %vm352_vm0, %v8025_v51 }
0x1771   : > { %v9849_v2 = vpop.f32.mrf.mxu0 }
0x1772   : > { %9841 = vmatmul.mubr.msk.f32.vlgmr.msra.gmra.mxu1 %vm352_vm0, %v11008_v35  ;;  %9850 = vmatprep.subr.msk.mxu1 %vm352_vm0, %v9849_v2 }
0x1773   : > { %v8205_v30 = vpop.f32.mrf.mxu0  ;;  %9851 = vmatpush3.xpose.msk.msra.mxu1 %vm352_vm0, %v9849_v2  ;;  %9854 = vmatprep.mubr.msk.f32.mxu1 %vm352_vm0, %v10991_v1 }
0x1774   : > { %9852 = vmatprep.subr.msk.mxu1 %vm352_vm0, %v8205_v30 }
0x1777   : > { %9853 = vmatpush3.xpose.msk.msra.mxu1 %vm352_vm0, %v8205_v30 }
0x177a   : > { %9855 = vmatmul.mubr.msk.f32.vlgmr.msra.gmra.mxu1 %vm352_vm0, %v11008_v35 }
0x1822   : > { %v9814_v18 = vpop.f32.mrf.mxu1 }
0x1823   : > { %v7756_v26 = vadd.f32 %v9814_v18, %v11661_v12 }
0x1824   : > { %v7746_v54 = vpop.f32.mrf.mxu1 }
0x1825   : > { %v8298_v17 = vmul.f32 0.125, %v7756_v26  ;;  %v7755_v58 = vadd.f32 %v7746_v54, %v11664_v57 }
0x1827   : > { %8300 = vst.msk [vmem:[%s11908_s22 + $0x8] sm:$0xff] %vm352_vm0, %v8298_v17  ;;  %v8297_v1 = vmul.f32 0.125, %v7755_v58 }
0x1829   : > { %8299 = vst.msk [vmem:[%s11908_s22] sm:$0xff] %vm352_vm0, %v8297_v1 }
0x182a   : > { %v9828_v35 = vpop.f32.mrf.mxu1 }
0x182b   : > { %v7936_v12 = vadd.f32 %v9828_v35, %v11709_v63 }
0x182c   : > { %v7926_v48 = vpop.f32.mrf.mxu1 }
0x182d   : > { %v8302_v57 = vmul.f32 0.125, %v7936_v12  ;;  %v7935_v0 = vadd.f32 %v7926_v48, %v11712_v53 }
0x182f   : > { %8833 = vst.msk [vmem:[%s11908_s22 + $0x18] sm:$0xff] %vm352_vm0, %v8302_v57  ;;  %v8301_v25 = vmul.f32 0.125, %v7935_v0 }
0x1831   : > { %8832 = vst.msk [vmem:[%s11908_s22 + $0x10] sm:$0xff] %vm352_vm0, %v8301_v25 }
0x1832   : > { %v9842_v23 = vpop.f32.mrf.mxu1 }
0x1833   : > { %v8116_v60 = vadd.f32 %v9842_v23, %v11755_v10 }
0x1834   : > { %v8106_v46 = vpop.f32.mrf.mxu1 }
0x1835   : > { %v8307_v32 = vmul.f32 0.125, %v8116_v60  ;;  %v8115_v63 = vadd.f32 %v8106_v46, %v11758_v50 }
0x1837   : > { %8835 = vst.msk [vmem:[%s11908_s22 + $0x28] sm:$0xff] %vm352_vm0, %v8307_v32  ;;  %v8306_v11 = vmul.f32 0.125, %v8115_v63 }
0x1839   : > { %8834 = vst.msk [vmem:[%s11908_s22 + $0x20] sm:$0xff] %vm352_vm0, %v8306_v11 }
0x183a   : > { %v9856_v53 = vpop.f32.mrf.mxu1 }
0x183b   : > { %v8296_v27 = vadd.f32 %v9856_v53, %v11793_v47 }
0x183c   : > { %v8286_v28 = vpop.f32.mrf.mxu1 }
0x183d   : > { %v8312_v10 = vmul.f32 0.125, %v8296_v27  ;;  %v8295_v20 = vadd.f32 %v8286_v28, %v11796_v61 }
0x183f   : > { %8837 = vst.msk [vmem:[%s11908_s22 + $0x38] sm:$0xff] %vm352_vm0, %v8312_v10  ;;  %v8311_v50 = vmul.f32 0.125, %v8295_v20 }
0x1841   : > { %8836 = vst.msk [vmem:[%s11908_s22 + $0x30] sm:$0xff] %vm352_vm0, %v8311_v50 }
0x1842   : > { %10004 = shalt.err (!%p10001_p8)
}
0x1843   : > { %s10005_s27 = scalar_lea.hbm %s11933_s5, 1024  ;;  %s10009_s28 = scalar_lea.hbm %s11985_s3, 2048 }
0x1844   : > { %p10006_p7 = scmp.ne.s32.totalorder %s11933_s5, %s10005_s27  ;;  %p10010_p6 = scmp.lt.s32.totalorder %s11933_s5, %s11985_s3 }
0x1845   : > { %p10011_p11 = scmp.lt.s32.totalorder %s10009_s28, %s10005_s27 }
0x1846   : > { %p10007_p12 = pnand %p10006_p7, %p12071_p10 }
0x1847   : > { %p10012_p13 = por %p10011_p11, %p10010_p6 }
0x1848   : > { %p10008_p9 = pneg %p10007_p12 }
0x184a   : > { %p10013_p3 = pnand %p10012_p13, %p10008_p9 }
0x184c   : > { %10016 = shalt.err (!%p10013_p3)
}
0x184d   : > { %s10072_s7 = smov 128   ;;  %s10073_s22 = smov 8  }
0x184e   : > { %9867 = dma.vmem_to_hbm [thread:$0]  (%p12071_p10), %s11935_s8, 1024, %s11933_s5, %s8317_s16, %s10072_s7, %s10072_s7, %s10073_s22  }
0x184f PF: > { %s8345_s26 = sand.u32 1, %s10051_s12   ;;  %p12072_p2 = scmp.ne.s32.totalorder %s12023_s25, 0 }
0x1850   : > { %p12073_p0 = scmp.ge.s32.totalorder %s10063_s15, 2  ;;  %s8346_s9 = scalar_lea.sflag [#allocation4], %s8345_s26 }
0x1852   : > { %p9881_p4 = pnand %p12073_p0, %p12072_p2 }
0x1854   : > { %p9882_p5 = pneg %p9881_p4 }
0x1856   : > { %10046 = dma.done.wait (%p9882_p5), %s8346_s9, 1024  }
0x1857   : > { %10048 = vsyncadd (%p9882_p5), %s8346_s9, 4294966272  ;;  %p18_p1 = scmp.ge.s32.totalorder %s10119_s18, 4   ;;  %s12074_s12 = smov %s10055_s13 }
0x1858   : > { %s12075_s13 = smov %s10059_s14  ;;  %s12076_s14 = smov %s10131_s21 }
0x1859   : > { %s12077_s15 = smov %s10119_s18  ;;  %20 = sbr.rel (!%p18_p1) target bundleno = 7 (0x7), region = 93 }
0x185e   :  { %8351 = vsyncpa [#allocation3], 1 }
0x185f   :  { %8353 = vsyncpa [#allocation3 + $0x1], 1 }
0x1860   :  { %8354 = vsyncpa [#allocation4], 1 }
0x1861   :  { %8356 = vsyncpa [#allocation4 + $0x1], 1 }
0x1862   :  { %8357 = vsyncpa [#allocation5], 1 }
0x1863   :  { %8359 = vsyncpa [#allocation5 + $0x1], 1 }
0x1864   :  { %8360 = vsyncpa [#allocation6], 1 }
0x1865   :  { %8362 = vsyncpa [#allocation6 + $0x1], 1 }

</bundles_post_ra>
